<compile_context>
chip_gen: v7x
topology: tpu7x:2x2x1
jax: 0.10.0
libtpu: 0.0.40
codegen_flags: <defaults>
</compile_context>

<pallas_src>
import jax
import jax.numpy as jnp
import numpy as np
from jax.experimental import pallas as pl
from jax.experimental.pallas import tpu as pltpu


# Static geometry implied by the module (16*4*4 flatten => 28x28 inputs).
H_IN = 28              # input spatial size (square)
KS = 5                 # conv kernel size
OH1 = H_IN - KS + 1    # 24  conv1 output spatial
PH1 = OH1 // 2         # 12  pool1 output spatial
OH2 = PH1 - KS + 1     # 8   conv2 output spatial
PH2 = OH2 // 2         # 4   pool2 output spatial
C1P = 8                # conv1 out-channels 6 padded to 8
XL = 3 * H_IN          # 84  input lanes           (c*28 + w)
L1 = C1P * PH1         # 96  conv1/pool1 lanes     (co*12 + pw)
L2 = 16 * PH2          # 64  conv2/pool2 lanes     (co*4  + pw)
NF1 = PH2 * L2         # 256 fc1 input width
NFO = 128              # padded fc1/fc2/output lane width


# ------------------------------ Pallas kernel ------------------------------

def _encoder_kernel(x_ref, w1e_ref, w1o_ref, b1_ref, w2e_ref, w2o_ref, b2_ref,
                    wf1_ref, bf1_ref, wf2_ref, bf2_ref, out_ref, p2f_ref):
    nb = x_ref.shape[0]
    f32 = jnp.float32
    b1 = b1_ref[...]                                       # (1, 96)
    b2 = b2_ref[...]                                       # (1, 64)

    for s in range(nb):        # static unroll over the samples of this block
        # ---- conv1: 5 banded matmuls (K=84); W-pool folded into even/odd
        #      weight copies; accumulators stay in vregs. ----
        acc_e = jnp.zeros((OH1, L1), f32)
        acc_o = jnp.zeros((OH1, L1), f32)
        for dh in range(KS):
            lhs = x_ref[s, dh:dh + OH1, :]                 # (24, 84) contiguous
            acc_e = acc_e + jnp.dot(lhs, w1e_ref[dh], preferred_element_type=f32)
            acc_o = acc_o + jnp.dot(lhs, w1o_ref[dh], preferred_element_type=f32)
        m = jnp.maximum(acc_e, acc_o).reshape(PH1, 2, L1)  # W-pool done
        p1 = jnp.maximum(jnp.maximum(m[:, 0, :], m[:, 1, :]) + b1, 0.0)   # (12, 96)

        # ---- conv2: same scheme (K=96) on the register-resident pool1 value ----
        acc_e = jnp.zeros((OH2, L2), f32)
        acc_o = jnp.zeros((OH2, L2), f32)
        for dh in range(KS):
            lhs = p1[dh:dh + OH2, :]                       # (8, 96)
            acc_e = acc_e + jnp.dot(lhs, w2e_ref[dh], preferred_element_type=f32)
            acc_o = acc_o + jnp.dot(lhs, w2o_ref[dh], preferred_element_type=f32)
        m = jnp.maximum(acc_e, acc_o).reshape(PH2, 2, L2)
        p2 = jnp.maximum(jnp.maximum(m[:, 0, :], m[:, 1, :]) + b2, 0.0)   # (4, 64)

        # ---- assemble this sample's lane-dense fc1 input row (torch's NCHW
        #      flatten is folded into wf1's row permutation at prepare time) ----
        for ph in range(PH2):
            p2f_ref[s:s + 1, ph * L2:(ph + 1) * L2] = p2[ph:ph + 1, :]

    # ---- fc1 + fc2 for the whole batch block: single K=256 / K=128 dots ----
    h = jnp.dot(p2f_ref[...], wf1_ref[...], preferred_element_type=f32) + bf1_ref[...]
    h = jnp.maximum(h, 0.0)                                # (nb, 128)
    y = jnp.dot(h, wf2_ref[...], preferred_element_type=f32) + bf2_ref[...]
    out_ref[...] = jnp.maximum(y, 0.0)                     # (nb, 128) lane-dense


# ------------------------------- JAX wrapper --------------------------------

def prepare_params(p):
    """One-time host-side re-layout of torch-style params for the kernel."""
    w1 = np.asarray(p["conv1_w"], np.float32)      # (6, 3, 5, 5)   OIHW
    b1 = np.asarray(p["conv1_b"], np.float32)      # (6,)
    w2 = np.asarray(p["conv2_w"], np.float32)      # (16, 6, 5, 5)
    b2 = np.asarray(p["conv2_b"], np.float32)      # (16,)
    f1w = np.asarray(p["fc1_w"], np.float32)       # (120, 256)
    f1b = np.asarray(p["fc1_b"], np.float32)       # (120,)
    f2w = np.asarray(p["fc2_w"], np.float32)       # (84, 120)
    f2b = np.asarray(p["fc2_b"], np.float32)       # (84,)

    # conv1 banded/Toeplitz weights, one per kernel row dh, with the 2x2-pool's
    # W selection folded in.  rows = c*28 + w, cols = co*12 + pw.
    w1e = np.zeros((KS, XL, L1), np.float32)
    w1o = np.zeros((KS, XL, L1), np.float32)
    for dh in range(KS):
        for co in range(6):
            for c in range(3):
                for pw in range(PH1):
                    for dw in range(KS):
                        v = w1[co, c, dh, dw]
                        w1e[dh, c * H_IN + 2 * pw + dw,     co * PH1 + pw] = v
                        w1o[dh, c * H_IN + 2 * pw + 1 + dw, co * PH1 + pw] = v
    b1p = np.zeros((1, L1), np.float32)
    for co in range(6):
        b1p[0, co * PH1:(co + 1) * PH1] = b1[co]

    # conv2: rows = c*12 + w (in-channels padded 6->8 stay zero),
    # cols = co*4 + pw.
    w2e = np.zeros((KS, L1, L2), np.float32)
    w2o = np.zeros((KS, L1, L2), np.float32)
    for dh in range(KS):
        for co in range(16):
            for c in range(6):
                for pw in range(PH2):
                    for dw in range(KS):
                        v = w2[co, c, dh, dw]
                        w2e[dh, c * PH1 + 2 * pw + dw,     co * PH2 + pw] = v
                        w2o[dh, c * PH1 + 2 * pw + 1 + dw, co * PH2 + pw] = v
    b2p = np.zeros((1, L2), np.float32)
    for co in range(16):
        b2p[0, co * PH2:(co + 1) * PH2] = b2[co]

    # fc1: kernel column k = ph*64 + co*4 + pw ; torch column = co*16 + ph*4 + pw.
    a = f1w.reshape(120, 16, PH2, PH2)                        # [f, co, ph, pw]
    wf1 = np.transpose(a, (2, 1, 3, 0)).reshape(NF1, 120)     # [ph, co, pw, f]
    wf1 = np.pad(wf1, ((0, 0), (0, NFO - 120)))               # (256, 128)
    bf1 = np.pad(f1b, (0, NFO - 120)).reshape(1, NFO)

    wf2 = np.pad(f2w.T, ((0, NFO - 120), (0, NFO - 84)))      # (128, 128)
    bf2 = np.pad(f2b, (0, NFO - 84)).reshape(1, NFO)

    arrs = dict(w1e=w1e, w1o=w1o, b1=b1p, w2e=w2e, w2o=w2o, b2=b2p,
                wf1=wf1, bf1=bf1, wf2=wf2, bf2=bf2)
    return {k: jnp.asarray(v) for k, v in arrs.items()}


@jax.jit
def base_encoder_forward(x_nchw, prep):
    n, c, h, w = x_nchw.shape
    assert (c, h, w) == (3, H_IN, H_IN), "BaseEncoder expects 3x28x28 inputs"
    # Lane-dense input: (n, 28, 84), lanes ordered (channel, width).
    x_ld = jnp.transpose(x_nchw.astype(jnp.float32), (0, 2, 1, 3)).reshape(n, H_IN, XL)

    # Batch tiling: whole batch in one block when small; otherwise tiles of 8
    # samples over a "parallel" grid axis (v7x: split across both TensorCores,
    # and per-block VMEM stays far below the 64 MiB ceiling).
    if n <= 8:
        nb, n_pad = n, n
    else:
        nb = 8
        n_pad = ((n + 7) // 8) * 8
        x_ld = jnp.pad(x_ld, ((0, n_pad - n), (0, 0), (0, 0)))

    out = pl.pallas_call(
        _encoder_kernel,
        out_shape=jax.ShapeDtypeStruct((n_pad, NFO), jnp.float32),
        grid_spec=pltpu.PrefetchScalarGridSpec(
            num_scalar_prefetch=0,
            grid=(n_pad // nb,),
            in_specs=[
                pl.BlockSpec((nb, H_IN, XL), lambda i: (i, 0, 0)),   # x
                pl.BlockSpec((KS, XL, L1), lambda i: (0, 0, 0)),     # conv1 even
                pl.BlockSpec((KS, XL, L1), lambda i: (0, 0, 0)),     # conv1 odd
                pl.BlockSpec((1, L1), lambda i: (0, 0)),             # conv1 bias
                pl.BlockSpec((KS, L1, L2), lambda i: (0, 0, 0)),     # conv2 even
                pl.BlockSpec((KS, L1, L2), lambda i: (0, 0, 0)),     # conv2 odd
                pl.BlockSpec((1, L2), lambda i: (0, 0)),             # conv2 bias
                pl.BlockSpec((NF1, NFO), lambda i: (0, 0)),          # fc1 weight
                pl.BlockSpec((1, NFO), lambda i: (0, 0)),            # fc1 bias
                pl.BlockSpec((NFO, NFO), lambda i: (0, 0)),          # fc2 weight
                pl.BlockSpec((1, NFO), lambda i: (0, 0)),            # fc2 bias
            ],
            out_specs=pl.BlockSpec((nb, NFO), lambda i: (i, 0)),
            scratch_shapes=[pltpu.VMEM((nb, NF1), jnp.float32)],     # fc1 input
        ),
        compiler_params=pltpu.CompilerParams(
            dimension_semantics=("parallel",)),
    )(x_ld, prep["w1e"], prep["w1o"], prep["b1"],
      prep["w2e"], prep["w2o"], prep["b2"],
      prep["wf1"], prep["bf1"], prep["wf2"], prep["bf2"])
    return out[:n, :84]


# --------------------------- init + pure-JAX reference ----------------------

def init_params(key):
    """Deterministic init matching the PyTorch module's parameter shapes."""
    ks = jax.random.split(key, 8)

    def unif(k, shape, fan_in):
        bound = 1.0 / jnp.sqrt(jnp.float32(fan_in))
        return jax.random.uniform(k, shape, jnp.float32, -bound, bound)

    return {
        "conv1_w": unif(ks[0], (6, 3, 5, 5), 3 * 5 * 5),
        "conv1_b": unif(ks[1], (6,), 3 * 5 * 5),
        "conv2_w": unif(ks[2], (16, 6, 5, 5), 6 * 5 * 5),
        "conv2_b": unif(ks[3], (16,), 6 * 5 * 5),
        "fc1_w": unif(ks[4], (120, 16 * 4 * 4), 16 * 4 * 4),
        "fc1_b": unif(ks[5], (120,), 16 * 4 * 4),
        "fc2_w": unif(ks[6], (84, 120), 120),
        "fc2_b": unif(ks[7], (84,), 120),
    }


def _reference_forward(x_nchw, p):
    """Pure-XLA reference mirroring the torch forward (for a sanity check)."""
    hp = jax.lax.Precision.HIGHEST
    x = x_nchw.astype(jnp.float32)
    dn = ("NCHW", "OIHW", "NCHW")
    y = jax.lax.conv_general_dilated(x, p["conv1_w"], (1, 1), "VALID",
                                     dimension_numbers=dn, precision=hp)
    y = jax.nn.relu(y + p["conv1_b"][None, :, None, None])
    y = jax.lax.reduce_window(y, -jnp.inf, jax.lax.max,
                              (1, 1, 2, 2), (1, 1, 2, 2), "VALID")
    y = jax.lax.conv_general_dilated(y, p["conv2_w"], (1, 1), "VALID",
                                     dimension_numbers=dn, precision=hp)
    y = jax.nn.relu(y + p["conv2_b"][None, :, None, None])
    y = jax.lax.reduce_window(y, -jnp.inf, jax.lax.max,
                              (1, 1, 2, 2), (1, 1, 2, 2), "VALID")
    y = y.reshape(y.shape[0], -1)                 # NCHW flatten, like torch
    y = jax.nn.relu(jnp.dot(y, p["fc1_w"].T, precision=hp) + p["fc1_b"])
    y = jax.nn.relu(jnp.dot(y, p["fc2_w"].T, precision=hp) + p["fc2_b"])
    return y


if __name__ == "__main__":
    key = jax.random.PRNGKey(0)
    k_x, k_p = jax.random.split(key)

    # Input must be 3x28x28 so the flatten matches 16*4*4 = 256 features.
    x = jax.random.normal(k_x, (2, 3, 28, 28), dtype=jnp.float32)
    params = init_params(k_p)
    prep = prepare_params(params)

    out = jax.block_until_ready(base_encoder_forward(x, prep))
    assert out.shape == (2, 84), out.shape
    assert bool(jnp.all(jnp.isfinite(out)))

    ref = jax.block_until_ready(_reference_forward(x, params))
    # All-f32 path typically lands ~1e-5; 1e-3 leaves margin for MXU f32-pass
    # reassociation while still catching any layout / permutation bug (O(0.1)).
    err = float(jnp.max(jnp.abs(out - ref)))
    assert err < 1e-3, f"mismatch vs reference: max abs err = {err}"

    print("KERNEL_OK")
</pallas_src>

<mosaic_0001>
module attributes {stable_mosaic.version = 11 : i64} {
  func.func @_encoder_kernel(%arg0: i32, %arg1: memref<2x28x84xf32, #tpu.memory_space<vmem>>, %arg2: memref<5x84x96xf32, #tpu.memory_space<vmem>>, %arg3: memref<5x84x96xf32, #tpu.memory_space<vmem>>, %arg4: memref<1x96xf32, #tpu.memory_space<vmem>>, %arg5: memref<5x96x64xf32, #tpu.memory_space<vmem>>, %arg6: memref<5x96x64xf32, #tpu.memory_space<vmem>>, %arg7: memref<1x64xf32, #tpu.memory_space<vmem>>, %arg8: memref<256x128xf32, #tpu.memory_space<vmem>>, %arg9: memref<1x128xf32, #tpu.memory_space<vmem>>, %arg10: memref<128x128xf32, #tpu.memory_space<vmem>>, %arg11: memref<1x128xf32, #tpu.memory_space<vmem>>, %arg12: memref<2x128xf32, #tpu.memory_space<vmem>>, %arg13: memref<2x256xf32, #tpu.memory_space<vmem>>) attributes {dimension_semantics = [#tpu.dimension_semantics<parallel>], iteration_bounds = array<i64: 1>, scalar_prefetch = 0 : i64, scratch_operands = 1 : i64, tpu.core_type = #tpu.core_type<tc>, window_params = [{transform_indices = @transform_0, window_bounds = array<i64: 2, 28, 84>}, {pipeline_mode = #tpu.pipeline_mode<synchronous>, transform_indices = @transform_1, window_bounds = array<i64: 5, 84, 96>}, {pipeline_mode = #tpu.pipeline_mode<synchronous>, transform_indices = @transform_2, window_bounds = array<i64: 5, 84, 96>}, {pipeline_mode = #tpu.pipeline_mode<synchronous>, transform_indices = @transform_3, window_bounds = array<i64: 1, 96>}, {pipeline_mode = #tpu.pipeline_mode<synchronous>, transform_indices = @transform_4, window_bounds = array<i64: 5, 96, 64>}, {pipeline_mode = #tpu.pipeline_mode<synchronous>, transform_indices = @transform_5, window_bounds = array<i64: 5, 96, 64>}, {pipeline_mode = #tpu.pipeline_mode<synchronous>, transform_indices = @transform_6, window_bounds = array<i64: 1, 64>}, {pipeline_mode = #tpu.pipeline_mode<synchronous>, transform_indices = @transform_7, window_bounds = array<i64: 256, 128>}, {pipeline_mode = #tpu.pipeline_mode<synchronous>, transform_indices = @transform_8, window_bounds = array<i64: 1, 128>}, {pipeline_mode = #tpu.pipeline_mode<synchronous>, transform_indices = @transform_9, window_bounds = array<i64: 128, 128>}, {pipeline_mode = #tpu.pipeline_mode<synchronous>, transform_indices = @transform_10, window_bounds = array<i64: 1, 128>}, {transform_indices = @transform_11, window_bounds = array<i64: 2, 128>}]} {
    %c0 = arith.constant 0 : index
    %c0_0 = arith.constant 0 : index
    %0 = vector.load %arg4[%c0, %c0_0] : memref<1x96xf32, #tpu.memory_space<vmem>>, vector<1x96xf32>
    %c0_1 = arith.constant 0 : index
    %c0_2 = arith.constant 0 : index
    %1 = vector.load %arg7[%c0_1, %c0_2] : memref<1x64xf32, #tpu.memory_space<vmem>>, vector<1x64xf32>
    %cst = arith.constant 0.000000e+00 : f32
    %2 = vector.broadcast %cst : f32 to vector<24x96xf32>
    %cst_3 = arith.constant 0.000000e+00 : f32
    %3 = vector.broadcast %cst_3 : f32 to vector<24x96xf32>
    %c0_4 = arith.constant 0 : index
    %c0_5 = arith.constant 0 : index
    %c0_6 = arith.constant 0 : index
    %4 = vector.load %arg1[%c0_4, %c0_5, %c0_6] : memref<2x28x84xf32, #tpu.memory_space<vmem>>, vector<1x24x84xf32>
    %5 = vector.shape_cast %4 : vector<1x24x84xf32> to vector<24x84xf32>
    %c0_7 = arith.constant 0 : index
    %c0_8 = arith.constant 0 : index
    %c0_9 = arith.constant 0 : index
    %6 = vector.load %arg2[%c0_7, %c0_8, %c0_9] : memref<5x84x96xf32, #tpu.memory_space<vmem>>, vector<1x84x96xf32>
    %7 = vector.shape_cast %6 : vector<1x84x96xf32> to vector<84x96xf32>
    %cst_10 = arith.constant dense<0.000000e+00> : vector<24x96xf32>
    %8 = tpu.matmul %5, %7, %cst_10 {dimension_numbers = #tpu.dot_dimension_numbers<[1], [0], [0], [1], [0, 0, 1, 1], [], []>} : vector<24x84xf32>, vector<84x96xf32>, vector<24x96xf32> -> vector<24x96xf32>
    %9 = arith.addf %2, %8 : vector<24x96xf32>
    %c0_11 = arith.constant 0 : index
    %c0_12 = arith.constant 0 : index
    %c0_13 = arith.constant 0 : index
    %10 = vector.load %arg3[%c0_11, %c0_12, %c0_13] : memref<5x84x96xf32, #tpu.memory_space<vmem>>, vector<1x84x96xf32>
    %11 = vector.shape_cast %10 : vector<1x84x96xf32> to vector<84x96xf32>
    %cst_14 = arith.constant dense<0.000000e+00> : vector<24x96xf32>
    %12 = tpu.matmul %5, %11, %cst_14 {dimension_numbers = #tpu.dot_dimension_numbers<[1], [0], [0], [1], [0, 0, 1, 1], [], []>} : vector<24x84xf32>, vector<84x96xf32>, vector<24x96xf32> -> vector<24x96xf32>
    %13 = arith.addf %3, %12 : vector<24x96xf32>
    %c0_15 = arith.constant 0 : index
    %c1 = arith.constant 1 : index
    %c0_16 = arith.constant 0 : index
    %14 = vector.load %arg1[%c0_15, %c1, %c0_16] : memref<2x28x84xf32, #tpu.memory_space<vmem>>, vector<1x24x84xf32>
    %15 = vector.shape_cast %14 : vector<1x24x84xf32> to vector<24x84xf32>
    %c1_17 = arith.constant 1 : index
    %c0_18 = arith.constant 0 : index
    %c0_19 = arith.constant 0 : index
    %16 = vector.load %arg2[%c1_17, %c0_18, %c0_19] : memref<5x84x96xf32, #tpu.memory_space<vmem>>, vector<1x84x96xf32>
    %17 = vector.shape_cast %16 : vector<1x84x96xf32> to vector<84x96xf32>
    %cst_20 = arith.constant dense<0.000000e+00> : vector<24x96xf32>
    %18 = tpu.matmul %15, %17, %cst_20 {dimension_numbers = #tpu.dot_dimension_numbers<[1], [0], [0], [1], [0, 0, 1, 1], [], []>} : vector<24x84xf32>, vector<84x96xf32>, vector<24x96xf32> -> vector<24x96xf32>
    %19 = arith.addf %9, %18 : vector<24x96xf32>
    %c1_21 = arith.constant 1 : index
    %c0_22 = arith.constant 0 : index
    %c0_23 = arith.constant 0 : index
    %20 = vector.load %arg3[%c1_21, %c0_22, %c0_23] : memref<5x84x96xf32, #tpu.memory_space<vmem>>, vector<1x84x96xf32>
    %21 = vector.shape_cast %20 : vector<1x84x96xf32> to vector<84x96xf32>
    %cst_24 = arith.constant dense<0.000000e+00> : vector<24x96xf32>
    %22 = tpu.matmul %15, %21, %cst_24 {dimension_numbers = #tpu.dot_dimension_numbers<[1], [0], [0], [1], [0, 0, 1, 1], [], []>} : vector<24x84xf32>, vector<84x96xf32>, vector<24x96xf32> -> vector<24x96xf32>
    %23 = arith.addf %13, %22 : vector<24x96xf32>
    %c0_25 = arith.constant 0 : index
    %c2 = arith.constant 2 : index
    %c0_26 = arith.constant 0 : index
    %24 = vector.load %arg1[%c0_25, %c2, %c0_26] : memref<2x28x84xf32, #tpu.memory_space<vmem>>, vector<1x24x84xf32>
    %25 = vector.shape_cast %24 : vector<1x24x84xf32> to vector<24x84xf32>
    %c2_27 = arith.constant 2 : index
    %c0_28 = arith.constant 0 : index
    %c0_29 = arith.constant 0 : index
    %26 = vector.load %arg2[%c2_27, %c0_28, %c0_29] : memref<5x84x96xf32, #tpu.memory_space<vmem>>, vector<1x84x96xf32>
    %27 = vector.shape_cast %26 : vector<1x84x96xf32> to vector<84x96xf32>
    %cst_30 = arith.constant dense<0.000000e+00> : vector<24x96xf32>
    %28 = tpu.matmul %25, %27, %cst_30 {dimension_numbers = #tpu.dot_dimension_numbers<[1], [0], [0], [1], [0, 0, 1, 1], [], []>} : vector<24x84xf32>, vector<84x96xf32>, vector<24x96xf32> -> vector<24x96xf32>
    %29 = arith.addf %19, %28 : vector<24x96xf32>
    %c2_31 = arith.constant 2 : index
    %c0_32 = arith.constant 0 : index
    %c0_33 = arith.constant 0 : index
    %30 = vector.load %arg3[%c2_31, %c0_32, %c0_33] : memref<5x84x96xf32, #tpu.memory_space<vmem>>, vector<1x84x96xf32>
    %31 = vector.shape_cast %30 : vector<1x84x96xf32> to vector<84x96xf32>
    %cst_34 = arith.constant dense<0.000000e+00> : vector<24x96xf32>
    %32 = tpu.matmul %25, %31, %cst_34 {dimension_numbers = #tpu.dot_dimension_numbers<[1], [0], [0], [1], [0, 0, 1, 1], [], []>} : vector<24x84xf32>, vector<84x96xf32>, vector<24x96xf32> -> vector<24x96xf32>
    %33 = arith.addf %23, %32 : vector<24x96xf32>
    %c0_35 = arith.constant 0 : index
    %c3 = arith.constant 3 : index
    %c0_36 = arith.constant 0 : index
    %34 = vector.load %arg1[%c0_35, %c3, %c0_36] : memref<2x28x84xf32, #tpu.memory_space<vmem>>, vector<1x24x84xf32>
    %35 = vector.shape_cast %34 : vector<1x24x84xf32> to vector<24x84xf32>
    %c3_37 = arith.constant 3 : index
    %c0_38 = arith.constant 0 : index
    %c0_39 = arith.constant 0 : index
    %36 = vector.load %arg2[%c3_37, %c0_38, %c0_39] : memref<5x84x96xf32, #tpu.memory_space<vmem>>, vector<1x84x96xf32>
    %37 = vector.shape_cast %36 : vector<1x84x96xf32> to vector<84x96xf32>
    %cst_40 = arith.constant dense<0.000000e+00> : vector<24x96xf32>
    %38 = tpu.matmul %35, %37, %cst_40 {dimension_numbers = #tpu.dot_dimension_numbers<[1], [0], [0], [1], [0, 0, 1, 1], [], []>} : vector<24x84xf32>, vector<84x96xf32>, vector<24x96xf32> -> vector<24x96xf32>
    %39 = arith.addf %29, %38 : vector<24x96xf32>
    %c3_41 = arith.constant 3 : index
    %c0_42 = arith.constant 0 : index
    %c0_43 = arith.constant 0 : index
    %40 = vector.load %arg3[%c3_41, %c0_42, %c0_43] : memref<5x84x96xf32, #tpu.memory_space<vmem>>, vector<1x84x96xf32>
    %41 = vector.shape_cast %40 : vector<1x84x96xf32> to vector<84x96xf32>
    %cst_44 = arith.constant dense<0.000000e+00> : vector<24x96xf32>
    %42 = tpu.matmul %35, %41, %cst_44 {dimension_numbers = #tpu.dot_dimension_numbers<[1], [0], [0], [1], [0, 0, 1, 1], [], []>} : vector<24x84xf32>, vector<84x96xf32>, vector<24x96xf32> -> vector<24x96xf32>
    %43 = arith.addf %33, %42 : vector<24x96xf32>
    %c0_45 = arith.constant 0 : index
    %c4 = arith.constant 4 : index
    %c0_46 = arith.constant 0 : index
    %44 = vector.load %arg1[%c0_45, %c4, %c0_46] : memref<2x28x84xf32, #tpu.memory_space<vmem>>, vector<1x24x84xf32>
    %45 = vector.shape_cast %44 : vector<1x24x84xf32> to vector<24x84xf32>
    %c4_47 = arith.constant 4 : index
    %c0_48 = arith.constant 0 : index
    %c0_49 = arith.constant 0 : index
    %46 = vector.load %arg2[%c4_47, %c0_48, %c0_49] : memref<5x84x96xf32, #tpu.memory_space<vmem>>, vector<1x84x96xf32>
    %47 = vector.shape_cast %46 : vector<1x84x96xf32> to vector<84x96xf32>
    %cst_50 = arith.constant dense<0.000000e+00> : vector<24x96xf32>
    %48 = tpu.matmul %45, %47, %cst_50 {dimension_numbers = #tpu.dot_dimension_numbers<[1], [0], [0], [1], [0, 0, 1, 1], [], []>} : vector<24x84xf32>, vector<84x96xf32>, vector<24x96xf32> -> vector<24x96xf32>
    %49 = arith.addf %39, %48 : vector<24x96xf32>
    %c4_51 = arith.constant 4 : index
    %c0_52 = arith.constant 0 : index
    %c0_53 = arith.constant 0 : index
    %50 = vector.load %arg3[%c4_51, %c0_52, %c0_53] : memref<5x84x96xf32, #tpu.memory_space<vmem>>, vector<1x84x96xf32>
    %51 = vector.shape_cast %50 : vector<1x84x96xf32> to vector<84x96xf32>
    %cst_54 = arith.constant dense<0.000000e+00> : vector<24x96xf32>
    %52 = tpu.matmul %45, %51, %cst_54 {dimension_numbers = #tpu.dot_dimension_numbers<[1], [0], [0], [1], [0, 0, 1, 1], [], []>} : vector<24x84xf32>, vector<84x96xf32>, vector<24x96xf32> -> vector<24x96xf32>
    %53 = arith.addf %43, %52 : vector<24x96xf32>
    %54 = arith.maximumf %49, %53 : vector<24x96xf32>
    %55 = vector.shape_cast %54 : vector<24x96xf32> to vector<12x2x96xf32>
    %56 = vector.extract_strided_slice %55 {offsets = [0, 0, 0], sizes = [12, 1, 96], strides = [1, 1, 1]} : vector<12x2x96xf32> to vector<12x1x96xf32>
    %57 = vector.shape_cast %56 : vector<12x1x96xf32> to vector<12x96xf32>
    %58 = vector.extract_strided_slice %55 {offsets = [0, 1, 0], sizes = [12, 1, 96], strides = [1, 1, 1]} : vector<12x2x96xf32> to vector<12x1x96xf32>
    %59 = vector.shape_cast %58 : vector<12x1x96xf32> to vector<12x96xf32>
    %60 = arith.maximumf %57, %59 : vector<12x96xf32>
    %61 = vector.broadcast %0 : vector<1x96xf32> to vector<12x96xf32>
    %62 = arith.addf %60, %61 : vector<12x96xf32>
    %cst_55 = arith.constant 0.000000e+00 : f32
    %63 = vector.broadcast %cst_55 : f32 to vector<12x96xf32>
    %64 = arith.maximumf %62, %63 : vector<12x96xf32>
    %cst_56 = arith.constant 0.000000e+00 : f32
    %65 = vector.broadcast %cst_56 : f32 to vector<8x64xf32>
    %cst_57 = arith.constant 0.000000e+00 : f32
    %66 = vector.broadcast %cst_57 : f32 to vector<8x64xf32>
    %67 = vector.extract_strided_slice %64 {offsets = [0, 0], sizes = [8, 96], strides = [1, 1]} : vector<12x96xf32> to vector<8x96xf32>
    %c0_58 = arith.constant 0 : index
    %c0_59 = arith.constant 0 : index
    %c0_60 = arith.constant 0 : index
    %68 = vector.load %arg5[%c0_58, %c0_59, %c0_60] : memref<5x96x64xf32, #tpu.memory_space<vmem>>, vector<1x96x64xf32>
    %69 = vector.shape_cast %68 : vector<1x96x64xf32> to vector<96x64xf32>
    %cst_61 = arith.constant dense<0.000000e+00> : vector<8x64xf32>
    %70 = tpu.matmul %67, %69, %cst_61 {dimension_numbers = #tpu.dot_dimension_numbers<[1], [0], [0], [1], [0, 0, 1, 1], [], []>} : vector<8x96xf32>, vector<96x64xf32>, vector<8x64xf32> -> vector<8x64xf32>
    %71 = arith.addf %65, %70 : vector<8x64xf32>
    %c0_62 = arith.constant 0 : index
    %c0_63 = arith.constant 0 : index
    %c0_64 = arith.constant 0 : index
    %72 = vector.load %arg6[%c0_62, %c0_63, %c0_64] : memref<5x96x64xf32, #tpu.memory_space<vmem>>, vector<1x96x64xf32>
    %73 = vector.shape_cast %72 : vector<1x96x64xf32> to vector<96x64xf32>
    %cst_65 = arith.constant dense<0.000000e+00> : vector<8x64xf32>
    %74 = tpu.matmul %67, %73, %cst_65 {dimension_numbers = #tpu.dot_dimension_numbers<[1], [0], [0], [1], [0, 0, 1, 1], [], []>} : vector<8x96xf32>, vector<96x64xf32>, vector<8x64xf32> -> vector<8x64xf32>
    %75 = arith.addf %66, %74 : vector<8x64xf32>
    %76 = vector.extract_strided_slice %64 {offsets = [1, 0], sizes = [8, 96], strides = [1, 1]} : vector<12x96xf32> to vector<8x96xf32>
    %c1_66 = arith.constant 1 : index
    %c0_67 = arith.constant 0 : index
    %c0_68 = arith.constant 0 : index
    %77 = vector.load %arg5[%c1_66, %c0_67, %c0_68] : memref<5x96x64xf32, #tpu.memory_space<vmem>>, vector<1x96x64xf32>
    %78 = vector.shape_cast %77 : vector<1x96x64xf32> to vector<96x64xf32>
    %cst_69 = arith.constant dense<0.000000e+00> : vector<8x64xf32>
    %79 = tpu.matmul %76, %78, %cst_69 {dimension_numbers = #tpu.dot_dimension_numbers<[1], [0], [0], [1], [0, 0, 1, 1], [], []>} : vector<8x96xf32>, vector<96x64xf32>, vector<8x64xf32> -> vector<8x64xf32>
    %80 = arith.addf %71, %79 : vector<8x64xf32>
    %c1_70 = arith.constant 1 : index
    %c0_71 = arith.constant 0 : index
    %c0_72 = arith.constant 0 : index
    %81 = vector.load %arg6[%c1_70, %c0_71, %c0_72] : memref<5x96x64xf32, #tpu.memory_space<vmem>>, vector<1x96x64xf32>
    %82 = vector.shape_cast %81 : vector<1x96x64xf32> to vector<96x64xf32>
    %cst_73 = arith.constant dense<0.000000e+00> : vector<8x64xf32>
    %83 = tpu.matmul %76, %82, %cst_73 {dimension_numbers = #tpu.dot_dimension_numbers<[1], [0], [0], [1], [0, 0, 1, 1], [], []>} : vector<8x96xf32>, vector<96x64xf32>, vector<8x64xf32> -> vector<8x64xf32>
    %84 = arith.addf %75, %83 : vector<8x64xf32>
    %85 = vector.extract_strided_slice %64 {offsets = [2, 0], sizes = [8, 96], strides = [1, 1]} : vector<12x96xf32> to vector<8x96xf32>
    %c2_74 = arith.constant 2 : index
    %c0_75 = arith.constant 0 : index
    %c0_76 = arith.constant 0 : index
    %86 = vector.load %arg5[%c2_74, %c0_75, %c0_76] : memref<5x96x64xf32, #tpu.memory_space<vmem>>, vector<1x96x64xf32>
    %87 = vector.shape_cast %86 : vector<1x96x64xf32> to vector<96x64xf32>
    %cst_77 = arith.constant dense<0.000000e+00> : vector<8x64xf32>
    %88 = tpu.matmul %85, %87, %cst_77 {dimension_numbers = #tpu.dot_dimension_numbers<[1], [0], [0], [1], [0, 0, 1, 1], [], []>} : vector<8x96xf32>, vector<96x64xf32>, vector<8x64xf32> -> vector<8x64xf32>
    %89 = arith.addf %80, %88 : vector<8x64xf32>
    %c2_78 = arith.constant 2 : index
    %c0_79 = arith.constant 0 : index
    %c0_80 = arith.constant 0 : index
    %90 = vector.load %arg6[%c2_78, %c0_79, %c0_80] : memref<5x96x64xf32, #tpu.memory_space<vmem>>, vector<1x96x64xf32>
    %91 = vector.shape_cast %90 : vector<1x96x64xf32> to vector<96x64xf32>
    %cst_81 = arith.constant dense<0.000000e+00> : vector<8x64xf32>
    %92 = tpu.matmul %85, %91, %cst_81 {dimension_numbers = #tpu.dot_dimension_numbers<[1], [0], [0], [1], [0, 0, 1, 1], [], []>} : vector<8x96xf32>, vector<96x64xf32>, vector<8x64xf32> -> vector<8x64xf32>
    %93 = arith.addf %84, %92 : vector<8x64xf32>
    %94 = vector.extract_strided_slice %64 {offsets = [3, 0], sizes = [8, 96], strides = [1, 1]} : vector<12x96xf32> to vector<8x96xf32>
    %c3_82 = arith.constant 3 : index
    %c0_83 = arith.constant 0 : index
    %c0_84 = arith.constant 0 : index
    %95 = vector.load %arg5[%c3_82, %c0_83, %c0_84] : memref<5x96x64xf32, #tpu.memory_space<vmem>>, vector<1x96x64xf32>
    %96 = vector.shape_cast %95 : vector<1x96x64xf32> to vector<96x64xf32>
    %cst_85 = arith.constant dense<0.000000e+00> : vector<8x64xf32>
    %97 = tpu.matmul %94, %96, %cst_85 {dimension_numbers = #tpu.dot_dimension_numbers<[1], [0], [0], [1], [0, 0, 1, 1], [], []>} : vector<8x96xf32>, vector<96x64xf32>, vector<8x64xf32> -> vector<8x64xf32>
    %98 = arith.addf %89, %97 : vector<8x64xf32>
    %c3_86 = arith.constant 3 : index
    %c0_87 = arith.constant 0 : index
    %c0_88 = arith.constant 0 : index
    %99 = vector.load %arg6[%c3_86, %c0_87, %c0_88] : memref<5x96x64xf32, #tpu.memory_space<vmem>>, vector<1x96x64xf32>
    %100 = vector.shape_cast %99 : vector<1x96x64xf32> to vector<96x64xf32>
    %cst_89 = arith.constant dense<0.000000e+00> : vector<8x64xf32>
    %101 = tpu.matmul %94, %100, %cst_89 {dimension_numbers = #tpu.dot_dimension_numbers<[1], [0], [0], [1], [0, 0, 1, 1], [], []>} : vector<8x96xf32>, vector<96x64xf32>, vector<8x64xf32> -> vector<8x64xf32>
    %102 = arith.addf %93, %101 : vector<8x64xf32>
    %103 = vector.extract_strided_slice %64 {offsets = [4, 0], sizes = [8, 96], strides = [1, 1]} : vector<12x96xf32> to vector<8x96xf32>
    %c4_90 = arith.constant 4 : index
    %c0_91 = arith.constant 0 : index
    %c0_92 = arith.constant 0 : index
    %104 = vector.load %arg5[%c4_90, %c0_91, %c0_92] : memref<5x96x64xf32, #tpu.memory_space<vmem>>, vector<1x96x64xf32>
    %105 = vector.shape_cast %104 : vector<1x96x64xf32> to vector<96x64xf32>
    %cst_93 = arith.constant dense<0.000000e+00> : vector<8x64xf32>
    %106 = tpu.matmul %103, %105, %cst_93 {dimension_numbers = #tpu.dot_dimension_numbers<[1], [0], [0], [1], [0, 0, 1, 1], [], []>} : vector<8x96xf32>, vector<96x64xf32>, vector<8x64xf32> -> vector<8x64xf32>
    %107 = arith.addf %98, %106 : vector<8x64xf32>
    %c4_94 = arith.constant 4 : index
    %c0_95 = arith.constant 0 : index
    %c0_96 = arith.constant 0 : index
    %108 = vector.load %arg6[%c4_94, %c0_95, %c0_96] : memref<5x96x64xf32, #tpu.memory_space<vmem>>, vector<1x96x64xf32>
    %109 = vector.shape_cast %108 : vector<1x96x64xf32> to vector<96x64xf32>
    %cst_97 = arith.constant dense<0.000000e+00> : vector<8x64xf32>
    %110 = tpu.matmul %103, %109, %cst_97 {dimension_numbers = #tpu.dot_dimension_numbers<[1], [0], [0], [1], [0, 0, 1, 1], [], []>} : vector<8x96xf32>, vector<96x64xf32>, vector<8x64xf32> -> vector<8x64xf32>
    %111 = arith.addf %102, %110 : vector<8x64xf32>
    %112 = arith.maximumf %107, %111 : vector<8x64xf32>
    %113 = vector.shape_cast %112 : vector<8x64xf32> to vector<4x2x64xf32>
    %114 = vector.extract_strided_slice %113 {offsets = [0, 0, 0], sizes = [4, 1, 64], strides = [1, 1, 1]} : vector<4x2x64xf32> to vector<4x1x64xf32>
    %115 = vector.shape_cast %114 : vector<4x1x64xf32> to vector<4x64xf32>
    %116 = vector.extract_strided_slice %113 {offsets = [0, 1, 0], sizes = [4, 1, 64], strides = [1, 1, 1]} : vector<4x2x64xf32> to vector<4x1x64xf32>
    %117 = vector.shape_cast %116 : vector<4x1x64xf32> to vector<4x64xf32>
    %118 = arith.maximumf %115, %117 : vector<4x64xf32>
    %119 = vector.broadcast %1 : vector<1x64xf32> to vector<4x64xf32>
    %120 = arith.addf %118, %119 : vector<4x64xf32>
    %cst_98 = arith.constant 0.000000e+00 : f32
    %121 = vector.broadcast %cst_98 : f32 to vector<4x64xf32>
    %122 = arith.maximumf %120, %121 : vector<4x64xf32>
    %123 = vector.extract_strided_slice %122 {offsets = [0, 0], sizes = [1, 64], strides = [1, 1]} : vector<4x64xf32> to vector<1x64xf32>
    %c0_99 = arith.constant 0 : index
    %c0_100 = arith.constant 0 : index
    %124 = vector.load %arg13[%c0_99, %c0_100] : memref<2x256xf32, #tpu.memory_space<vmem>>, vector<1x64xf32>
    tpu.vector_store %arg13[%c0_99, %c0_100], %123 {strides = array<i32>} : memref<2x256xf32, #tpu.memory_space<vmem>>, vector<1x64xf32>,
    %125 = vector.extract_strided_slice %122 {offsets = [1, 0], sizes = [1, 64], strides = [1, 1]} : vector<4x64xf32> to vector<1x64xf32>
    %c0_101 = arith.constant 0 : index
    %c64 = arith.constant 64 : index
    %126 = vector.load %arg13[%c0_101, %c64] : memref<2x256xf32, #tpu.memory_space<vmem>>, vector<1x64xf32>
    tpu.vector_store %arg13[%c0_101, %c64], %125 {strides = array<i32>} : memref<2x256xf32, #tpu.memory_space<vmem>>, vector<1x64xf32>,
    %127 = vector.extract_strided_slice %122 {offsets = [2, 0], sizes = [1, 64], strides = [1, 1]} : vector<4x64xf32> to vector<1x64xf32>
    %c0_102 = arith.constant 0 : index
    %c128 = arith.constant 128 : index
    %128 = vector.load %arg13[%c0_102, %c128] : memref<2x256xf32, #tpu.memory_space<vmem>>, vector<1x64xf32>
    tpu.vector_store %arg13[%c0_102, %c128], %127 {strides = array<i32>} : memref<2x256xf32, #tpu.memory_space<vmem>>, vector<1x64xf32>,
    %129 = vector.extract_strided_slice %122 {offsets = [3, 0], sizes = [1, 64], strides = [1, 1]} : vector<4x64xf32> to vector<1x64xf32>
    %c0_103 = arith.constant 0 : index
    %c192 = arith.constant 192 : index
    %130 = vector.load %arg13[%c0_103, %c192] : memref<2x256xf32, #tpu.memory_space<vmem>>, vector<1x64xf32>
    tpu.vector_store %arg13[%c0_103, %c192], %129 {strides = array<i32>} : memref<2x256xf32, #tpu.memory_space<vmem>>, vector<1x64xf32>,
    %cst_104 = arith.constant 0.000000e+00 : f32
    %131 = vector.broadcast %cst_104 : f32 to vector<24x96xf32>
    %cst_105 = arith.constant 0.000000e+00 : f32
    %132 = vector.broadcast %cst_105 : f32 to vector<24x96xf32>
    %c1_106 = arith.constant 1 : index
    %c0_107 = arith.constant 0 : index
    %c0_108 = arith.constant 0 : index
    %133 = vector.load %arg1[%c1_106, %c0_107, %c0_108] : memref<2x28x84xf32, #tpu.memory_space<vmem>>, vector<1x24x84xf32>
    %134 = vector.shape_cast %133 : vector<1x24x84xf32> to vector<24x84xf32>
    %c0_109 = arith.constant 0 : index
    %c0_110 = arith.constant 0 : index
    %c0_111 = arith.constant 0 : index
    %135 = vector.load %arg2[%c0_109, %c0_110, %c0_111] : memref<5x84x96xf32, #tpu.memory_space<vmem>>, vector<1x84x96xf32>
    %136 = vector.shape_cast %135 : vector<1x84x96xf32> to vector<84x96xf32>
    %cst_112 = arith.constant dense<0.000000e+00> : vector<24x96xf32>
    %137 = tpu.matmul %134, %136, %cst_112 {dimension_numbers = #tpu.dot_dimension_numbers<[1], [0], [0], [1], [0, 0, 1, 1], [], []>} : vector<24x84xf32>, vector<84x96xf32>, vector<24x96xf32> -> vector<24x96xf32>
    %138 = arith.addf %131, %137 : vector<24x96xf32>
    %c0_113 = arith.constant 0 : index
    %c0_114 = arith.constant 0 : index
    %c0_115 = arith.constant 0 : index
    %139 = vector.load %arg3[%c0_113, %c0_114, %c0_115] : memref<5x84x96xf32, #tpu.memory_space<vmem>>, vector<1x84x96xf32>
    %140 = vector.shape_cast %139 : vector<1x84x96xf32> to vector<84x96xf32>
    %cst_116 = arith.constant dense<0.000000e+00> : vector<24x96xf32>
    %141 = tpu.matmul %134, %140, %cst_116 {dimension_numbers = #tpu.dot_dimension_numbers<[1], [0], [0], [1], [0, 0, 1, 1], [], []>} : vector<24x84xf32>, vector<84x96xf32>, vector<24x96xf32> -> vector<24x96xf32>
    %142 = arith.addf %132, %141 : vector<24x96xf32>
    %c1_117 = arith.constant 1 : index
    %c1_118 = arith.constant 1 : index
    %c0_119 = arith.constant 0 : index
    %143 = vector.load %arg1[%c1_117, %c1_118, %c0_119] : memref<2x28x84xf32, #tpu.memory_space<vmem>>, vector<1x24x84xf32>
    %144 = vector.shape_cast %143 : vector<1x24x84xf32> to vector<24x84xf32>
    %c1_120 = arith.constant 1 : index
    %c0_121 = arith.constant 0 : index
    %c0_122 = arith.constant 0 : index
    %145 = vector.load %arg2[%c1_120, %c0_121, %c0_122] : memref<5x84x96xf32, #tpu.memory_space<vmem>>, vector<1x84x96xf32>
    %146 = vector.shape_cast %145 : vector<1x84x96xf32> to vector<84x96xf32>
    %cst_123 = arith.constant dense<0.000000e+00> : vector<24x96xf32>
    %147 = tpu.matmul %144, %146, %cst_123 {dimension_numbers = #tpu.dot_dimension_numbers<[1], [0], [0], [1], [0, 0, 1, 1], [], []>} : vector<24x84xf32>, vector<84x96xf32>, vector<24x96xf32> -> vector<24x96xf32>
    %148 = arith.addf %138, %147 : vector<24x96xf32>
    %c1_124 = arith.constant 1 : index
    %c0_125 = arith.constant 0 : index
    %c0_126 = arith.constant 0 : index
    %149 = vector.load %arg3[%c1_124, %c0_125, %c0_126] : memref<5x84x96xf32, #tpu.memory_space<vmem>>, vector<1x84x96xf32>
    %150 = vector.shape_cast %149 : vector<1x84x96xf32> to vector<84x96xf32>
    %cst_127 = arith.constant dense<0.000000e+00> : vector<24x96xf32>
    %151 = tpu.matmul %144, %150, %cst_127 {dimension_numbers = #tpu.dot_dimension_numbers<[1], [0], [0], [1], [0, 0, 1, 1], [], []>} : vector<24x84xf32>, vector<84x96xf32>, vector<24x96xf32> -> vector<24x96xf32>
    %152 = arith.addf %142, %151 : vector<24x96xf32>
    %c1_128 = arith.constant 1 : index
    %c2_129 = arith.constant 2 : index
    %c0_130 = arith.constant 0 : index
    %153 = vector.load %arg1[%c1_128, %c2_129, %c0_130] : memref<2x28x84xf32, #tpu.memory_space<vmem>>, vector<1x24x84xf32>
    %154 = vector.shape_cast %153 : vector<1x24x84xf32> to vector<24x84xf32>
    %c2_131 = arith.constant 2 : index
    %c0_132 = arith.constant 0 : index
    %c0_133 = arith.constant 0 : index
    %155 = vector.load %arg2[%c2_131, %c0_132, %c0_133] : memref<5x84x96xf32, #tpu.memory_space<vmem>>, vector<1x84x96xf32>
    %156 = vector.shape_cast %155 : vector<1x84x96xf32> to vector<84x96xf32>
    %cst_134 = arith.constant dense<0.000000e+00> : vector<24x96xf32>
    %157 = tpu.matmul %154, %156, %cst_134 {dimension_numbers = #tpu.dot_dimension_numbers<[1], [0], [0], [1], [0, 0, 1, 1], [], []>} : vector<24x84xf32>, vector<84x96xf32>, vector<24x96xf32> -> vector<24x96xf32>
    %158 = arith.addf %148, %157 : vector<24x96xf32>
    %c2_135 = arith.constant 2 : index
    %c0_136 = arith.constant 0 : index
    %c0_137 = arith.constant 0 : index
    %159 = vector.load %arg3[%c2_135, %c0_136, %c0_137] : memref<5x84x96xf32, #tpu.memory_space<vmem>>, vector<1x84x96xf32>
    %160 = vector.shape_cast %159 : vector<1x84x96xf32> to vector<84x96xf32>
    %cst_138 = arith.constant dense<0.000000e+00> : vector<24x96xf32>
    %161 = tpu.matmul %154, %160, %cst_138 {dimension_numbers = #tpu.dot_dimension_numbers<[1], [0], [0], [1], [0, 0, 1, 1], [], []>} : vector<24x84xf32>, vector<84x96xf32>, vector<24x96xf32> -> vector<24x96xf32>
    %162 = arith.addf %152, %161 : vector<24x96xf32>
    %c1_139 = arith.constant 1 : index
    %c3_140 = arith.constant 3 : index
    %c0_141 = arith.constant 0 : index
    %163 = vector.load %arg1[%c1_139, %c3_140, %c0_141] : memref<2x28x84xf32, #tpu.memory_space<vmem>>, vector<1x24x84xf32>
    %164 = vector.shape_cast %163 : vector<1x24x84xf32> to vector<24x84xf32>
    %c3_142 = arith.constant 3 : index
    %c0_143 = arith.constant 0 : index
    %c0_144 = arith.constant 0 : index
    %165 = vector.load %arg2[%c3_142, %c0_143, %c0_144] : memref<5x84x96xf32, #tpu.memory_space<vmem>>, vector<1x84x96xf32>
    %166 = vector.shape_cast %165 : vector<1x84x96xf32> to vector<84x96xf32>
    %cst_145 = arith.constant dense<0.000000e+00> : vector<24x96xf32>
    %167 = tpu.matmul %164, %166, %cst_145 {dimension_numbers = #tpu.dot_dimension_numbers<[1], [0], [0], [1], [0, 0, 1, 1], [], []>} : vector<24x84xf32>, vector<84x96xf32>, vector<24x96xf32> -> vector<24x96xf32>
    %168 = arith.addf %158, %167 : vector<24x96xf32>
    %c3_146 = arith.constant 3 : index
    %c0_147 = arith.constant 0 : index
    %c0_148 = arith.constant 0 : index
    %169 = vector.load %arg3[%c3_146, %c0_147, %c0_148] : memref<5x84x96xf32, #tpu.memory_space<vmem>>, vector<1x84x96xf32>
    %170 = vector.shape_cast %169 : vector<1x84x96xf32> to vector<84x96xf32>
    %cst_149 = arith.constant dense<0.000000e+00> : vector<24x96xf32>
    %171 = tpu.matmul %164, %170, %cst_149 {dimension_numbers = #tpu.dot_dimension_numbers<[1], [0], [0], [1], [0, 0, 1, 1], [], []>} : vector<24x84xf32>, vector<84x96xf32>, vector<24x96xf32> -> vector<24x96xf32>
    %172 = arith.addf %162, %171 : vector<24x96xf32>
    %c1_150 = arith.constant 1 : index
    %c4_151 = arith.constant 4 : index
    %c0_152 = arith.constant 0 : index
    %173 = vector.load %arg1[%c1_150, %c4_151, %c0_152] : memref<2x28x84xf32, #tpu.memory_space<vmem>>, vector<1x24x84xf32>
    %174 = vector.shape_cast %173 : vector<1x24x84xf32> to vector<24x84xf32>
    %c4_153 = arith.constant 4 : index
    %c0_154 = arith.constant 0 : index
    %c0_155 = arith.constant 0 : index
    %175 = vector.load %arg2[%c4_153, %c0_154, %c0_155] : memref<5x84x96xf32, #tpu.memory_space<vmem>>, vector<1x84x96xf32>
    %176 = vector.shape_cast %175 : vector<1x84x96xf32> to vector<84x96xf32>
    %cst_156 = arith.constant dense<0.000000e+00> : vector<24x96xf32>
    %177 = tpu.matmul %174, %176, %cst_156 {dimension_numbers = #tpu.dot_dimension_numbers<[1], [0], [0], [1], [0, 0, 1, 1], [], []>} : vector<24x84xf32>, vector<84x96xf32>, vector<24x96xf32> -> vector<24x96xf32>
    %178 = arith.addf %168, %177 : vector<24x96xf32>
    %c4_157 = arith.constant 4 : index
    %c0_158 = arith.constant 0 : index
    %c0_159 = arith.constant 0 : index
    %179 = vector.load %arg3[%c4_157, %c0_158, %c0_159] : memref<5x84x96xf32, #tpu.memory_space<vmem>>, vector<1x84x96xf32>
    %180 = vector.shape_cast %179 : vector<1x84x96xf32> to vector<84x96xf32>
    %cst_160 = arith.constant dense<0.000000e+00> : vector<24x96xf32>
    %181 = tpu.matmul %174, %180, %cst_160 {dimension_numbers = #tpu.dot_dimension_numbers<[1], [0], [0], [1], [0, 0, 1, 1], [], []>} : vector<24x84xf32>, vector<84x96xf32>, vector<24x96xf32> -> vector<24x96xf32>
    %182 = arith.addf %172, %181 : vector<24x96xf32>
    %183 = arith.maximumf %178, %182 : vector<24x96xf32>
    %184 = vector.shape_cast %183 : vector<24x96xf32> to vector<12x2x96xf32>
    %185 = vector.extract_strided_slice %184 {offsets = [0, 0, 0], sizes = [12, 1, 96], strides = [1, 1, 1]} : vector<12x2x96xf32> to vector<12x1x96xf32>
    %186 = vector.shape_cast %185 : vector<12x1x96xf32> to vector<12x96xf32>
    %187 = vector.extract_strided_slice %184 {offsets = [0, 1, 0], sizes = [12, 1, 96], strides = [1, 1, 1]} : vector<12x2x96xf32> to vector<12x1x96xf32>
    %188 = vector.shape_cast %187 : vector<12x1x96xf32> to vector<12x96xf32>
    %189 = arith.maximumf %186, %188 : vector<12x96xf32>
    %190 = vector.broadcast %0 : vector<1x96xf32> to vector<12x96xf32>
    %191 = arith.addf %189, %190 : vector<12x96xf32>
    %cst_161 = arith.constant 0.000000e+00 : f32
    %192 = vector.broadcast %cst_161 : f32 to vector<12x96xf32>
    %193 = arith.maximumf %191, %192 : vector<12x96xf32>
    %cst_162 = arith.constant 0.000000e+00 : f32
    %194 = vector.broadcast %cst_162 : f32 to vector<8x64xf32>
    %cst_163 = arith.constant 0.000000e+00 : f32
    %195 = vector.broadcast %cst_163 : f32 to vector<8x64xf32>
    %196 = vector.extract_strided_slice %193 {offsets = [0, 0], sizes = [8, 96], strides = [1, 1]} : vector<12x96xf32> to vector<8x96xf32>
    %c0_164 = arith.constant 0 : index
    %c0_165 = arith.constant 0 : index
    %c0_166 = arith.constant 0 : index
    %197 = vector.load %arg5[%c0_164, %c0_165, %c0_166] : memref<5x96x64xf32, #tpu.memory_space<vmem>>, vector<1x96x64xf32>
    %198 = vector.shape_cast %197 : vector<1x96x64xf32> to vector<96x64xf32>
    %cst_167 = arith.constant dense<0.000000e+00> : vector<8x64xf32>
    %199 = tpu.matmul %196, %198, %cst_167 {dimension_numbers = #tpu.dot_dimension_numbers<[1], [0], [0], [1], [0, 0, 1, 1], [], []>} : vector<8x96xf32>, vector<96x64xf32>, vector<8x64xf32> -> vector<8x64xf32>
    %200 = arith.addf %194, %199 : vector<8x64xf32>
    %c0_168 = arith.constant 0 : index
    %c0_169 = arith.constant 0 : index
    %c0_170 = arith.constant 0 : index
    %201 = vector.load %arg6[%c0_168, %c0_169, %c0_170] : memref<5x96x64xf32, #tpu.memory_space<vmem>>, vector<1x96x64xf32>
    %202 = vector.shape_cast %201 : vector<1x96x64xf32> to vector<96x64xf32>
    %cst_171 = arith.constant dense<0.000000e+00> : vector<8x64xf32>
    %203 = tpu.matmul %196, %202, %cst_171 {dimension_numbers = #tpu.dot_dimension_numbers<[1], [0], [0], [1], [0, 0, 1, 1], [], []>} : vector<8x96xf32>, vector<96x64xf32>, vector<8x64xf32> -> vector<8x64xf32>
    %204 = arith.addf %195, %203 : vector<8x64xf32>
    %205 = vector.extract_strided_slice %193 {offsets = [1, 0], sizes = [8, 96], strides = [1, 1]} : vector<12x96xf32> to vector<8x96xf32>
    %c1_172 = arith.constant 1 : index
    %c0_173 = arith.constant 0 : index
    %c0_174 = arith.constant 0 : index
    %206 = vector.load %arg5[%c1_172, %c0_173, %c0_174] : memref<5x96x64xf32, #tpu.memory_space<vmem>>, vector<1x96x64xf32>
    %207 = vector.shape_cast %206 : vector<1x96x64xf32> to vector<96x64xf32>
    %cst_175 = arith.constant dense<0.000000e+00> : vector<8x64xf32>
    %208 = tpu.matmul %205, %207, %cst_175 {dimension_numbers = #tpu.dot_dimension_numbers<[1], [0], [0], [1], [0, 0, 1, 1], [], []>} : vector<8x96xf32>, vector<96x64xf32>, vector<8x64xf32> -> vector<8x64xf32>
    %209 = arith.addf %200, %208 : vector<8x64xf32>
    %c1_176 = arith.constant 1 : index
    %c0_177 = arith.constant 0 : index
    %c0_178 = arith.constant 0 : index
    %210 = vector.load %arg6[%c1_176, %c0_177, %c0_178] : memref<5x96x64xf32, #tpu.memory_space<vmem>>, vector<1x96x64xf32>
    %211 = vector.shape_cast %210 : vector<1x96x64xf32> to vector<96x64xf32>
    %cst_179 = arith.constant dense<0.000000e+00> : vector<8x64xf32>
    %212 = tpu.matmul %205, %211, %cst_179 {dimension_numbers = #tpu.dot_dimension_numbers<[1], [0], [0], [1], [0, 0, 1, 1], [], []>} : vector<8x96xf32>, vector<96x64xf32>, vector<8x64xf32> -> vector<8x64xf32>
    %213 = arith.addf %204, %212 : vector<8x64xf32>
    %214 = vector.extract_strided_slice %193 {offsets = [2, 0], sizes = [8, 96], strides = [1, 1]} : vector<12x96xf32> to vector<8x96xf32>
    %c2_180 = arith.constant 2 : index
    %c0_181 = arith.constant 0 : index
    %c0_182 = arith.constant 0 : index
    %215 = vector.load %arg5[%c2_180, %c0_181, %c0_182] : memref<5x96x64xf32, #tpu.memory_space<vmem>>, vector<1x96x64xf32>
    %216 = vector.shape_cast %215 : vector<1x96x64xf32> to vector<96x64xf32>
    %cst_183 = arith.constant dense<0.000000e+00> : vector<8x64xf32>
    %217 = tpu.matmul %214, %216, %cst_183 {dimension_numbers = #tpu.dot_dimension_numbers<[1], [0], [0], [1], [0, 0, 1, 1], [], []>} : vector<8x96xf32>, vector<96x64xf32>, vector<8x64xf32> -> vector<8x64xf32>
    %218 = arith.addf %209, %217 : vector<8x64xf32>
    %c2_184 = arith.constant 2 : index
    %c0_185 = arith.constant 0 : index
    %c0_186 = arith.constant 0 : index
    %219 = vector.load %arg6[%c2_184, %c0_185, %c0_186] : memref<5x96x64xf32, #tpu.memory_space<vmem>>, vector<1x96x64xf32>
    %220 = vector.shape_cast %219 : vector<1x96x64xf32> to vector<96x64xf32>
    %cst_187 = arith.constant dense<0.000000e+00> : vector<8x64xf32>
    %221 = tpu.matmul %214, %220, %cst_187 {dimension_numbers = #tpu.dot_dimension_numbers<[1], [0], [0], [1], [0, 0, 1, 1], [], []>} : vector<8x96xf32>, vector<96x64xf32>, vector<8x64xf32> -> vector<8x64xf32>
    %222 = arith.addf %213, %221 : vector<8x64xf32>
    %223 = vector.extract_strided_slice %193 {offsets = [3, 0], sizes = [8, 96], strides = [1, 1]} : vector<12x96xf32> to vector<8x96xf32>
    %c3_188 = arith.constant 3 : index
    %c0_189 = arith.constant 0 : index
    %c0_190 = arith.constant 0 : index
    %224 = vector.load %arg5[%c3_188, %c0_189, %c0_190] : memref<5x96x64xf32, #tpu.memory_space<vmem>>, vector<1x96x64xf32>
    %225 = vector.shape_cast %224 : vector<1x96x64xf32> to vector<96x64xf32>
    %cst_191 = arith.constant dense<0.000000e+00> : vector<8x64xf32>
    %226 = tpu.matmul %223, %225, %cst_191 {dimension_numbers = #tpu.dot_dimension_numbers<[1], [0], [0], [1], [0, 0, 1, 1], [], []>} : vector<8x96xf32>, vector<96x64xf32>, vector<8x64xf32> -> vector<8x64xf32>
    %227 = arith.addf %218, %226 : vector<8x64xf32>
    %c3_192 = arith.constant 3 : index
    %c0_193 = arith.constant 0 : index
    %c0_194 = arith.constant 0 : index
    %228 = vector.load %arg6[%c3_192, %c0_193, %c0_194] : memref<5x96x64xf32, #tpu.memory_space<vmem>>, vector<1x96x64xf32>
    %229 = vector.shape_cast %228 : vector<1x96x64xf32> to vector<96x64xf32>
    %cst_195 = arith.constant dense<0.000000e+00> : vector<8x64xf32>
    %230 = tpu.matmul %223, %229, %cst_195 {dimension_numbers = #tpu.dot_dimension_numbers<[1], [0], [0], [1], [0, 0, 1, 1], [], []>} : vector<8x96xf32>, vector<96x64xf32>, vector<8x64xf32> -> vector<8x64xf32>
    %231 = arith.addf %222, %230 : vector<8x64xf32>
    %232 = vector.extract_strided_slice %193 {offsets = [4, 0], sizes = [8, 96], strides = [1, 1]} : vector<12x96xf32> to vector<8x96xf32>
    %c4_196 = arith.constant 4 : index
    %c0_197 = arith.constant 0 : index
    %c0_198 = arith.constant 0 : index
    %233 = vector.load %arg5[%c4_196, %c0_197, %c0_198] : memref<5x96x64xf32, #tpu.memory_space<vmem>>, vector<1x96x64xf32>
    %234 = vector.shape_cast %233 : vector<1x96x64xf32> to vector<96x64xf32>
    %cst_199 = arith.constant dense<0.000000e+00> : vector<8x64xf32>
    %235 = tpu.matmul %232, %234, %cst_199 {dimension_numbers = #tpu.dot_dimension_numbers<[1], [0], [0], [1], [0, 0, 1, 1], [], []>} : vector<8x96xf32>, vector<96x64xf32>, vector<8x64xf32> -> vector<8x64xf32>
    %236 = arith.addf %227, %235 : vector<8x64xf32>
    %c4_200 = arith.constant 4 : index
    %c0_201 = arith.constant 0 : index
    %c0_202 = arith.constant 0 : index
    %237 = vector.load %arg6[%c4_200, %c0_201, %c0_202] : memref<5x96x64xf32, #tpu.memory_space<vmem>>, vector<1x96x64xf32>
    %238 = vector.shape_cast %237 : vector<1x96x64xf32> to vector<96x64xf32>
    %cst_203 = arith.constant dense<0.000000e+00> : vector<8x64xf32>
    %239 = tpu.matmul %232, %238, %cst_203 {dimension_numbers = #tpu.dot_dimension_numbers<[1], [0], [0], [1], [0, 0, 1, 1], [], []>} : vector<8x96xf32>, vector<96x64xf32>, vector<8x64xf32> -> vector<8x64xf32>
    %240 = arith.addf %231, %239 : vector<8x64xf32>
    %241 = arith.maximumf %236, %240 : vector<8x64xf32>
    %242 = vector.shape_cast %241 : vector<8x64xf32> to vector<4x2x64xf32>
    %243 = vector.extract_strided_slice %242 {offsets = [0, 0, 0], sizes = [4, 1, 64], strides = [1, 1, 1]} : vector<4x2x64xf32> to vector<4x1x64xf32>
    %244 = vector.shape_cast %243 : vector<4x1x64xf32> to vector<4x64xf32>
    %245 = vector.extract_strided_slice %242 {offsets = [0, 1, 0], sizes = [4, 1, 64], strides = [1, 1, 1]} : vector<4x2x64xf32> to vector<4x1x64xf32>
    %246 = vector.shape_cast %245 : vector<4x1x64xf32> to vector<4x64xf32>
    %247 = arith.maximumf %244, %246 : vector<4x64xf32>
    %248 = vector.broadcast %1 : vector<1x64xf32> to vector<4x64xf32>
    %249 = arith.addf %247, %248 : vector<4x64xf32>
    %cst_204 = arith.constant 0.000000e+00 : f32
    %250 = vector.broadcast %cst_204 : f32 to vector<4x64xf32>
    %251 = arith.maximumf %249, %250 : vector<4x64xf32>
    %252 = vector.extract_strided_slice %251 {offsets = [0, 0], sizes = [1, 64], strides = [1, 1]} : vector<4x64xf32> to vector<1x64xf32>
    %c1_205 = arith.constant 1 : index
    %c0_206 = arith.constant 0 : index
    %253 = vector.load %arg13[%c1_205, %c0_206] : memref<2x256xf32, #tpu.memory_space<vmem>>, vector<1x64xf32>
    tpu.vector_store %arg13[%c1_205, %c0_206], %252 {strides = array<i32>} : memref<2x256xf32, #tpu.memory_space<vmem>>, vector<1x64xf32>,
    %254 = vector.extract_strided_slice %251 {offsets = [1, 0], sizes = [1, 64], strides = [1, 1]} : vector<4x64xf32> to vector<1x64xf32>
    %c1_207 = arith.constant 1 : index
    %c64_208 = arith.constant 64 : index
    %255 = vector.load %arg13[%c1_207, %c64_208] : memref<2x256xf32, #tpu.memory_space<vmem>>, vector<1x64xf32>
    tpu.vector_store %arg13[%c1_207, %c64_208], %254 {strides = array<i32>} : memref<2x256xf32, #tpu.memory_space<vmem>>, vector<1x64xf32>,
    %256 = vector.extract_strided_slice %251 {offsets = [2, 0], sizes = [1, 64], strides = [1, 1]} : vector<4x64xf32> to vector<1x64xf32>
    %c1_209 = arith.constant 1 : index
    %c128_210 = arith.constant 128 : index
    %257 = vector.load %arg13[%c1_209, %c128_210] : memref<2x256xf32, #tpu.memory_space<vmem>>, vector<1x64xf32>
    tpu.vector_store %arg13[%c1_209, %c128_210], %256 {strides = array<i32>} : memref<2x256xf32, #tpu.memory_space<vmem>>, vector<1x64xf32>,
    %258 = vector.extract_strided_slice %251 {offsets = [3, 0], sizes = [1, 64], strides = [1, 1]} : vector<4x64xf32> to vector<1x64xf32>
    %c1_211 = arith.constant 1 : index
    %c192_212 = arith.constant 192 : index
    %259 = vector.load %arg13[%c1_211, %c192_212] : memref<2x256xf32, #tpu.memory_space<vmem>>, vector<1x64xf32>
    tpu.vector_store %arg13[%c1_211, %c192_212], %258 {strides = array<i32>} : memref<2x256xf32, #tpu.memory_space<vmem>>, vector<1x64xf32>,
    %c0_213 = arith.constant 0 : index
    %c0_214 = arith.constant 0 : index
    %260 = vector.load %arg13[%c0_213, %c0_214] : memref<2x256xf32, #tpu.memory_space<vmem>>, vector<2x256xf32>
    %c0_215 = arith.constant 0 : index
    %c0_216 = arith.constant 0 : index
    %261 = vector.load %arg8[%c0_215, %c0_216] : memref<256x128xf32, #tpu.memory_space<vmem>>, vector<256x128xf32>
    %cst_217 = arith.constant dense<0.000000e+00> : vector<2x128xf32>
    %262 = tpu.matmul %260, %261, %cst_217 {dimension_numbers = #tpu.dot_dimension_numbers<[1], [0], [0], [1], [0, 0, 1, 1], [], []>} : vector<2x256xf32>, vector<256x128xf32>, vector<2x128xf32> -> vector<2x128xf32>
    %c0_218 = arith.constant 0 : index
    %c0_219 = arith.constant 0 : index
    %263 = vector.load %arg9[%c0_218, %c0_219] : memref<1x128xf32, #tpu.memory_space<vmem>>, vector<1x128xf32>
    %264 = vector.broadcast %263 : vector<1x128xf32> to vector<2x128xf32>
    %265 = arith.addf %262, %264 : vector<2x128xf32>
    %cst_220 = arith.constant 0.000000e+00 : f32
    %266 = vector.broadcast %cst_220 : f32 to vector<2x128xf32>
    %267 = arith.maximumf %265, %266 : vector<2x128xf32>
    %c0_221 = arith.constant 0 : index
    %c0_222 = arith.constant 0 : index
    %268 = vector.load %arg10[%c0_221, %c0_222] : memref<128x128xf32, #tpu.memory_space<vmem>>, vector<128x128xf32>
    %cst_223 = arith.constant dense<0.000000e+00> : vector<2x128xf32>
    %269 = tpu.matmul %267, %268, %cst_223 {dimension_numbers = #tpu.dot_dimension_numbers<[1], [0], [0], [1], [0, 0, 1, 1], [], []>} : vector<2x128xf32>, vector<128x128xf32>, vector<2x128xf32> -> vector<2x128xf32>
    %c0_224 = arith.constant 0 : index
    %c0_225 = arith.constant 0 : index
    %270 = vector.load %arg11[%c0_224, %c0_225] : memref<1x128xf32, #tpu.memory_space<vmem>>, vector<1x128xf32>
    %271 = vector.broadcast %270 : vector<1x128xf32> to vector<2x128xf32>
    %272 = arith.addf %269, %271 : vector<2x128xf32>
    %cst_226 = arith.constant 0.000000e+00 : f32
    %273 = vector.broadcast %cst_226 : f32 to vector<2x128xf32>
    %274 = arith.maximumf %272, %273 : vector<2x128xf32>
    %c0_227 = arith.constant 0 : index
    %c0_228 = arith.constant 0 : index
    %275 = vector.load %arg12[%c0_227, %c0_228] : memref<2x128xf32, #tpu.memory_space<vmem>>, vector<2x128xf32>
    tpu.vector_store %arg12[%c0_227, %c0_228], %274 {strides = array<i32>} : memref<2x128xf32, #tpu.memory_space<vmem>>, vector<2x128xf32>,
    return
  }
  func.func @transform_0(%arg0: i32) -> (i32, i32, i32) {
    %c0_i32 = arith.constant 0 : i32
    %c0_i32_0 = arith.constant 0 : i32
    %c0_i32_1 = arith.constant 0 : i32
    return %arg0, %c0_i32, %c0_i32_0 : i32, i32, i32
  }
  func.func @transform_1(%arg0: i32) -> (i32, i32, i32) {
    %c0_i32 = arith.constant 0 : i32
    %c0_i32_0 = arith.constant 0 : i32
    %c0_i32_1 = arith.constant 0 : i32
    %c0_i32_2 = arith.constant 0 : i32
    return %c0_i32, %c0_i32_0, %c0_i32_1 : i32, i32, i32
  }
  func.func @transform_2(%arg0: i32) -> (i32, i32, i32) {
    %c0_i32 = arith.constant 0 : i32
    %c0_i32_0 = arith.constant 0 : i32
    %c0_i32_1 = arith.constant 0 : i32
    %c0_i32_2 = arith.constant 0 : i32
    return %c0_i32, %c0_i32_0, %c0_i32_1 : i32, i32, i32
  }
  func.func @transform_3(%arg0: i32) -> (i32, i32) {
    %c0_i32 = arith.constant 0 : i32
    %c0_i32_0 = arith.constant 0 : i32
    %c0_i32_1 = arith.constant 0 : i32
    return %c0_i32, %c0_i32_0 : i32, i32
  }
  func.func @transform_4(%arg0: i32) -> (i32, i32, i32) {
    %c0_i32 = arith.constant 0 : i32
    %c0_i32_0 = arith.constant 0 : i32
    %c0_i32_1 = arith.constant 0 : i32
    %c0_i32_2 = arith.constant 0 : i32
    return %c0_i32, %c0_i32_0, %c0_i32_1 : i32, i32, i32
  }
  func.func @transform_5(%arg0: i32) -> (i32, i32, i32) {
    %c0_i32 = arith.constant 0 : i32
    %c0_i32_0 = arith.constant 0 : i32
    %c0_i32_1 = arith.constant 0 : i32
    %c0_i32_2 = arith.constant 0 : i32
    return %c0_i32, %c0_i32_0, %c0_i32_1 : i32, i32, i32
  }
  func.func @transform_6(%arg0: i32) -> (i32, i32) {
    %c0_i32 = arith.constant 0 : i32
    %c0_i32_0 = arith.constant 0 : i32
    %c0_i32_1 = arith.constant 0 : i32
    return %c0_i32, %c0_i32_0 : i32, i32
  }
  func.func @transform_7(%arg0: i32) -> (i32, i32) {
    %c0_i32 = arith.constant 0 : i32
    %c0_i32_0 = arith.constant 0 : i32
    %c0_i32_1 = arith.constant 0 : i32
    return %c0_i32, %c0_i32_0 : i32, i32
  }
  func.func @transform_8(%arg0: i32) -> (i32, i32) {
    %c0_i32 = arith.constant 0 : i32
    %c0_i32_0 = arith.constant 0 : i32
    %c0_i32_1 = arith.constant 0 : i32
    return %c0_i32, %c0_i32_0 : i32, i32
  }
  func.func @transform_9(%arg0: i32) -> (i32, i32) {
    %c0_i32 = arith.constant 0 : i32
    %c0_i32_0 = arith.constant 0 : i32
    %c0_i32_1 = arith.constant 0 : i32
    return %c0_i32, %c0_i32_0 : i32, i32
  }
  func.func @transform_10(%arg0: i32) -> (i32, i32) {
    %c0_i32 = arith.constant 0 : i32
    %c0_i32_0 = arith.constant 0 : i32
    %c0_i32_1 = arith.constant 0 : i32
    return %c0_i32, %c0_i32_0 : i32, i32
  }
  func.func @transform_11(%arg0: i32) -> (i32, i32) {
    %c0_i32 = arith.constant 0 : i32
    %c0_i32_0 = arith.constant 0 : i32
    return %arg0, %c0_i32 : i32, i32
  }
}

</mosaic_0001>

<bundles_post_ra>
// kernel: base_encoder_forward.1
= control target key start
LH: loop header
LB: loop body
LE: loop exit
PB: predicated region body
PF: predicated region fallthrough
CT: control target
= control target key end

     0   :  { %v7833_v3 = vmov 0.0|0.0   ;;  %vm7834_vm0 = vmmov 0   ;;  %v7835_v11 = vmov 0.0   ;;  %vm91_vm1 = vcmask 1043456   ;;  %s10348_s0 = inlined_call_operand.vmem [shape: f32[2,28,84], index: 0, kind: input, shape index: {}]   ;;  %s10349_s1 = inlined_call_operand.vmem [shape: f32[5,84,96], index: 1, kind: input, shape index: {}]   ;;  %s10350_s2 = inlined_call_operand.vmem [shape: f32[5,84,96], index: 2, kind: input, shape index: {}]   ;;  %s10351_s3 = inlined_call_operand.vmem [shape: f32[1,96], index: 3, kind: input, shape index: {}]   ;;  %s10352_s4 = inlined_call_operand.vmem [shape: f32[5,96,64], index: 4, kind: input, shape index: {}]   ;;  %s10353_s5 = inlined_call_operand.vmem [shape: f32[5,96,64], index: 5, kind: input, shape index: {}]   ;;  %s10354_s6 = inlined_call_operand.vmem [shape: f32[1,64], index: 6, kind: input, shape index: {}]   ;;  %s10355_s7 = inlined_call_operand.vmem [shape: f32[256,128], index: 7, kind: input, shape index: {}]   ;;  %s10356_s8 = inlined_call_operand.vmem [shape: f32[1,128], index: 8, kind: input, shape index: {}]   ;;  %s10357_s9 = inlined_call_operand.vmem [shape: f32[128,128], index: 9, kind: input, shape index: {}]   ;;  %s10358_s10 = inlined_call_operand.vmem [shape: f32[1,128], index: 10, kind: input, shape index: {}]   ;;  %s10359_s11 = inlined_call_operand.hbm [shape: f32[2,128], index: 11, kind: output, shape index: {}]  }
   0x1   :  { %v4652_v0 = vld [vmem:[%s10349_s1 + $0x58] sm:$0xff]  ;;  %v4653_v1 = vld [vmem:[%s10349_s1 + $0x60] sm:$0xff]  ;;  %6959 = vmatprep.subr.bf16.mxu0 %v7833_v3  ;;  %6989 = vmatprep.subr.bf16.mxu1 %v7833_v3  ;;  %v4654_v6 = vld [vmem:[%s10349_s1 + $0x68] sm:$0xff]  ;;  %vm81_vm2 = vcmask 687104  }
   0x2   :  { %v4671_v2 = vld [vmem:[%s10350_s2 + $0x58] sm:$0xff]  ;;  %v6960_v4 = vpack.c.bf16 %v4653_v1, %v4652_v0  ;;  %v4672_v5 = vld [vmem:[%s10350_s2 + $0x60] sm:$0xff]  ;;  %v4655_v7 = vld [vmem:[%s10349_s1 + $0x70] sm:$0xff]  ;;  %5786 = vmatprep.mubr.msk.f32.mxu0 %vm7834_vm0, %v7835_v11  ;;  %5848 = vmatprep.mubr.msk.f32.mxu1 %vm7834_vm0, %v7835_v11 }
   0x3   :  { %v6990_v8 = vpack.c.bf16 %v4672_v5, %v4671_v2  ;;  %v4673_v9 = vld [vmem:[%s10350_s2 + $0x68] sm:$0xff]  ;;  %v4674_v10 = vld [vmem:[%s10350_s2 + $0x70] sm:$0xff]  ;;  %v6963_v12 = vpack.c.bf16 %v4655_v7, %v4654_v6  ;;  %v4656_v14 = vld [vmem:[%s10349_s1 + $0x78] sm:$0xff] }
   0x4   :  { %6961 = vmatpush3.bf16.msra.mxu0 %v6960_v4  ;;  %v6993_v13 = vpack.c.bf16 %v4674_v10, %v4673_v9  ;;  %v4657_v15 = vld [vmem:[%s10349_s1 + $0x80] sm:$0xff]  ;;  %v4675_v16 = vld [vmem:[%s10350_s2 + $0x78] sm:$0xff]  ;;  %v4658_v20 = vld [vmem:[%s10349_s1 + $0x88] sm:$0xff] }
   0x5   :  { %6991 = vmatpush3.bf16.msra.mxu1 %v6990_v8  ;;  %6962 = vmatprep.subr.bf16.mxu0 %v7833_v3  ;;  %v4676_v17 = vld [vmem:[%s10350_s2 + $0x80] sm:$0xff]  ;;  %v6966_v18 = vpack.c.bf16 %v4657_v15, %v4656_v14  ;;  %v4659_v21 = vld [vmem:[%s10349_s1 + $0x90] sm:$0xff]  ;;  %v4677_v22 = vld [vmem:[%s10350_s2 + $0x88] sm:$0xff] }
   0x6   :  { %6992 = vmatprep.subr.bf16.mxu1 %v7833_v3  ;;  %v6996_v19 = vpack.c.bf16 %v4676_v17, %v4675_v16  ;;  %v4678_v23 = vld [vmem:[%s10350_s2 + $0x90] sm:$0xff]  ;;  %v6969_v24 = vpack.c.bf16 %v4659_v21, %v4658_v20  ;;  %v4660_v26 = vld [vmem:[%s10349_s1 + $0x98] sm:$0xff]  ;;  %v4661_v27 = vld [vmem:[%s10349_s1 + $0xa0] sm:$0xff] }
   0x7   :  { %v6999_v25 = vpack.c.bf16 %v4678_v23, %v4677_v22  ;;  %v4679_v28 = vld [vmem:[%s10350_s2 + $0x98] sm:$0xff]  ;;  %v4680_v29 = vld [vmem:[%s10350_s2 + $0xa0] sm:$0xff]  ;;  %v6972_v30 = vpack.c.bf16 %v4661_v27, %v4660_v26  ;;  %v45_v33 = vld [vmem:[%s10349_s1 + $0x8] sm:$0xff] }
   0x8   :  { %6964 = vmatpush3.bf16.msra.mxu0 %v6963_v12  ;;  %v7002_v31 = vpack.c.bf16 %v4680_v29, %v4679_v28  ;;  %v44_v32 = vld [vmem:[%s10349_s1] sm:$0xff]  ;;  %v4662_v34 = vld [vmem:[%s10349_s1 + $0xa8] sm:$0xf]  ;;  %v46_v41 = vld [vmem:[%s10349_s1 + $0x10] sm:$0xff] }
   0x9   :  { %6994 = vmatpush3.bf16.msra.mxu1 %v6993_v13  ;;  %6965 = vmatprep.subr.bf16.mxu0 %v7833_v3  ;;  %v55_v35 = vld [vmem:[%s10350_s2] sm:$0xff]  ;;  %v56_v36 = vld [vmem:[%s10350_s2 + $0x8] sm:$0xff]  ;;  %v6975_v39 = vpack.c.bf16 %v45_v33, %v44_v32  ;;  %v47_v42 = vld [vmem:[%s10349_s1 + $0x18] sm:$0xff] }
   0xa   :  { %6995 = vmatprep.subr.bf16.mxu1 %v7833_v3  ;;  %v4681_v37 = vld [vmem:[%s10350_s2 + $0xa8] sm:$0xf]  ;;  %v7005_v40 = vpack.c.bf16 %v56_v36, %v55_v35  ;;  %v57_v43 = vld [vmem:[%s10350_s2 + $0x10] sm:$0xff]  ;;  %v58_v44 = vld [vmem:[%s10350_s2 + $0x18] sm:$0xff]  ;;  %v6978_v45 = vpack.c.bf16 %v47_v42, %v46_v41 }
   0xb   :  { %v66_v38 = vld [vmem:[%s10348_s0 + $0x1] sm:$0xff]  ;;  %v67_v46 = vld [vmem:[%s10348_s0 + $0x9] sm:$0xff]  ;;  %v7008_v47 = vpack.c.bf16 %v58_v44, %v57_v43  ;;  %v68_v53 = vld [vmem:[%s10348_s0 + $0x11] sm:$0xff] }
   0xc   :  { %6967 = vmatpush3.bf16.msra.mxu0 %v6966_v18  ;;  %v48_v48 = vld [vmem:[%s10349_s1 + $0x20] sm:$0xff]  ;;  %v49_v49 = vld [vmem:[%s10349_s1 + $0x28] sm:$0xff]  ;;  %v50_v55 = vld [vmem:[%s10349_s1 + $0x30] sm:$0xff] }
   0xd   :  { %6997 = vmatpush3.bf16.msra.mxu1 %v6996_v19  ;;  %6968 = vmatprep.subr.bf16.mxu0 %v7833_v3  ;;  %v59_v50 = vld [vmem:[%s10350_s2 + $0x20] sm:$0xff]  ;;  %v60_v51 = vld [vmem:[%s10350_s2 + $0x28] sm:$0xff]  ;;  %v6981_v52 = vpack.c.bf16 %v49_v49, %v48_v48  ;;  %v51_v56 = vld [vmem:[%s10349_s1 + $0x38] sm:$0xff] }
   0xe   :  { %6998 = vmatprep.subr.bf16.mxu1 %v7833_v3  ;;  %v7011_v54 = vpack.c.bf16 %v60_v51, %v59_v50  ;;  %v61_v57 = vld [vmem:[%s10350_s2 + $0x30] sm:$0xff]  ;;  %v62_v58 = vld [vmem:[%s10350_s2 + $0x38] sm:$0xff]  ;;  %v6984_v59 = vpack.c.bf16 %v51_v56, %v50_v55  ;;  %v52_v61 = vld [vmem:[%s10349_s1 + $0x40] sm:$0xff] }
   0xf   :  { %v7014_v60 = vpack.c.bf16 %v62_v58, %v61_v57  ;;  %v53_v62 = vld [vmem:[%s10349_s1 + $0x48] sm:$0xff]  ;;  %v63_v63 = vld [vmem:[%s10350_s2 + $0x40] sm:$0xff] }
  0x10   :  { %6970 = vmatpush3.bf16.msra.mxu0 %v6969_v24  ;;  %v64_v0 = vld [vmem:[%s10350_s2 + $0x48] sm:$0xff]  ;;  %v6987_v1 = vpack.c.bf16 %v53_v62, %v52_v61 }
  0x11   :  { %7000 = vmatpush3.bf16.msra.mxu1 %v6999_v25  ;;  %6971 = vmatprep.subr.bf16.mxu0 %v7833_v3  ;;  %v7017_v2 = vpack.c.bf16 %v64_v0, %v63_v63 }
  0x12   :  { %7001 = vmatprep.subr.bf16.mxu1 %v7833_v3 }
  0x14   :  { %6973 = vmatpush3.bf16.msra.mxu0 %v6972_v30 }
  0x15   :  { %7003 = vmatpush3.bf16.msra.mxu1 %v7002_v31  ;;  %5784 = vmatprep.subr.mxu0 %v7835_v11 }
  0x16   :  { %5846 = vmatprep.subr.mxu1 %v7835_v11 }
  0x18   :  { %5785 = vmatpush3.msk.msra.mxu0 %vm91_vm1, %v4662_v34 }
  0x19   :  { %5847 = vmatpush3.msk.msra.mxu1 %vm91_vm1, %v4681_v37  ;;  %6974 = vmatprep.subr.bf16.mxu0 %v7833_v3 }
  0x1a   :  { %7004 = vmatprep.subr.bf16.mxu1 %v7833_v3  ;;  %5787 = vmatmul.mubr.msk.f32.vlgmr.msra.gmra.mrb[0].mxu0 %vm81_vm2, %v66_v38 }
  0x1b   :  { %6976 = vmatpush3.bf16.msra.mxu0 %v6975_v39  ;;  %5849 = vmatmul.mubr.msk.f32.vlgmr.msra.gmra.mrb[0].mxu1 %vm81_vm2, %v66_v38 }
  0x1c   :  { %7006 = vmatpush3.bf16.msra.mxu1 %v7005_v40  ;;  %6977 = vmatprep.subr.bf16.mxu0 %v7833_v3 }
  0x1d   :  { %7007 = vmatprep.subr.bf16.mxu1 %v7833_v3  ;;  %5789 = vmatprep.mubr.msk.f32.mxu0 %vm7834_vm0, %v7835_v11 }
  0x1e   :  { %5851 = vmatprep.mubr.msk.f32.mxu1 %vm7834_vm0, %v7835_v11  ;;  %5790 = vmatmul.mubr.msk.f32.gmra.mrb[2].mxu0 %vm81_vm2, %v67_v46 }
  0x1f   :  { %6979 = vmatpush3.bf16.msra.mxu0 %v6978_v45  ;;  %5852 = vmatmul.mubr.msk.f32.gmra.mrb[2].mxu1 %vm81_vm2, %v67_v46 }
  0x20   :  { %7009 = vmatpush3.bf16.msra.mxu1 %v7008_v47  ;;  %6980 = vmatprep.subr.bf16.mxu0 %v7833_v3 }
  0x21   :  { %7010 = vmatprep.subr.bf16.mxu1 %v7833_v3  ;;  %5792 = vmatprep.mubr.msk.f32.mxu0 %vm7834_vm0, %v7835_v11 }
  0x22   :  { %5854 = vmatprep.mubr.msk.f32.mxu1 %vm7834_vm0, %v7835_v11  ;;  %5793 = vmatmul.mubr.msk.f32.gmra.mrb[4].mxu0 %vm81_vm2, %v68_v53 }
  0x23   :  { %6982 = vmatpush3.bf16.msra.mxu0 %v6981_v52  ;;  %5855 = vmatmul.mubr.msk.f32.gmra.mrb[4].mxu1 %vm81_vm2, %v68_v53 }
  0x24   :  { %7012 = vmatpush3.bf16.msra.mxu1 %v7011_v54  ;;  %6983 = vmatprep.subr.bf16.mxu0 %v7833_v3 }
  0x25   :  { %7013 = vmatprep.subr.bf16.mxu1 %v7833_v3  ;;  %5817 = vmatprep.mubr.msk.f32.mxu0 %vm7834_vm0, %v7835_v11 }
  0x26   :  { %5879 = vmatprep.mubr.msk.f32.mxu1 %vm7834_vm0, %v7835_v11 }
  0x27   :  { %6985 = vmatpush3.bf16.msra.mxu0 %v6984_v59 }
  0x28   :  { %7015 = vmatpush3.bf16.msra.mxu1 %v7014_v60  ;;  %6986 = vmatprep.subr.bf16.mxu0 %v7833_v3 }
  0x29   :  { %7016 = vmatprep.subr.bf16.mxu1 %v7833_v3 }
  0x2a   :  { %16 = vsyncpa [#allocation4], 0  ;;  %v4690_v4 = vld [vmem:[%s10349_s1 + $0xb0] sm:$0xff]  ;;  %v4691_v5 = vld [vmem:[%s10349_s1 + $0xb8] sm:$0xff]  ;;  %vm1321_vm3 = vcmask 1041409   ;;  %vm1323_vm4 = vcmask 1042434  }
  0x2b   :  { %6988 = vmatpush3.bf16.msra.mxu0 %v6987_v1  ;;  %v54_v6 = vld [vmem:[%s10349_s1 + $0x50] sm:$0xf]  ;;  %v4706_v8 = vld [vmem:[%s10350_s2 + $0xb8] sm:$0xff]  ;;  %v41_v10 = vld [vmem:[%s10348_s0] sm:$0xff]  ;;  %v7020_v12 = vpack.c.bf16 %v4691_v5, %v4690_v4  ;;  %vm1325_vm5 = vcmask 1043459   ;;  %vm1327_vm6 = vcmask 1044484  }
  0x2c   :  { %7018 = vmatpush3.bf16.msra.mxu1 %v7017_v2  ;;  %5815 = vmatprep.subr.mxu0 %v7835_v11  ;;  %v4705_v7 = vld [vmem:[%s10350_s2 + $0xb0] sm:$0xff]  ;;  %v4692_v14 = vld [vmem:[%s10349_s1 + $0xc0] sm:$0xff]  ;;  %v4693_v15 = vld [vmem:[%s10349_s1 + $0xc8] sm:$0xff]  ;;  %vm1329_vm7 = vcmask 1045509   ;;  %vm1331_vm8 = vcmask 1046534   ;;  %vm1333_vm9 = vcmask 1047559  }
  0x2d   :  { %5877 = vmatprep.subr.mxu1 %v7835_v11  ;;  %v65_v9 = vld [vmem:[%s10350_s2 + $0x50] sm:$0xf]  ;;  %v7035_v13 = vpack.c.bf16 %v4706_v8, %v4705_v7  ;;  %v4707_v16 = vld [vmem:[%s10350_s2 + $0xc0] sm:$0xff]  ;;  %v4708_v17 = vld [vmem:[%s10350_s2 + $0xc8] sm:$0xff]  ;;  %v7023_v18 = vpack.c.bf16 %v4693_v15, %v4692_v14  ;;  %vm1335_vm10 = vcmask 785408   ;;  %vm2257_vm11 = vcmask 516096  }
  0x2e   :  { %v42_v19 = vld [vmem:[%s10348_s0 + $0x8] sm:$0xff]  ;;  %v7038_v20 = vpack.c.bf16 %v4708_v17, %v4707_v16  ;;  %v4694_v21 = vld [vmem:[%s10349_s1 + $0xd0] sm:$0xff]  ;;  %v4695_v22 = vld [vmem:[%s10349_s1 + $0xd8] sm:$0xff]  ;;  %vm2263_vm12 = vcmask 1040896   ;;  %s7838_s19 = smov [#allocation3]  }
  0x2f   :  { %5816 = vmatpush3.msk.msra.mxu0 %vm91_vm1, %v54_v6  ;;  %v4709_v23 = vld [vmem:[%s10350_s2 + $0xd0] sm:$0xff]  ;;  %v4710_v24 = vld [vmem:[%s10350_s2 + $0xd8] sm:$0xff]  ;;  %v7026_v25 = vpack.c.bf16 %v4695_v22, %v4694_v21  ;;  %v4696_v28 = vld [vmem:[%s10349_s1 + $0xe0] sm:$0xff]  ;;  %s4644_s20 = sshll.u32 %s7838_s19, 4  ;;  %s4645_s20 = int_to_ptr.vmem [resolvable:$true] %s4644_s20 }
  0x30   :  { %5878 = vmatpush3.msk.msra.mxu1 %vm91_vm1, %v65_v9  ;;  %7019 = vmatprep.subr.bf16.mxu0 %v7833_v3  ;;  %v43_v26 = vld [vmem:[%s10348_s0 + $0x10] sm:$0xff]  ;;  %v7041_v27 = vpack.c.bf16 %v4710_v24, %v4709_v23  ;;  %v4697_v29 = vld [vmem:[%s10349_s1 + $0xe8] sm:$0xff]  ;;  %v4711_v30 = vld [vmem:[%s10350_s2 + $0xe0] sm:$0xff]  ;;  %p7814_p1 = scmp.lt.s32.totalorder %s4645_s20, %s4645_s20 }
  0x31   :  { %7034 = vmatprep.subr.bf16.mxu1 %v7833_v3  ;;  %5818 = vmatmul.mubr.msk.f32.vlgmr.msra.gmra.mrb[0].mxu0 %vm81_vm2, %v41_v10  ;;  %v4712_v31 = vld [vmem:[%s10350_s2 + $0xe8] sm:$0xff]  ;;  %v7029_v32 = vpack.c.bf16 %v4697_v29, %v4696_v28  ;;  %v4698_v34 = vld [vmem:[%s10349_s1 + $0xf0] sm:$0xff]  ;;  %v4699_v35 = vld [vmem:[%s10349_s1 + $0xf8] sm:$0xff] }
  0x32   :  { %5880 = vmatmul.mubr.msk.f32.vlgmr.msra.gmra.mrb[0].mxu1 %vm81_vm2, %v41_v10  ;;  %7021 = vmatpush3.bf16.msra.mxu0 %v7020_v12  ;;  %v7044_v33 = vpack.c.bf16 %v4712_v31, %v4711_v30  ;;  %v4713_v36 = vld [vmem:[%s10350_s2 + $0xf0] sm:$0xff]  ;;  %v4714_v37 = vld [vmem:[%s10350_s2 + $0xf8] sm:$0xff]  ;;  %v7032_v38 = vpack.c.bf16 %v4699_v35, %v4698_v34  ;;  %v4720_v40 = vld [vmem:[%s10349_s1 + $0x108] sm:$0xff] }
  0x33   :  { %7036 = vmatpush3.bf16.msra.mxu1 %v7035_v13  ;;  %7022 = vmatprep.subr.bf16.mxu0 %v7833_v3  ;;  %v7047_v39 = vpack.c.bf16 %v4714_v37, %v4713_v36  ;;  %v4721_v41 = vld [vmem:[%s10349_s1 + $0x110] sm:$0xff]  ;;  %v4700_v42 = vld [vmem:[%s10349_s1 + $0x100] sm:$0xf]  ;;  %v4735_v43 = vld [vmem:[%s10350_s2 + $0x108] sm:$0xff] }
  0x34   :  { %7037 = vmatprep.subr.bf16.mxu1 %v7833_v3  ;;  %5820 = vmatprep.mubr.msk.f32.mxu0 %vm7834_vm0, %v7835_v11  ;;  %v4736_v44 = vld [vmem:[%s10350_s2 + $0x110] sm:$0xff]  ;;  %v4715_v45 = vld [vmem:[%s10350_s2 + $0x100] sm:$0xf]  ;;  %v7050_v47 = vpack.c.bf16 %v4721_v41, %v4720_v40  ;;  %v4722_v49 = vld [vmem:[%s10349_s1 + $0x118] sm:$0xff] }
  0x35   :  { %5882 = vmatprep.mubr.msk.f32.mxu1 %vm7834_vm0, %v7835_v11  ;;  %5821 = vmatmul.mubr.msk.f32.gmra.mrb[2].mxu0 %vm81_vm2, %v42_v19  ;;  %v445_v46 = vld [vmem:[%s10348_s0 + $0x2] sm:$0xff]  ;;  %v7065_v48 = vpack.c.bf16 %v4736_v44, %v4735_v43  ;;  %v4737_v51 = vld [vmem:[%s10350_s2 + $0x118] sm:$0xff]  ;;  %v446_v54 = vld [vmem:[%s10348_s0 + $0xa] sm:$0xff] }
  0x36   :  { %7024 = vmatpush3.bf16.msra.mxu0 %v7023_v18  ;;  %5883 = vmatmul.mubr.msk.f32.gmra.mrb[2].mxu1 %vm81_vm2, %v42_v19  ;;  %v4723_v50 = vld [vmem:[%s10349_s1 + $0x120] sm:$0xff]  ;;  %v4724_v56 = vld [vmem:[%s10349_s1 + $0x128] sm:$0xff]  ;;  %v4725_v57 = vld [vmem:[%s10349_s1 + $0x130] sm:$0xff] }
  0x37   :  { %7039 = vmatpush3.bf16.msra.mxu1 %v7038_v20  ;;  %7025 = vmatprep.subr.bf16.mxu0 %v7833_v3  ;;  %v4738_v52 = vld [vmem:[%s10350_s2 + $0x120] sm:$0xff]  ;;  %v7053_v53 = vpack.c.bf16 %v4723_v50, %v4722_v49  ;;  %v4739_v58 = vld [vmem:[%s10350_s2 + $0x128] sm:$0xff]  ;;  %v4740_v59 = vld [vmem:[%s10350_s2 + $0x130] sm:$0xff]  ;;  %v7056_v60 = vpack.c.bf16 %v4725_v57, %v4724_v56 }
  0x38   :  { %7040 = vmatprep.subr.bf16.mxu1 %v7833_v3  ;;  %5823 = vmatprep.mubr.msk.f32.mxu0 %vm7834_vm0, %v7835_v11  ;;  %v7068_v55 = vpack.c.bf16 %v4738_v52, %v4737_v51  ;;  %v447_v61 = vld [vmem:[%s10348_s0 + $0x12] sm:$0xff]  ;;  %v7071_v62 = vpack.c.bf16 %v4740_v59, %v4739_v58  ;;  %v4727_v0 = vld [vmem:[%s10349_s1 + $0x140] sm:$0xff]  ;;  %v4728_v6 = vld [vmem:[%s10349_s1 + $0x148] sm:$0xff] }
  0x39   :  { %5885 = vmatprep.mubr.msk.f32.mxu1 %vm7834_vm0, %v7835_v11  ;;  %5824 = vmatmul.mubr.msk.f32.gmra.mrb[4].mxu0 %vm81_vm2, %v43_v26  ;;  %v4726_v63 = vld [vmem:[%s10349_s1 + $0x138] sm:$0xff]  ;;  %v4742_v2 = vld [vmem:[%s10350_s2 + $0x140] sm:$0xff]  ;;  %v4729_v7 = vld [vmem:[%s10349_s1 + $0x150] sm:$0xff] }
  0x3a   :  { %7027 = vmatpush3.bf16.msra.mxu0 %v7026_v25  ;;  %5886 = vmatmul.mubr.msk.f32.gmra.mrb[4].mxu1 %vm81_vm2, %v43_v26  ;;  %v4741_v1 = vld [vmem:[%s10350_s2 + $0x138] sm:$0xff]  ;;  %v7059_v4 = vpack.c.bf16 %v4727_v0, %v4726_v63  ;;  %v4743_v8 = vld [vmem:[%s10350_s2 + $0x148] sm:$0xff]  ;;  %v4744_v9 = vld [vmem:[%s10350_s2 + $0x150] sm:$0xff]  ;;  %v7062_v10 = vpack.c.bf16 %v4729_v7, %v4728_v6 }
  0x3b   :  { %7042 = vmatpush3.bf16.msra.mxu1 %v7041_v27  ;;  %7028 = vmatprep.subr.bf16.mxu0 %v7833_v3  ;;  %v7074_v5 = vpack.c.bf16 %v4742_v2, %v4741_v1  ;;  %v7077_v12 = vpack.c.bf16 %v4744_v9, %v4743_v8  ;;  %v4750_v13 = vld [vmem:[%s10349_s1 + $0x160] sm:$0xff]  ;;  %v4751_v14 = vld [vmem:[%s10349_s1 + $0x168] sm:$0xff]  ;;  %v4730_v15 = vld [vmem:[%s10349_s1 + $0x158] sm:$0xf] }
  0x3c   :  { %7043 = vmatprep.subr.bf16.mxu1 %v7833_v3  ;;  %5910 = vmatprep.mubr.msk.f32.mxu0 %vm7834_vm0, %v7835_v11  ;;  %v4765_v16 = vld [vmem:[%s10350_s2 + $0x160] sm:$0xff]  ;;  %v4766_v17 = vld [vmem:[%s10350_s2 + $0x168] sm:$0xff]  ;;  %v4745_v18 = vld [vmem:[%s10350_s2 + $0x158] sm:$0xf]  ;;  %v7080_v20 = vpack.c.bf16 %v4751_v14, %v4750_v13 }
  0x3d   :  { %5941 = vmatprep.mubr.msk.f32.mxu1 %vm7834_vm0, %v7835_v11  ;;  %v653_v19 = vld [vmem:[%s10348_s0 + $0x3] sm:$0xff]  ;;  %v7095_v21 = vpack.c.bf16 %v4766_v17, %v4765_v16  ;;  %v4752_v22 = vld [vmem:[%s10349_s1 + $0x170] sm:$0xff]  ;;  %v4753_v23 = vld [vmem:[%s10349_s1 + $0x178] sm:$0xff] }
  0x3e   :  { %7030 = vmatpush3.bf16.msra.mxu0 %v7029_v32  ;;  %v4767_v24 = vld [vmem:[%s10350_s2 + $0x170] sm:$0xff]  ;;  %v4768_v25 = vld [vmem:[%s10350_s2 + $0x178] sm:$0xff]  ;;  %v7083_v26 = vpack.c.bf16 %v4753_v23, %v4752_v22  ;;  %v4754_v29 = vld [vmem:[%s10349_s1 + $0x180] sm:$0xff] }
  0x3f   :  { %7045 = vmatpush3.bf16.msra.mxu1 %v7044_v33  ;;  %7031 = vmatprep.subr.bf16.mxu0 %v7833_v3  ;;  %v654_v27 = vld [vmem:[%s10348_s0 + $0xb] sm:$0xff]  ;;  %v7098_v28 = vpack.c.bf16 %v4768_v25, %v4767_v24  ;;  %v4769_v31 = vld [vmem:[%s10350_s2 + $0x180] sm:$0xff]  ;;  %v655_v34 = vld [vmem:[%s10348_s0 + $0x13] sm:$0xff] }
  0x40   :  { %7046 = vmatprep.subr.bf16.mxu1 %v7833_v3  ;;  %v4755_v30 = vld [vmem:[%s10349_s1 + $0x188] sm:$0xff]  ;;  %v4756_v36 = vld [vmem:[%s10349_s1 + $0x190] sm:$0xff]  ;;  %v4757_v37 = vld [vmem:[%s10349_s1 + $0x198] sm:$0xff] }
  0x41   :  { %v4770_v32 = vld [vmem:[%s10350_s2 + $0x188] sm:$0xff]  ;;  %v7086_v33 = vpack.c.bf16 %v4755_v30, %v4754_v29  ;;  %v7089_v40 = vpack.c.bf16 %v4757_v37, %v4756_v36  ;;  %v4773_v44 = vld [vmem:[%s10350_s2 + $0x1a0] sm:$0xff]  ;;  %v4775_v49 = vld [vmem:[%s10350_s2 + $0x1b0] sm:$0xf]  ;;  %v1079_v29 = vlaneseq }
  0x42   :  { %7033 = vmatpush3.bf16.msra.mxu0 %v7032_v38  ;;  %v7101_v35 = vpack.c.bf16 %v4770_v32, %v4769_v31  ;;  %v4771_v38 = vld [vmem:[%s10350_s2 + $0x190] sm:$0xff]  ;;  %v4759_v43 = vld [vmem:[%s10349_s1 + $0x1a8] sm:$0xff]  ;;  %v4810_v63 = vld [vmem:[%s10353_s5 + $0x78] sm:$0xff] }
  0x43   :  { %7048 = vmatpush3.bf16.msra.mxu1 %v7047_v39  ;;  %5908 = vmatprep.subr.mxu0 %v7835_v11  ;;  %v4772_v39 = vld [vmem:[%s10350_s2 + $0x198] sm:$0xff]  ;;  %v861_v50 = vld [vmem:[%s10348_s0 + $0x4] sm:$0xff]  ;;  %v862_v51 = vld [vmem:[%s10348_s0 + $0xc] sm:$0xff]  ;;  %v1080_v31 = vshrl.u32 %v1079_v29, 7 }
  0x44   :  { %5939 = vmatprep.subr.mxu1 %v7835_v11  ;;  %v7104_v41 = vpack.c.bf16 %v4772_v39, %v4771_v38  ;;  %v863_v52 = vld [vmem:[%s10348_s0 + $0x14] sm:$0xff]  ;;  %v4808_v57 = vld [vmem:[%s10353_s5 + $0x68] sm:$0xff]  ;;  %v4797_v1 = vld [vmem:[%s10352_s4 + $0x80] sm:$0xff] }
  0x45   :  { %v4795_v59 = vld [vmem:[%s10352_s4 + $0x70] sm:$0xff]  ;;  %v4798_v2 = vld [vmem:[%s10352_s4 + $0x88] sm:$0xff]  ;;  %v4800_v9 = vld [vmem:[%s10352_s4 + $0x98] sm:$0xff] }
  0x46   :  { %5909 = vmatpush3.msk.msra.mxu0 %vm91_vm1, %v4700_v42  ;;  %v4758_v42 = vld [vmem:[%s10349_s1 + $0x1a0] sm:$0xff]  ;;  %v4812_v6 = vld [vmem:[%s10353_s5 + $0x88] sm:$0xff]  ;;  %v4799_v8 = vld [vmem:[%s10352_s4 + $0x90] sm:$0xff] }
  0x47   :  { %5940 = vmatpush3.msk.msra.mxu1 %vm91_vm1, %v4715_v45  ;;  %7049 = vmatprep.subr.bf16.mxu0 %v7833_v3  ;;  %v4774_v45 = vld [vmem:[%s10350_s2 + $0x1a8] sm:$0xff]  ;;  %v4814_v13 = vld [vmem:[%s10353_s5 + $0x98] sm:$0xff]  ;;  %v4815_v17 = vld [vmem:[%s10353_s5 + $0xa0] sm:$0xff] }
  0x48   :  { %7064 = vmatprep.subr.bf16.mxu1 %v7833_v3  ;;  %5911 = vmatmul.mubr.msk.f32.vlgmr.msra.gmra.mrb[0].mxu0 %vm81_vm2, %v445_v46  ;;  %v4802_v16 = vld [vmem:[%s10352_s4 + $0xa8] sm:$0xff]  ;;  %v4804_v22 = vld [vmem:[%s10352_s4 + $0xb8] sm:$0xff]  ;;  %v4817_v23 = vld [vmem:[%s10353_s5 + $0xb0] sm:$0xff] }
  0x49   :  { %5942 = vmatmul.mubr.msk.f32.vlgmr.msra.gmra.mrb[0].mxu1 %vm81_vm2, %v445_v46  ;;  %7051 = vmatpush3.bf16.msra.mxu0 %v7050_v47  ;;  %v7092_v46 = vpack.c.bf16 %v4759_v43, %v4758_v42  ;;  %v7107_v47 = vpack.c.bf16 %v4774_v45, %v4773_v44  ;;  %v4818_v25 = vld [vmem:[%s10353_s5 + $0xb8] sm:$0xff]  ;;  %v4792_v32 = vld [vmem:[%s10351_s3] ss:$0 sm:$0xff] }
  0x4a   :  { %7066 = vmatpush3.bf16.msra.mxu1 %v7065_v48  ;;  %7052 = vmatprep.subr.bf16.mxu0 %v7833_v3  ;;  %v4760_v48 = vld [vmem:[%s10349_s1 + $0x1b0] sm:$0xf]  ;;  %v8546_v44 = vld [vmem:[%s10352_s4] sm:$0xff] }
  0x4b   :  { %7067 = vmatprep.subr.bf16.mxu1 %v7833_v3  ;;  %5913 = vmatprep.mubr.msk.f32.mxu0 %vm7834_vm0, %v7835_v11 }
  0x4c   :  { %5944 = vmatprep.mubr.msk.f32.mxu1 %vm7834_vm0, %v7835_v11  ;;  %5914 = vmatmul.mubr.msk.f32.gmra.mrb[2].mxu0 %vm81_vm2, %v446_v54 }
  0x4d   :  { %7054 = vmatpush3.bf16.msra.mxu0 %v7053_v53  ;;  %5945 = vmatmul.mubr.msk.f32.gmra.mrb[2].mxu1 %vm81_vm2, %v446_v54  ;;  %v4793_v53 = vld [vmem:[%s10352_s4 + $0x60] sm:$0xff]  ;;  %v4794_v54 = vld [vmem:[%s10352_s4 + $0x68] sm:$0xff] }
  0x4e   :  { %7069 = vmatpush3.bf16.msra.mxu1 %v7068_v55  ;;  %7055 = vmatprep.subr.bf16.mxu0 %v7833_v3  ;;  %v4807_v55 = vld [vmem:[%s10353_s5 + $0x60] sm:$0xff]  ;;  %v7110_v56 = vpack.c.bf16 %v4794_v54, %v4793_v53  ;;  %v8570_v53 = vsub.s32 0, %v1080_v31 }
  0x4f   :  { %7070 = vmatprep.subr.bf16.mxu1 %v7833_v3  ;;  %5916 = vmatprep.mubr.msk.f32.mxu0 %vm7834_vm0, %v7835_v11  ;;  %v7146_v58 = vpack.c.bf16 %v4808_v57, %v4807_v55  ;;  %v8576_v57 = vld [vmem:[%s10352_s4 + $0x10] sm:$0xff] }
  0x50   :  { %5947 = vmatprep.mubr.msk.f32.mxu1 %vm7834_vm0, %v7835_v11  ;;  %5917 = vmatmul.mubr.msk.f32.gmra.mrb[4].mxu0 %vm81_vm2, %v447_v61 }
  0x51   :  { %7057 = vmatpush3.bf16.msra.mxu0 %v7056_v60  ;;  %5948 = vmatmul.mubr.msk.f32.gmra.mrb[4].mxu1 %vm81_vm2, %v447_v61  ;;  %v4796_v60 = vld [vmem:[%s10352_s4 + $0x78] sm:$0xff]  ;;  %v4809_v61 = vld [vmem:[%s10353_s5 + $0x70] sm:$0xff] }
  0x52   :  { %7072 = vmatpush3.bf16.msra.mxu1 %v7071_v62  ;;  %7058 = vmatprep.subr.bf16.mxu0 %v7833_v3  ;;  %v7113_v62 = vpack.c.bf16 %v4796_v60, %v4795_v59  ;;  %v7149_v0 = vpack.c.bf16 %v4810_v63, %v4809_v61  ;;  %v8582_v63 = vld [vmem:[%s10352_s4 + $0x18] sm:$0xff] }
  0x53   :  { %7073 = vmatprep.subr.bf16.mxu1 %v7833_v3  ;;  %5972 = vmatprep.mubr.msk.f32.mxu0 %vm7834_vm0, %v7835_v11 }
  0x54   :  { %6003 = vmatprep.mubr.msk.f32.mxu1 %vm7834_vm0, %v7835_v11 }
  0x55   :  { %7060 = vmatpush3.bf16.msra.mxu0 %v7059_v4  ;;  %v4811_v4 = vld [vmem:[%s10353_s5 + $0x80] sm:$0xff] }
  0x56   :  { %7075 = vmatpush3.bf16.msra.mxu1 %v7074_v5  ;;  %7061 = vmatprep.subr.bf16.mxu0 %v7833_v3  ;;  %v7116_v5 = vpack.c.bf16 %v4798_v2, %v4797_v1  ;;  %v7152_v7 = vpack.c.bf16 %v4812_v6, %v4811_v4  ;;  %v8592_v1 = vld [vmem:[%s10353_s5 + $0x18] sm:$0xff] }
  0x57   :  { %7076 = vmatprep.subr.bf16.mxu1 %v7833_v3 }
  0x59   :  { %7063 = vmatpush3.bf16.msra.mxu0 %v7062_v10  ;;  %v4813_v10 = vld [vmem:[%s10353_s5 + $0x90] sm:$0xff] }
  0x5a   :  { %7078 = vmatpush3.bf16.msra.mxu1 %v7077_v12  ;;  %5970 = vmatprep.subr.mxu0 %v7835_v11  ;;  %v7119_v12 = vpack.c.bf16 %v4800_v9, %v4799_v8  ;;  %v7155_v14 = vpack.c.bf16 %v4814_v13, %v4813_v10 }
  0x5b   :  { %6001 = vmatprep.subr.mxu1 %v7835_v11 }
  0x5d   :  { %5971 = vmatpush3.msk.msra.mxu0 %vm91_vm1, %v4730_v15  ;;  %v4801_v15 = vld [vmem:[%s10352_s4 + $0xa0] sm:$0xff] }
  0x5e   :  { %6002 = vmatpush3.msk.msra.mxu1 %vm91_vm1, %v4745_v18  ;;  %7079 = vmatprep.subr.bf16.mxu0 %v7833_v3  ;;  %v7122_v18 = vpack.c.bf16 %v4802_v16, %v4801_v15  ;;  %v7131_v16 = vpack.c.bf16 %v8582_v63, %v8576_v57  ;;  %v1251_v57 = vld [vmem:[%s10352_s4 + $0x38] sm:$0xff]  ;;  %v1262_v63 = vld [vmem:[%s10353_s5 + $0x30] sm:$0xff] }
  0x5f   :  { %7094 = vmatprep.subr.bf16.mxu1 %v7833_v3  ;;  %5973 = vmatmul.mubr.msk.f32.vlgmr.msra.gmra.mrb[0].mxu0 %vm81_vm2, %v653_v19 }
  0x60   :  { %6004 = vmatmul.mubr.msk.f32.vlgmr.msra.gmra.mrb[0].mxu1 %vm81_vm2, %v653_v19  ;;  %7081 = vmatpush3.bf16.msra.mxu0 %v7080_v20  ;;  %v4816_v19 = vld [vmem:[%s10353_s5 + $0xa8] sm:$0xff] }
  0x61   :  { %7096 = vmatpush3.bf16.msra.mxu1 %v7095_v21  ;;  %7082 = vmatprep.subr.bf16.mxu0 %v7833_v3  ;;  %v7158_v20 = vpack.c.bf16 %v4816_v19, %v4815_v17  ;;  %v4803_v21 = vld [vmem:[%s10352_s4 + $0xb0] sm:$0xff] }
  0x62   :  { %7097 = vmatprep.subr.bf16.mxu1 %v7833_v3  ;;  %5975 = vmatprep.mubr.msk.f32.mxu0 %vm7834_vm0, %v7835_v11  ;;  %v7125_v24 = vpack.c.bf16 %v4804_v22, %v4803_v21 }
  0x63   :  { %6006 = vmatprep.mubr.msk.f32.mxu1 %vm7834_vm0, %v7835_v11  ;;  %5976 = vmatmul.mubr.msk.f32.gmra.mrb[2].mxu0 %vm81_vm2, %v654_v27 }
  0x64   :  { %7084 = vmatpush3.bf16.msra.mxu0 %v7083_v26  ;;  %6007 = vmatmul.mubr.msk.f32.gmra.mrb[2].mxu1 %vm81_vm2, %v654_v27  ;;  %v7161_v26 = vpack.c.bf16 %v4818_v25, %v4817_v23  ;;  %v7836_v27 = vmov 1983009808  }
  0x65   :  { %7099 = vmatpush3.bf16.msra.mxu1 %v7098_v28  ;;  %7085 = vmatprep.subr.bf16.mxu0 %v7833_v3  ;;  %v1077_v28 = vunpack.c.l.s4 %v7836_v27 }
  0x66   :  { %7100 = vmatprep.subr.bf16.mxu1 %v7833_v3  ;;  %5978 = vmatprep.mubr.msk.f32.mxu0 %vm7834_vm0, %v7835_v11 }
  0x67   :  { %6009 = vmatprep.mubr.msk.f32.mxu1 %vm7834_vm0, %v7835_v11  ;;  %5979 = vmatmul.mubr.msk.f32.gmra.mrb[4].mxu0 %vm81_vm2, %v655_v34  ;;  %v1078_v30 = vunpack.c.0.s8 %v1077_v28 }
  0x68   :  { %7087 = vmatpush3.bf16.msra.mxu0 %v7086_v33  ;;  %6010 = vmatmul.mubr.msk.f32.gmra.mrb[4].mxu1 %vm81_vm2, %v655_v34  ;;  %v1191_v34 = vcombine.high %v4792_v32, %v4792_v32 }
  0x69   :  { %7102 = vmatpush3.bf16.msra.mxu1 %v7101_v35  ;;  %7088 = vmatprep.subr.bf16.mxu0 %v7833_v3  ;;  %v8527_v33 = vsub.s32 %v1078_v30, %v1080_v31 }
  0x6a   :  { %7103 = vmatprep.subr.bf16.mxu1 %v7833_v3  ;;  %6034 = vmatprep.mubr.msk.f32.mxu0 %vm7834_vm0, %v7835_v11 }
  0x6b   :  { %6065 = vmatprep.mubr.msk.f32.mxu1 %vm7834_vm0, %v7835_v11  ;;  %v8530_v35 = vrot.slane %v4792_v32, %v8527_v33  ;;  %v8533_v36 = vrot.slane %v1191_v34, %v8527_v33 }
  0x6c   :  { %7090 = vmatpush3.bf16.msra.mxu0 %v7089_v40 }
  0x6d   :  { %7105 = vmatpush3.bf16.msra.mxu1 %v7104_v41  ;;  %7091 = vmatprep.subr.bf16.mxu0 %v7833_v3  ;;  %v8537_v39 = vcombine.high %v8530_v35, %v8530_v35  ;;  %v8541_v43 = vcombine.high %v8533_v36, %v8533_v36  ;;  %v1210_v55 = vrot.slane %v8533_v36, 1 }
  0x6e   :  { %7106 = vmatprep.subr.bf16.mxu1 %v7833_v3 }
  0x6f   :  { %v1211_v2 = vrot.slane %v8541_v43, 1 }
  0x70   :  { %7093 = vmatpush3.bf16.msra.mxu0 %v7092_v46 }
  0x71   :  { %7108 = vmatpush3.bf16.msra.mxu1 %v7107_v47  ;;  %6032 = vmatprep.subr.mxu0 %v7835_v11  ;;  %v8550_v47 = vrot.slane %v8530_v35, 1 }
  0x72   :  { %6063 = vmatprep.subr.mxu1 %v7835_v11 }
  0x74   :  { %6033 = vmatpush3.msk.msra.mxu0 %vm91_vm1, %v4760_v48 }
  0x75   :  { %6064 = vmatpush3.msk.msra.mxu1 %vm91_vm1, %v4775_v49  ;;  %6035 = vmatmul.mubr.msk.f32.vlgmr.msra.gmra.mrb[0].mxu0 %vm81_vm2, %v861_v50  ;;  %v8555_v49 = vld [vmem:[%s10352_s4 + $0x8] sm:$0xff] }
  0x76   :  { %6066 = vmatmul.mubr.msk.f32.vlgmr.msra.gmra.mrb[0].mxu1 %vm81_vm2, %v861_v50  ;;  %6037 = vmatprep.mubr.msk.f32.mxu0 %vm7834_vm0, %v7835_v11  ;;  %v8560_v50 = vld [vmem:[%s10353_s5] sm:$0xff]  ;;  %v7128_v4 = vpack.c.bf16 %v8555_v49, %v8546_v44  ;;  %v1249_v44 = vld [vmem:[%s10352_s4 + $0x28] sm:$0xff] }
  0x77   :  { %6068 = vmatprep.mubr.msk.f32.mxu1 %vm7834_vm0, %v7835_v11  ;;  %7109 = vmatprep.subr.bf16.mxu0 %v7833_v3  ;;  %v1260_v49 = vld [vmem:[%s10353_s5 + $0x20] sm:$0xff] }
  0x78   :  { %7145 = vmatprep.subr.bf16.mxu1 %v7833_v3  ;;  %7111 = vmatpush3.bf16.msra.mxu0 %v7110_v56 }
  0x79   :  { %6038 = vmatmul.mubr.msk.f32.gmra.mrb[2].mxu0 %vm81_vm2, %v862_v51  ;;  %7147 = vmatpush3.bf16.msra.mxu1 %v7146_v58 }
  0x7a   :  { %6069 = vmatmul.mubr.msk.f32.gmra.mrb[2].mxu1 %vm81_vm2, %v862_v51  ;;  %6040 = vmatprep.mubr.msk.f32.mxu0 %vm7834_vm0, %v7835_v11  ;;  %v8565_v51 = vld [vmem:[%s10353_s5 + $0x8] sm:$0xff] }
  0x7b   :  { %6071 = vmatprep.mubr.msk.f32.mxu1 %vm7834_vm0, %v7835_v11  ;;  %7112 = vmatprep.subr.bf16.mxu0 %v7833_v3 }
  0x7c   :  { %7148 = vmatprep.subr.bf16.mxu1 %v7833_v3  ;;  %7114 = vmatpush3.bf16.msra.mxu0 %v7113_v62 }
  0x7d   :  { %6041 = vmatmul.mubr.msk.f32.gmra.mrb[4].mxu0 %vm81_vm2, %v863_v52  ;;  %7150 = vmatpush3.bf16.msra.mxu1 %v7149_v0  ;;  %v8587_v0 = vld [vmem:[%s10353_s5 + $0x10] sm:$0xff] }
  0x7e   :  { %6072 = vmatmul.mubr.msk.f32.gmra.mrb[4].mxu1 %vm81_vm2, %v863_v52  ;;  %6098 = vmatprep.mubr.msk.f32.mxu0 %vm7834_vm0, %v7835_v11  ;;  %v8568_v52 = vrot.slane %v8537_v39, 1  ;;  %v7167_v17 = vpack.c.bf16 %v8592_v1, %v8587_v0  ;;  %v1263_v0 = vld [vmem:[%s10353_s5 + $0x38] sm:$0xff] }
  0x7f   :  { %6152 = vmatprep.mubr.msk.f32.mxu1 %vm7834_vm0, %v7835_v11  ;;  %7115 = vmatprep.subr.bf16.mxu0 %v7833_v3 }
  0x80   :  { %7151 = vmatprep.subr.bf16.mxu1 %v7833_v3  ;;  %7117 = vmatpush3.bf16.msra.mxu0 %v7116_v5  ;;  %v7164_v5 = vpack.c.bf16 %v8565_v51, %v8560_v50  ;;  %v1261_v50 = vld [vmem:[%s10353_s5 + $0x28] sm:$0xff] }
  0x81   :  { %7153 = vmatpush3.bf16.msra.mxu1 %v7152_v7  ;;  %7118 = vmatprep.subr.bf16.mxu0 %v7833_v3 }
  0x82   :  { %7154 = vmatprep.subr.bf16.mxu1 %v7833_v3 }
  0x84   :  { %7120 = vmatpush3.bf16.msra.mxu0 %v7119_v12 }
  0x85   :  { %7156 = vmatpush3.bf16.msra.mxu1 %v7155_v14  ;;  %7121 = vmatprep.subr.bf16.mxu0 %v7833_v3 }
  0x86   :  { %7157 = vmatprep.subr.bf16.mxu1 %v7833_v3 }
  0x88   :  { %7123 = vmatpush3.bf16.msra.mxu0 %v7122_v18 }
  0x89   :  { %7159 = vmatpush3.bf16.msra.mxu1 %v7158_v20  ;;  %7124 = vmatprep.subr.bf16.mxu0 %v7833_v3 }
  0x8a   :  { %7160 = vmatprep.subr.bf16.mxu1 %v7833_v3 }
  0x8c   :  { %7126 = vmatpush3.bf16.msra.mxu0 %v7125_v24 }
  0x8d   :  { %7162 = vmatpush3.bf16.msra.mxu1 %v7161_v26  ;;  %7127 = vmatprep.subr.bf16.mxu0 %v7833_v3 }
  0x8e   :  { %7163 = vmatprep.subr.bf16.mxu1 %v7833_v3 }
 0x148   :  { %v954_v37 = vpop.f32.mrb[0].mxu0 }
 0x149   :  { %v1052_v38 = vpop.f32.mrb[0].mxu1  ;;  %v6036_v40 = vpop.f32.mrb[1].mxu0 }
 0x14a   :  { %v1069_v41 = vmax.f32 %v954_v37, %v1052_v38  ;;  %v6067_v42 = vpop.f32.mrb[1].mxu1 }
 0x14c   :  { %v1075_v45 = vcombine.high %v1069_v41, %v1069_v41  ;;  %v1082_v46 = vrot.slane %v1069_v41, %v8527_v33  ;;  %v959_v48 = vpop.f32.mrb[2].mxu0 }
 0x14d   :  { %v1057_v54 = vpop.f32.mrb[2].mxu1  ;;  %v6039_v56 = vpop.f32.mrb[3].mxu0 }
 0x14e   :  { %v1089_v58 = vrot.slane %v1075_v45, %v8527_v33  ;;  %v1090_v59 = vcombine.high %v1082_v46, %v1082_v46  ;;  %v4780_v60 = vrot.slane %v1082_v46, 9  ;;  %v1070_v61 = vmax.f32 %v959_v48, %v1057_v54  ;;  %v6070_v62 = vpop.f32.mrb[3].mxu1 }
 0x150   :  { %v1091_v6 = vcombine.high %v1089_v58, %v1089_v58  ;;  %v4781_v7 = vrot.slane %v1090_v59, 9  ;;  %v4782_v8 = vrot.slane %v1089_v58, 9  ;;  %v1174_v9 = vmax.f32 %v1082_v46, %v4780_v60  ;;  %v964_v10 = vpop.f32.mrb[4].mxu0 }
 0x151   :  { %v1092_v12 = vcombine.high %v1070_v61, %v1070_v61  ;;  %v1099_v13 = vrot.slane %v1070_v61, %v8527_v33  ;;  %v1062_v14 = vpop.f32.mrb[4].mxu1  ;;  %v6042_v15 = vpop.f32.mrb[5].mxu0 }
 0x152   :  { %v4783_v18 = vrot.slane %v1091_v6, 9  ;;  %v1175_v19 = vmax.f32 %v1090_v59, %v4781_v7  ;;  %v1176_v20 = vmax.f32 %v1089_v58, %v4782_v8  ;;  %v1220_v21 = vadd.f32 %v8530_v35, %v1174_v9  ;;  %v6073_v22 = vpop.f32.mrb[5].mxu1 }
 0x153   :  { %v1106_v23 = vrot.slane %v1092_v12, %v8527_v33  ;;  %v1107_v24 = vcombine.high %v1099_v13, %v1099_v13  ;;  %v4784_v25 = vrot.slane %v1099_v13, 9  ;;  %v1071_v26 = vmax.f32 %v964_v10, %v1062_v14 }
 0x154   :  { %v1177_v27 = vmax.f32 %v1091_v6, %v4783_v18  ;;  %v1221_v28 = vadd.f32 %v8550_v47, %v1175_v19  ;;  %v1222_v29 = vadd.f32 %v8537_v39, %v1176_v20  ;;  %v1232_v30 = vmax.f32 %v1220_v21, 0.0 }
 0x155   :  { %v1108_v31 = vcombine.high %v1106_v23, %v1106_v23  ;;  %v4785_v32 = vrot.slane %v1107_v24, 9  ;;  %v4786_v34 = vrot.slane %v1106_v23, 9  ;;  %v1178_v37 = vmax.f32 %v1099_v13, %v4784_v25 }
 0x156   :  { %v1223_v38 = vadd.f32 %v8568_v52, %v1177_v27  ;;  %v1233_v40 = vmax.f32 %v1221_v28, 0.0  ;;  %v1234_v41 = vmax.f32 %v1222_v29, 0.0  ;;  %v1412_v42 = vrot.slane %v1232_v30, %v8570_v53 }
 0x157   :  { %v4787_v45 = vrot.slane %v1108_v31, 9  ;;  %v1179_v46 = vmax.f32 %v1107_v24, %v4785_v32  ;;  %v1180_v48 = vmax.f32 %v1106_v23, %v4786_v34  ;;  %v1224_v54 = vadd.f32 %v8533_v36, %v1178_v37 }
 0x158   :  { %v1235_v56 = vmax.f32 %v1223_v38, 0.0  ;;  %v1292_v58 = vrot.slane %v1233_v40, %v8570_v53  ;;  %v1296_v59 = vrot.slane %v1234_v41, %v8570_v53  ;;  %v1109_v60 = vcombine.high %v1071_v26, %v1071_v26 }
 0x159   :  { %v1181_v61 = vmax.f32 %v1108_v31, %v4787_v45  ;;  %v1225_v62 = vadd.f32 %v1210_v55, %v1179_v46  ;;  %v1226_v6 = vadd.f32 %v8541_v43, %v1180_v48  ;;  %v1236_v7 = vmax.f32 %v1224_v54, 0.0 }
 0x15a   :  { %v1300_v8 = vrot.slane %v1235_v56, %v8570_v53  ;;  %v1322_v9 = vsel %vm1321_vm3, %v1296_v59, %v1292_v58  ;;  %v1413_v10 = vsel %vm1321_vm3, %v1292_v58, %v1412_v42  ;;  %v1116_v12 = vrot.slane %v1071_v26, %v8527_v33 }
 0x15b   :  { %v1227_v13 = vadd.f32 %v1211_v2, %v1181_v61  ;;  %v1237_v14 = vmax.f32 %v1225_v62, 0.0  ;;  %v1238_v15 = vmax.f32 %v1226_v6, 0.0  ;;  %v1304_v18 = vrot.slane %v1236_v7, %v8570_v53 }
 0x15c   :  { %v1663_v19 = vsel %vm1321_vm3, %v1300_v8, %v1296_v59  ;;  %v1123_v20 = vrot.slane %v1109_v60, %v8527_v33  ;;  %v1124_v21 = vcombine.high %v1116_v12, %v1116_v12  ;;  %v4788_v22 = vrot.slane %v1116_v12, 9 }
 0x15d   :  { %v1239_v23 = vmax.f32 %v1227_v13, 0.0  ;;  %v1308_v24 = vrot.slane %v1237_v14, %v8570_v53  ;;  %v1312_v25 = vrot.slane %v1238_v15, %v8570_v53  ;;  %v1324_v26 = vsel %vm1323_vm4, %v1300_v8, %v1322_v9 }
 0x15e   :  { %v1125_v27 = vcombine.high %v1123_v20, %v1123_v20  ;;  %v4789_v28 = vrot.slane %v1124_v21, 9  ;;  %v4790_v29 = vrot.slane %v1123_v20, 9  ;;  %v1182_v30 = vmax.f32 %v1116_v12, %v4788_v22 }
 0x15f   :  { %v1316_v31 = vrot.slane %v1239_v23, %v8570_v53  ;;  %v1326_v32 = vsel %vm1325_vm5, %v1304_v18, %v1324_v26  ;;  %v1414_v34 = vsel %vm1323_vm4, %v1296_v59, %v1413_v10  ;;  %v1664_v37 = vsel %vm1323_vm4, %v1304_v18, %v1663_v19 }
 0x160   :  { %v4791_v38 = vrot.slane %v1125_v27, 9  ;;  %v1183_v40 = vmax.f32 %v1124_v21, %v4789_v28  ;;  %v1184_v41 = vmax.f32 %v1123_v20, %v4790_v29  ;;  %v1228_v42 = vadd.f32 %v8530_v35, %v1182_v30  ;;  %v1248_v30 = vld [vmem:[%s10352_s4 + $0x20] sm:$0xff] }
 0x161   :  { %v1328_v45 = vsel %vm1327_vm6, %v1308_v24, %v1326_v32  ;;  %v1415_v46 = vsel %vm1325_vm5, %v1300_v8, %v1414_v34  ;;  %v1665_v48 = vsel %vm1325_vm5, %v1308_v24, %v1664_v37  ;;  %v1845_v54 = vsel %vm1321_vm3, %v1304_v18, %v1300_v8 }
 0x162   :  { %v1185_v56 = vmax.f32 %v1125_v27, %v4791_v38  ;;  %v1229_v58 = vadd.f32 %v8550_v47, %v1183_v40  ;;  %v1230_v59 = vadd.f32 %v8537_v39, %v1184_v41  ;;  %v1240_v60 = vmax.f32 %v1228_v42, 0.0  ;;  %v1250_v41 = vld [vmem:[%s10352_s4 + $0x30] sm:$0xff] }
 0x163   :  { %v1330_v61 = vsel %vm1329_vm7, %v1312_v25, %v1328_v45  ;;  %v1416_v62 = vsel %vm1327_vm6, %v1304_v18, %v1415_v46  ;;  %v1666_v6 = vsel %vm1327_vm6, %v1312_v25, %v1665_v48  ;;  %v1846_v7 = vsel %vm1323_vm4, %v1308_v24, %v1845_v54  ;;  %v1252_v45 = vld [vmem:[%s10352_s4 + $0x40] sm:$0xff]  ;;  %v1253_v46 = vld [vmem:[%s10352_s4 + $0x48] sm:$0xff] }
 0x164   :  { %v1241_v9 = vmax.f32 %v1229_v58, 0.0  ;;  %v1242_v10 = vmax.f32 %v1230_v59, 0.0  ;;  %v1320_v12 = vrot.slane %v1240_v60, %v8570_v53  ;;  %v1332_v8 = vsel %vm1331_vm8, %v1316_v31, %v1330_v61  ;;  %v1264_v48 = vld [vmem:[%s10353_s5 + $0x40] sm:$0xff]  ;;  %v1265_v54 = vld [vmem:[%s10353_s5 + $0x48] sm:$0xff]  ;;  %v1254_v59 = vld [vmem:[%s10352_s4 + $0x50] sm:$0xff] }
 0x165   :  { %v1417_v13 = vsel %vm1329_vm7, %v1308_v24, %v1416_v62  ;;  %v1667_v14 = vsel %vm1329_vm7, %v1316_v31, %v1666_v6  ;;  %v1847_v15 = vsel %vm1325_vm5, %v1312_v25, %v1846_v7  ;;  %v1231_v19 = vadd.f32 %v8568_v52, %v1185_v56  ;;  %v1255_v60 = vld [vmem:[%s10352_s4 + $0x58] sm:$0xff]  ;;  %v1266_v61 = vld [vmem:[%s10353_s5 + $0x50] sm:$0xff] }
 0x166   :  { %v1334_v20 = vsel %vm1333_vm9, %v1320_v12, %v1332_v8  ;;  %v1418_v21 = vsel %vm1331_vm8, %v1312_v25, %v1417_v13  ;;  %v1662_v22 = vrot.slane %v1241_v9, %v8570_v53  ;;  %v1668_v23 = vsel %vm1331_vm8, %v1320_v12, %v1667_v14  ;;  %v1267_v62 = vld [vmem:[%s10353_s5 + $0x58] sm:$0xff]  ;;  %v4821_v9 = vld [vmem:[%s10352_s4 + $0xc0] sm:$0xff]  ;;  %v4835_v8 = vld [vmem:[%s10353_s5 + $0xc8] sm:$0xff] }
 0x167   :  { %6099 = vmatmul.mubr.msk.f32.vlgmr.msra.gmra.mrb[6].mxu0 %vm1335_vm10, %v1334_v20  ;;  %6153 = vmatmul.mubr.msk.f32.vlgmr.msra.gmra.mrb[6].mxu1 %vm1335_vm10, %v1334_v20  ;;  %v8656_v26 = vsel %vm1333_vm9, %v1316_v31, %v1418_v21  ;;  %v1844_v27 = vrot.slane %v1242_v10, %v8570_v53  ;;  %v1848_v28 = vsel %vm1327_vm6, %v1316_v31, %v1847_v15  ;;  %v1243_v29 = vmax.f32 %v1231_v19, 0.0  ;;  %v4822_v10 = vld [vmem:[%s10352_s4 + $0xc8] sm:$0xff]  ;;  %v4823_v15 = vld [vmem:[%s10352_s4 + $0xd0] sm:$0xff]  ;;  %v4824_v19 = vld [vmem:[%s10352_s4 + $0xd8] sm:$0xff] }
 0x168   :  { %7129 = vmatpush3.bf16.msra.mxu0 %v7128_v4  ;;  %7165 = vmatpush3.bf16.msra.mxu1 %v7164_v5  ;;  %v8670_v32 = vsel %vm1333_vm9, %v1662_v22, %v1668_v23  ;;  %v1849_v34 = vsel %vm1329_vm7, %v1320_v12, %v1848_v28  ;;  %v2027_v37 = vsel %vm1321_vm3, %v1308_v24, %v1304_v18  ;;  %v4836_v20 = vld [vmem:[%s10353_s5 + $0xd0] sm:$0xff]  ;;  %v4837_v21 = vld [vmem:[%s10353_s5 + $0xd8] sm:$0xff]  ;;  %v4826_v28 = vld [vmem:[%s10352_s4 + $0xe8] sm:$0xff] }
 0x169   :  { %7130 = vmatprep.subr.bf16.mxu0 %v7833_v3  ;;  %7166 = vmatprep.subr.bf16.mxu1 %v7833_v3  ;;  %v1850_v51 = vsel %vm1331_vm8, %v1662_v22, %v1849_v34  ;;  %v2028_v4 = vsel %vm1323_vm4, %v1312_v25, %v2027_v37  ;;  %v2026_v18 = vrot.slane %v1243_v29, %v8570_v53  ;;  %v4839_v29 = vld [vmem:[%s10353_s5 + $0xe8] sm:$0xff]  ;;  %v4827_v37 = vld [vmem:[%s10352_s4 + $0xf0] sm:$0xff] }
 0x16a   :  { %6125 = vmatprep.mubr.msk.f32.mxu0 %vm7834_vm0, %v7835_v11  ;;  %6179 = vmatprep.mubr.msk.f32.mxu1 %vm7834_vm0, %v7835_v11  ;;  %v8692_v5 = vsel %vm1333_vm9, %v1844_v27, %v1850_v51  ;;  %v2029_v24 = vsel %vm1325_vm5, %v1316_v31, %v2028_v4  ;;  %v7134_v25 = vpack.c.bf16 %v1249_v44, %v1248_v30  ;;  %v4828_v44 = vld [vmem:[%s10352_s4 + $0xf8] sm:$0xff] }
 0x16b   :  { %v2030_v38 = vsel %vm1327_vm6, %v1320_v12, %v2029_v24  ;;  %v7170_v40 = vpack.c.bf16 %v1261_v50, %v1260_v49  ;;  %v7173_v31 = vpack.c.bf16 %v1263_v0, %v1262_v63  ;;  %v7140_v56 = vpack.c.bf16 %v1253_v46, %v1252_v45  ;;  %v4834_v12 = vld [vmem:[%s10353_s5 + $0xc0] sm:$0xff]  ;;  %v4840_v49 = vld [vmem:[%s10353_s5 + $0xf0] sm:$0xff]  ;;  %v4841_v50 = vld [vmem:[%s10353_s5 + $0xf8] sm:$0xff] }
 0x16c   :  { %7132 = vmatpush3.bf16.msra.mxu0 %v7131_v16  ;;  %7168 = vmatpush3.bf16.msra.mxu1 %v7167_v17  ;;  %v2031_v42 = vsel %vm1329_vm7, %v1662_v22, %v2030_v38  ;;  %v7137_v17 = vpack.c.bf16 %v1251_v57, %v1250_v41  ;;  %v7176_v58 = vpack.c.bf16 %v1265_v54, %v1264_v48  ;;  %v4830_v24 = vld [vmem:[%s10352_s4 + $0x108] sm:$0xff]  ;;  %v4842_v38 = vld [vmem:[%s10353_s5 + $0x100] sm:$0xff]  ;;  %v4832_v57 = vld [vmem:[%s10352_s4 + $0x118] sm:$0xff] }
 0x16d   :  { %7133 = vmatprep.subr.bf16.mxu0 %v7833_v3  ;;  %7169 = vmatprep.subr.bf16.mxu1 %v7833_v3  ;;  %v2032_v1 = vsel %vm1331_vm8, %v1844_v27, %v2031_v42  ;;  %v7143_v6 = vpack.c.bf16 %v1255_v60, %v1254_v59  ;;  %v7179_v7 = vpack.c.bf16 %v1267_v62, %v1266_v61  ;;  %v4825_v27 = vld [vmem:[%s10352_s4 + $0xe0] sm:$0xff]  ;;  %v4831_v42 = vld [vmem:[%s10352_s4 + $0x110] sm:$0xff]  ;;  %v4845_v0 = vld [vmem:[%s10353_s5 + $0x118] sm:$0xff] }
 0x16e   :  { %v8720_v16 = vsel %vm1333_vm9, %v2026_v18, %v2032_v1  ;;  %v7182_v13 = vpack.c.bf16 %v4822_v10, %v4821_v9  ;;  %v7200_v14 = vpack.c.bf16 %v4835_v8, %v4834_v12  ;;  %v7185_v22 = vpack.c.bf16 %v4824_v19, %v4823_v15  ;;  %v4829_v18 = vld [vmem:[%s10352_s4 + $0x100] sm:$0xff]  ;;  %v4844_v63 = vld [vmem:[%s10353_s5 + $0x110] sm:$0xff]  ;;  %v4848_v45 = vld [vmem:[%s10352_s4 + $0x128] sm:$0xff] }
 0x16f   :  { %v7203_v23 = vpack.c.bf16 %v4837_v21, %v4836_v20  ;;  %v7188_v30 = vpack.c.bf16 %v4826_v28, %v4825_v27  ;;  %v7191_v51 = vpack.c.bf16 %v4828_v44, %v4827_v37  ;;  %v7209_v4 = vpack.c.bf16 %v4841_v50, %v4840_v49  ;;  %v4860_v46 = vld [vmem:[%s10353_s5 + $0x120] sm:$0xff]  ;;  %v4861_v48 = vld [vmem:[%s10353_s5 + $0x128] sm:$0xff]  ;;  %v4850_v59 = vld [vmem:[%s10352_s4 + $0x138] sm:$0xff] }
 0x170   :  { %7135 = vmatpush3.bf16.msra.mxu0 %v7134_v25  ;;  %7171 = vmatpush3.bf16.msra.mxu1 %v7170_v40  ;;  %v4843_v25 = vld [vmem:[%s10353_s5 + $0x108] sm:$0xff]  ;;  %v7194_v40 = vpack.c.bf16 %v4830_v24, %v4829_v18  ;;  %v7197_v1 = vpack.c.bf16 %v4832_v57, %v4831_v42  ;;  %v4862_v60 = vld [vmem:[%s10353_s5 + $0x130] sm:$0xff]  ;;  %v4863_v61 = vld [vmem:[%s10353_s5 + $0x138] sm:$0xff] }
 0x171   :  { %7136 = vmatprep.subr.bf16.mxu0 %v7833_v3  ;;  %7172 = vmatprep.subr.bf16.mxu1 %v7833_v3  ;;  %v7212_v41 = vpack.c.bf16 %v4843_v25, %v4842_v38  ;;  %v4852_v9 = vld [vmem:[%s10352_s4 + $0x148] sm:$0xff]  ;;  %v4866_v15 = vld [vmem:[%s10353_s5 + $0x150] sm:$0xff]  ;;  %v4867_v19 = vld [vmem:[%s10353_s5 + $0x158] sm:$0xff] }
 0x172   :  { %v4865_v10 = vld [vmem:[%s10353_s5 + $0x148] sm:$0xff]  ;;  %v7245_v21 = vpack.c.bf16 %v4867_v19, %v4866_v15  ;;  %v4868_v27 = vld [vmem:[%s10353_s5 + $0x160] sm:$0xff]  ;;  %v4870_v37 = vld [vmem:[%s10353_s5 + $0x170] sm:$0xff] }
 0x173   :  { %v4869_v28 = vld [vmem:[%s10353_s5 + $0x168] sm:$0xff]  ;;  %v4871_v44 = vld [vmem:[%s10353_s5 + $0x178] sm:$0xff]  ;;  %v4886_v18 = vld [vmem:[%s10353_s5 + $0x180] sm:$0xff] }
 0x174   :  { %7138 = vmatpush3.bf16.msra.mxu0 %v7137_v17  ;;  %7174 = vmatpush3.bf16.msra.mxu1 %v7173_v31  ;;  %v7215_v17 = vpack.c.bf16 %v4845_v0, %v4844_v63  ;;  %v4847_v31 = vld [vmem:[%s10352_s4 + $0x120] sm:$0xff]  ;;  %v7251_v50 = vpack.c.bf16 %v4871_v44, %v4870_v37  ;;  %v4887_v24 = vld [vmem:[%s10353_s5 + $0x188] sm:$0xff]  ;;  %v4888_v42 = vld [vmem:[%s10353_s5 + $0x190] sm:$0xff] }
 0x175   :  { %7139 = vmatprep.subr.bf16.mxu0 %v7833_v3  ;;  %7175 = vmatprep.subr.bf16.mxu1 %v7833_v3  ;;  %v7218_v54 = vpack.c.bf16 %v4848_v45, %v4847_v31  ;;  %v7272_v25 = vpack.c.bf16 %v4887_v24, %v4886_v18  ;;  %v4889_v57 = vld [vmem:[%s10353_s5 + $0x198] sm:$0xff]  ;;  %v4891_v31 = vld [vmem:[%s10353_s5 + $0x1a8] sm:$0xff]  ;;  %v4917_v24 = vld [vmem:[%s10349_s1 + $0x90] sm:$0xff] }
 0x176   :  { %v7275_v0 = vpack.c.bf16 %v4889_v57, %v4888_v42  ;;  %v4910_v19 = vld [vmem:[%s10349_s1 + $0x58] sm:$0xff]  ;;  %v4916_v18 = vld [vmem:[%s10349_s1 + $0x88] sm:$0xff]  ;;  %v4919_v57 = vld [vmem:[%s10349_s1 + $0xa0] sm:$0xff] }
 0x177   :  { %v4914_v44 = vld [vmem:[%s10349_s1 + $0x78] sm:$0xff] }
 0x178   :  { %7141 = vmatpush3.bf16.msra.mxu0 %v7140_v56  ;;  %7177 = vmatpush3.bf16.msra.mxu1 %v7176_v58  ;;  %v7236_v56 = vpack.c.bf16 %v4861_v48, %v4860_v46  ;;  %v4849_v58 = vld [vmem:[%s10352_s4 + $0x130] sm:$0xff]  ;;  %v4918_v42 = vld [vmem:[%s10349_s1 + $0x98] sm:$0xff] }
 0x179   :  { %7142 = vmatprep.subr.bf16.mxu0 %v7833_v3  ;;  %7178 = vmatprep.subr.bf16.mxu1 %v7833_v3  ;;  %v7221_v62 = vpack.c.bf16 %v4850_v59, %v4849_v58  ;;  %v4879_v48 = vld [vmem:[%s10352_s4 + $0x1b0] sm:$0xff]  ;;  %v4893_v58 = vld [vmem:[%s10353_s5 + $0x1b8] sm:$0xff] }
 0x17c   :  { %7144 = vmatpush3.bf16.msra.mxu0 %v7143_v6  ;;  %7180 = vmatpush3.bf16.msra.mxu1 %v7179_v7  ;;  %v7239_v6 = vpack.c.bf16 %v4863_v61, %v4862_v60  ;;  %v4851_v7 = vld [vmem:[%s10352_s4 + $0x140] sm:$0xff] }
 0x17d   :  { %7181 = vmatprep.subr.bf16.mxu0 %v7833_v3  ;;  %7199 = vmatprep.subr.bf16.mxu1 %v7833_v3  ;;  %v7224_v12 = vpack.c.bf16 %v4852_v9, %v4851_v7  ;;  %v4881_v61 = vld [vmem:[%s10352_s4 + $0x1c0] sm:$0xff]  ;;  %v4895_v7 = vld [vmem:[%s10353_s5 + $0x1c8] sm:$0xff] }
 0x17f   :  { %6126 = vmatmul.mubr.msk.f32.vlgmr.msra.gmra.mrb[6].mxu0 %vm1335_vm10, %v8656_v26  ;;  %6180 = vmatmul.mubr.msk.f32.vlgmr.msra.gmra.mrb[6].mxu1 %vm1335_vm10, %v8656_v26  ;;  %v4838_v26 = vld [vmem:[%s10353_s5 + $0xe0] sm:$0xff] }
 0x180   :  { %7183 = vmatpush3.bf16.msra.mxu0 %v7182_v13  ;;  %7201 = vmatpush3.bf16.msra.mxu1 %v7200_v14  ;;  %v7206_v34 = vpack.c.bf16 %v4839_v29, %v4838_v26  ;;  %v4853_v13 = vld [vmem:[%s10352_s4 + $0x150] sm:$0xff]  ;;  %v4854_v14 = vld [vmem:[%s10352_s4 + $0x158] sm:$0xff]  ;;  %v7248_v29 = vpack.c.bf16 %v4869_v28, %v4868_v27  ;;  %v4912_v28 = vld [vmem:[%s10349_s1 + $0x68] sm:$0xff] }
 0x181   :  { %7184 = vmatprep.subr.bf16.mxu0 %v7833_v3  ;;  %7202 = vmatprep.subr.bf16.mxu1 %v7833_v3  ;;  %v7227_v20 = vpack.c.bf16 %v4854_v14, %v4853_v13  ;;  %v4897_v13 = vld [vmem:[%s10353_s5 + $0x1d8] sm:$0xff] }
 0x182   :  { %6206 = vmatprep.mubr.msk.f32.mxu0 %vm7834_vm0, %v7835_v11  ;;  %6233 = vmatprep.mubr.msk.f32.mxu1 %vm7834_vm0, %v7835_v11 }
 0x184   :  { %7186 = vmatpush3.bf16.msra.mxu0 %v7185_v22  ;;  %7204 = vmatpush3.bf16.msra.mxu1 %v7203_v23  ;;  %v4855_v22 = vld [vmem:[%s10352_s4 + $0x160] sm:$0xff]  ;;  %v4856_v23 = vld [vmem:[%s10352_s4 + $0x168] sm:$0xff] }
 0x185   :  { %7187 = vmatprep.subr.bf16.mxu0 %v7833_v3  ;;  %7205 = vmatprep.subr.bf16.mxu1 %v7833_v3  ;;  %v7230_v26 = vpack.c.bf16 %v4856_v23, %v4855_v22  ;;  %v4930_v22 = vld [vmem:[%s10350_s2 + $0x60] sm:$0xff] }
 0x188   :  { %7189 = vmatpush3.bf16.msra.mxu0 %v7188_v30  ;;  %7207 = vmatpush3.bf16.msra.mxu1 %v7206_v34  ;;  %v4857_v30 = vld [vmem:[%s10352_s4 + $0x170] sm:$0xff]  ;;  %v4858_v34 = vld [vmem:[%s10352_s4 + $0x178] sm:$0xff] }
 0x189   :  { %7190 = vmatprep.subr.bf16.mxu0 %v7833_v3  ;;  %7208 = vmatprep.subr.bf16.mxu1 %v7833_v3  ;;  %v7233_v49 = vpack.c.bf16 %v4858_v34, %v4857_v30  ;;  %v4932_v30 = vld [vmem:[%s10350_s2 + $0x70] sm:$0xff] }
 0x18c   :  { %7192 = vmatpush3.bf16.msra.mxu0 %v7191_v51  ;;  %7210 = vmatpush3.bf16.msra.mxu1 %v7209_v4  ;;  %v4873_v51 = vld [vmem:[%s10352_s4 + $0x180] sm:$0xff]  ;;  %v4874_v4 = vld [vmem:[%s10352_s4 + $0x188] sm:$0xff] }
 0x18d   :  { %7193 = vmatprep.subr.bf16.mxu0 %v7833_v3  ;;  %7211 = vmatprep.subr.bf16.mxu1 %v7833_v3  ;;  %v7254_v38 = vpack.c.bf16 %v4874_v4, %v4873_v51 }
 0x190   :  { %7195 = vmatpush3.bf16.msra.mxu0 %v7194_v40  ;;  %7213 = vmatpush3.bf16.msra.mxu1 %v7212_v41  ;;  %v4875_v40 = vld [vmem:[%s10352_s4 + $0x190] sm:$0xff]  ;;  %v4876_v41 = vld [vmem:[%s10352_s4 + $0x198] sm:$0xff] }
 0x191   :  { %7196 = vmatprep.subr.bf16.mxu0 %v7833_v3  ;;  %7214 = vmatprep.subr.bf16.mxu1 %v7833_v3  ;;  %v7257_v63 = vpack.c.bf16 %v4876_v41, %v4875_v40  ;;  %v7299_v40 = vpack.c.bf16 %v4917_v24, %v4916_v18  ;;  %v2296_v18 = vld [vmem:[%s10350_s2 + $0x50] sm:$0xf]  ;;  %v4904_v24 = vld [vmem:[%s10348_s0 + $0x20] sm:$0xff] }
 0x194   :  { %7198 = vmatpush3.bf16.msra.mxu0 %v7197_v1  ;;  %7216 = vmatpush3.bf16.msra.mxu1 %v7215_v17  ;;  %v4877_v1 = vld [vmem:[%s10352_s4 + $0x1a0] sm:$0xff]  ;;  %v4878_v17 = vld [vmem:[%s10352_s4 + $0x1a8] sm:$0xff] }
 0x195   :  { %7217 = vmatprep.subr.bf16.mxu0 %v7833_v3  ;;  %7235 = vmatprep.subr.bf16.mxu1 %v7833_v3  ;;  %v7260_v45 = vpack.c.bf16 %v4878_v17, %v4877_v1  ;;  %v7302_v1 = vpack.c.bf16 %v4919_v57, %v4918_v42  ;;  %v4968_v42 = vld [vmem:[%s10350_s2 + $0xc0] sm:$0xff]  ;;  %v4969_v57 = vld [vmem:[%s10350_s2 + $0xc8] sm:$0xff] }
 0x197   :  { %6207 = vmatmul.mubr.msk.f32.vlgmr.msra.gmra.mrb[6].mxu0 %vm1335_vm10, %v8670_v32  ;;  %6234 = vmatmul.mubr.msk.f32.vlgmr.msra.gmra.mrb[6].mxu1 %vm1335_vm10, %v8670_v32  ;;  %v4864_v32 = vld [vmem:[%s10353_s5 + $0x140] sm:$0xff] }
 0x198   :  { %7219 = vmatpush3.bf16.msra.mxu0 %v7218_v54  ;;  %7237 = vmatpush3.bf16.msra.mxu1 %v7236_v56  ;;  %v7242_v8 = vpack.c.bf16 %v4865_v10, %v4864_v32  ;;  %v4880_v54 = vld [vmem:[%s10352_s4 + $0x1b8] sm:$0xff]  ;;  %v4892_v56 = vld [vmem:[%s10353_s5 + $0x1b0] sm:$0xff] }
 0x199   :  { %7220 = vmatprep.subr.bf16.mxu0 %v7833_v3  ;;  %7238 = vmatprep.subr.bf16.mxu1 %v7833_v3  ;;  %v7263_v59 = vpack.c.bf16 %v4880_v54, %v4879_v48  ;;  %v7281_v60 = vpack.c.bf16 %v4893_v58, %v4892_v56  ;;  %v4883_v10 = vld [vmem:[%s10352_s4 + $0x1d0] sm:$0xff]  ;;  %v4920_v48 = vld [vmem:[%s10349_s1 + $0xa8] sm:$0xf] }
 0x19a   :  { %6260 = vmatprep.mubr.msk.f32.mxu0 %vm7834_vm0, %v7835_v11  ;;  %6287 = vmatprep.mubr.msk.f32.mxu1 %vm7834_vm0, %v7835_v11  ;;  %v4939_v54 = vld [vmem:[%s10350_s2 + $0xa8] sm:$0xf] }
 0x19b   :  { %v4907_v56 = vld [vmem:[%s10348_s0 + $0x21] sm:$0xff] }
 0x19c   :  { %7222 = vmatpush3.bf16.msra.mxu0 %v7221_v62  ;;  %7240 = vmatpush3.bf16.msra.mxu1 %v7239_v6  ;;  %v4882_v62 = vld [vmem:[%s10352_s4 + $0x1c8] sm:$0xff]  ;;  %v4894_v6 = vld [vmem:[%s10353_s5 + $0x1c0] sm:$0xff] }
 0x19d   :  { %7223 = vmatprep.subr.bf16.mxu0 %v7833_v3  ;;  %7241 = vmatprep.subr.bf16.mxu1 %v7833_v3  ;;  %v7266_v9 = vpack.c.bf16 %v4882_v62, %v4881_v61  ;;  %v7284_v32 = vpack.c.bf16 %v4895_v7, %v4894_v6  ;;  %v2278_v61 = vld [vmem:[%s10349_s1 + $0x18] sm:$0xff]  ;;  %v2288_v62 = vld [vmem:[%s10350_s2 + $0x10] sm:$0xff] }
 0x19e   :  { %v2289_v6 = vld [vmem:[%s10350_s2 + $0x18] sm:$0xff] }
 0x1a0   :  { %7225 = vmatpush3.bf16.msra.mxu0 %v7224_v12  ;;  %7243 = vmatpush3.bf16.msra.mxu1 %v7242_v8  ;;  %v4884_v12 = vld [vmem:[%s10352_s4 + $0x1d8] sm:$0xff]  ;;  %v4896_v8 = vld [vmem:[%s10353_s5 + $0x1d0] sm:$0xff] }
 0x1a1   :  { %7226 = vmatprep.subr.bf16.mxu0 %v7833_v3  ;;  %7244 = vmatprep.subr.bf16.mxu1 %v7833_v3  ;;  %v7269_v14 = vpack.c.bf16 %v4884_v12, %v4883_v10  ;;  %v7287_v15 = vpack.c.bf16 %v4897_v13, %v4896_v8  ;;  %v4908_v10 = vld [vmem:[%s10348_s0 + $0x29] sm:$0xff]  ;;  %v2290_v8 = vld [vmem:[%s10350_s2 + $0x20] sm:$0xff] }
 0x1a2   :  { %v2280_v12 = vld [vmem:[%s10349_s1 + $0x28] sm:$0xff] }
 0x1a3   :  { %v2291_v13 = vld [vmem:[%s10350_s2 + $0x28] sm:$0xff] }
 0x1a4   :  { %7228 = vmatpush3.bf16.msra.mxu0 %v7227_v20  ;;  %7246 = vmatpush3.bf16.msra.mxu1 %v7245_v21  ;;  %v4911_v20 = vld [vmem:[%s10349_s1 + $0x60] sm:$0xff]  ;;  %v4929_v21 = vld [vmem:[%s10350_s2 + $0x58] sm:$0xff] }
 0x1a5   :  { %7229 = vmatprep.subr.bf16.mxu0 %v7833_v3  ;;  %7247 = vmatprep.subr.bf16.mxu1 %v7833_v3  ;;  %v7290_v23 = vpack.c.bf16 %v4911_v20, %v4910_v19  ;;  %v7320_v27 = vpack.c.bf16 %v4930_v22, %v4929_v21  ;;  %v2281_v19 = vld [vmem:[%s10349_s1 + $0x30] sm:$0xff]  ;;  %v2282_v21 = vld [vmem:[%s10349_s1 + $0x38] sm:$0xff] }
 0x1a6   :  { %v4909_v20 = vld [vmem:[%s10348_s0 + $0x31] sm:$0xff] }
 0x1a7   :  { %v2292_v22 = vld [vmem:[%s10350_s2 + $0x30] sm:$0xff] }
 0x1a8   :  { %7231 = vmatpush3.bf16.msra.mxu0 %v7230_v26  ;;  %7249 = vmatpush3.bf16.msra.mxu1 %v7248_v29  ;;  %v4913_v26 = vld [vmem:[%s10349_s1 + $0x70] sm:$0xff]  ;;  %v4931_v29 = vld [vmem:[%s10350_s2 + $0x68] sm:$0xff] }
 0x1a9   :  { %7232 = vmatprep.subr.bf16.mxu0 %v7833_v3  ;;  %7250 = vmatprep.subr.bf16.mxu1 %v7833_v3  ;;  %v7293_v34 = vpack.c.bf16 %v4913_v26, %v4912_v28  ;;  %v7323_v37 = vpack.c.bf16 %v4932_v30, %v4931_v29  ;;  %v2283_v26 = vld [vmem:[%s10349_s1 + $0x40] sm:$0xff]  ;;  %v2284_v29 = vld [vmem:[%s10349_s1 + $0x48] sm:$0xff] }
 0x1aa   :  { %v2294_v30 = vld [vmem:[%s10350_s2 + $0x40] sm:$0xff] }
 0x1ac   :  { %7234 = vmatpush3.bf16.msra.mxu0 %v7233_v49  ;;  %7252 = vmatpush3.bf16.msra.mxu1 %v7251_v50  ;;  %v4915_v49 = vld [vmem:[%s10349_s1 + $0x80] sm:$0xff] }
 0x1ad   :  { %7253 = vmatprep.subr.bf16.mxu0 %v7833_v3  ;;  %7271 = vmatprep.subr.bf16.mxu1 %v7833_v3  ;;  %v4934_v50 = vld [vmem:[%s10350_s2 + $0x80] sm:$0xff]  ;;  %v7296_v51 = vpack.c.bf16 %v4915_v49, %v4914_v44  ;;  %v4951_v49 = vld [vmem:[%s10349_s1 + $0xb0] sm:$0xff] }
 0x1af   :  { %6261 = vmatmul.mubr.msk.f32.vlgmr.msra.gmra.mrb[6].mxu0 %vm1335_vm10, %v8692_v5  ;;  %6288 = vmatmul.mubr.msk.f32.vlgmr.msra.gmra.mrb[6].mxu1 %vm1335_vm10, %v8692_v5  ;;  %v4890_v5 = vld [vmem:[%s10353_s5 + $0x1a0] sm:$0xff] }
 0x1b0   :  { %7255 = vmatpush3.bf16.msra.mxu0 %v7254_v38  ;;  %7273 = vmatpush3.bf16.msra.mxu1 %v7272_v25  ;;  %v7278_v46 = vpack.c.bf16 %v4891_v31, %v4890_v5  ;;  %v4935_v38 = vld [vmem:[%s10350_s2 + $0x88] sm:$0xff]  ;;  %v4936_v25 = vld [vmem:[%s10350_s2 + $0x90] sm:$0xff]  ;;  %v2275_v5 = vld [vmem:[%s10349_s1] sm:$0xff] }
 0x1b1   :  { %7256 = vmatprep.subr.bf16.mxu0 %v7833_v3  ;;  %7274 = vmatprep.subr.bf16.mxu1 %v7833_v3  ;;  %v7329_v41 = vpack.c.bf16 %v4936_v25, %v4935_v38  ;;  %v2276_v31 = vld [vmem:[%s10349_s1 + $0x8] sm:$0xff] }
 0x1b2   :  { %6314 = vmatprep.mubr.msk.f32.mxu0 %vm7834_vm0, %v7835_v11  ;;  %6341 = vmatprep.mubr.msk.f32.mxu1 %vm7834_vm0, %v7835_v11  ;;  %v7305_v58 = vpack.c.bf16 %v2276_v31, %v2275_v5  ;;  %v4956_v5 = vld [vmem:[%s10349_s1 + $0xd8] sm:$0xff]  ;;  %v4970_v31 = vld [vmem:[%s10350_s2 + $0xd0] sm:$0xff] }
 0x1b4   :  { %7258 = vmatpush3.bf16.msra.mxu0 %v7257_v63  ;;  %7276 = vmatpush3.bf16.msra.mxu1 %v7275_v0  ;;  %v4937_v63 = vld [vmem:[%s10350_s2 + $0x98] sm:$0xff]  ;;  %v4938_v0 = vld [vmem:[%s10350_s2 + $0xa0] sm:$0xff] }
 0x1b5   :  { %7259 = vmatprep.subr.bf16.mxu0 %v7833_v3  ;;  %7277 = vmatprep.subr.bf16.mxu1 %v7833_v3  ;;  %v7332_v17 = vpack.c.bf16 %v4938_v0, %v4937_v63  ;;  %v7368_v0 = vpack.c.bf16 %v4969_v57, %v4968_v42  ;;  %v4992_v57 = vld [vmem:[%s10349_s1 + $0x148] sm:$0xff] }
 0x1b8   :  { %7261 = vmatpush3.bf16.msra.mxu0 %v7260_v45  ;;  %7279 = vmatpush3.bf16.msra.mxu1 %v7278_v46  ;;  %v2286_v45 = vld [vmem:[%s10350_s2] sm:$0xff]  ;;  %v2287_v46 = vld [vmem:[%s10350_s2 + $0x8] sm:$0xff] }
 0x1b9   :  { %7262 = vmatprep.subr.bf16.mxu0 %v7833_v3  ;;  %7280 = vmatprep.subr.bf16.mxu1 %v7833_v3 }
 0x1bc   :  { %7264 = vmatpush3.bf16.msra.mxu0 %v7263_v59  ;;  %7282 = vmatpush3.bf16.msra.mxu1 %v7281_v60  ;;  %v7335_v59 = vpack.c.bf16 %v2287_v46, %v2286_v45  ;;  %v2277_v60 = vld [vmem:[%s10349_s1 + $0x10] sm:$0xff]  ;;  %v4971_v45 = vld [vmem:[%s10350_s2 + $0xd8] sm:$0xff] }
 0x1bd   :  { %7265 = vmatprep.subr.bf16.mxu0 %v7833_v3  ;;  %7283 = vmatprep.subr.bf16.mxu1 %v7833_v3  ;;  %v7308_v7 = vpack.c.bf16 %v2278_v61, %v2277_v60  ;;  %v4973_v60 = vld [vmem:[%s10350_s2 + $0xe8] sm:$0xff] }
 0x1c0   :  { %7267 = vmatpush3.bf16.msra.mxu0 %v7266_v9  ;;  %7285 = vmatpush3.bf16.msra.mxu1 %v7284_v32  ;;  %v7338_v9 = vpack.c.bf16 %v2289_v6, %v2288_v62  ;;  %v2279_v32 = vld [vmem:[%s10349_s1 + $0x20] sm:$0xff]  ;;  %v4959_v6 = vld [vmem:[%s10349_s1 + $0xf0] sm:$0xff] }
 0x1c1   :  { %7268 = vmatprep.subr.bf16.mxu0 %v7833_v3  ;;  %7286 = vmatprep.subr.bf16.mxu1 %v7833_v3 }
 0x1c4   :  { %7270 = vmatpush3.bf16.msra.mxu0 %v7269_v14  ;;  %7288 = vmatpush3.bf16.msra.mxu1 %v7287_v15  ;;  %v7311_v14 = vpack.c.bf16 %v2280_v12, %v2279_v32  ;;  %v7341_v15 = vpack.c.bf16 %v2291_v13, %v2290_v8  ;;  %v4975_v32 = vld [vmem:[%s10350_s2 + $0xf8] sm:$0xff]  ;;  %v4984_v8 = vld [vmem:[%s10349_s1 + $0x108] sm:$0xff]  ;;  %v4985_v13 = vld [vmem:[%s10349_s1 + $0x110] sm:$0xff] }
 0x1c5   :  { %7289 = vmatprep.subr.bf16.mxu0 %v7833_v3  ;;  %7319 = vmatprep.subr.bf16.mxu1 %v7833_v3 }
 0x1c7   :  { %6315 = vmatmul.mubr.msk.f32.vlgmr.msra.gmra.mrb[6].mxu0 %vm1335_vm10, %v8720_v16  ;;  %6342 = vmatmul.mubr.msk.f32.vlgmr.msra.gmra.mrb[6].mxu1 %vm1335_vm10, %v8720_v16  ;;  %v4933_v16 = vld [vmem:[%s10350_s2 + $0x78] sm:$0xff] }
 0x1c8   :  { %7291 = vmatpush3.bf16.msra.mxu0 %v7290_v23  ;;  %7321 = vmatpush3.bf16.msra.mxu1 %v7320_v27  ;;  %v7326_v4 = vpack.c.bf16 %v4934_v50, %v4933_v16  ;;  %v2293_v23 = vld [vmem:[%s10350_s2 + $0x38] sm:$0xff]  ;;  %v7314_v27 = vpack.c.bf16 %v2282_v21, %v2281_v19  ;;  %v4966_v50 = vld [vmem:[%s10350_s2 + $0xb0] sm:$0xff]  ;;  %v4961_v19 = vld [vmem:[%s10349_s1 + $0x100] sm:$0xf] }
 0x1c9   :  { %7292 = vmatprep.subr.bf16.mxu0 %v7833_v3  ;;  %7322 = vmatprep.subr.bf16.mxu1 %v7833_v3  ;;  %v7344_v28 = vpack.c.bf16 %v2293_v23, %v2292_v22  ;;  %v4952_v16 = vld [vmem:[%s10349_s1 + $0xb8] sm:$0xff]  ;;  %v4948_v21 = vld [vmem:[%s10348_s0 + $0x22] sm:$0xff]  ;;  %v7380_v22 = vpack.c.bf16 %v4985_v13, %v4984_v8 }
 0x1ca   :  { %6366 = vmatprep.mubr.msk.f32.mxu0 %vm7834_vm0, %v7835_v11  ;;  %6428 = vmatprep.mubr.msk.f32.mxu1 %vm7834_vm0, %v7835_v11  ;;  %v7350_v38 = vpack.c.bf16 %v4952_v16, %v4951_v49  ;;  %v4989_v49 = vld [vmem:[%s10349_s1 + $0x130] sm:$0xff]  ;;  %v5003_v16 = vld [vmem:[%s10350_s2 + $0x128] sm:$0xff]  ;;  %v5036_v13 = vld [vmem:[%s10350_s2 + $0x180] sm:$0xff] }
 0x1cb   :  { %v5022_v8 = vld [vmem:[%s10349_s1 + $0x188] sm:$0xff] }
 0x1cc   :  { %7294 = vmatpush3.bf16.msra.mxu0 %v7293_v34  ;;  %7324 = vmatpush3.bf16.msra.mxu1 %v7323_v37  ;;  %v2295_v34 = vld [vmem:[%s10350_s2 + $0x48] sm:$0xff]  ;;  %v7317_v37 = vpack.c.bf16 %v2284_v29, %v2283_v26  ;;  %v5001_v26 = vld [vmem:[%s10350_s2 + $0x118] sm:$0xff]  ;;  %v5002_v29 = vld [vmem:[%s10350_s2 + $0x120] sm:$0xff] }
 0x1cd   :  { %7295 = vmatprep.subr.bf16.mxu0 %v7833_v3  ;;  %7325 = vmatprep.subr.bf16.mxu1 %v7833_v3  ;;  %v7347_v44 = vpack.c.bf16 %v2295_v34, %v2294_v30  ;;  %v7398_v34 = vpack.c.bf16 %v5002_v29, %v5001_v26  ;;  %v5025_v29 = vld [vmem:[%s10349_s1 + $0x1a0] sm:$0xff] }
 0x1d0   :  { %7297 = vmatpush3.bf16.msra.mxu0 %v7296_v51  ;;  %7327 = vmatpush3.bf16.msra.mxu1 %v7326_v4  ;;  %v4967_v51 = vld [vmem:[%s10350_s2 + $0xb8] sm:$0xff]  ;;  %v2285_v4 = vld [vmem:[%s10349_s1 + $0x50] sm:$0xf] }
 0x1d1   :  { %7298 = vmatprep.subr.bf16.mxu0 %v7833_v3  ;;  %7328 = vmatprep.subr.bf16.mxu1 %v7833_v3  ;;  %v7365_v25 = vpack.c.bf16 %v4967_v51, %v4966_v50  ;;  %v5004_v50 = vld [vmem:[%s10350_s2 + $0x130] sm:$0xff] }
 0x1d4   :  { %7300 = vmatpush3.bf16.msra.mxu0 %v7299_v40  ;;  %7330 = vmatpush3.bf16.msra.mxu1 %v7329_v41  ;;  %v4953_v40 = vld [vmem:[%s10349_s1 + $0xc0] sm:$0xff]  ;;  %v4954_v41 = vld [vmem:[%s10349_s1 + $0xc8] sm:$0xff] }
 0x1d5   :  { %7301 = vmatprep.subr.bf16.mxu0 %v7833_v3  ;;  %7331 = vmatprep.subr.bf16.mxu1 %v7833_v3  ;;  %v7353_v63 = vpack.c.bf16 %v4954_v41, %v4953_v40  ;;  %v5006_v40 = vld [vmem:[%s10350_s2 + $0x140] sm:$0xff] }
 0x1d8   :  { %7303 = vmatpush3.bf16.msra.mxu0 %v7302_v1  ;;  %7333 = vmatpush3.bf16.msra.mxu1 %v7332_v17  ;;  %v4955_v1 = vld [vmem:[%s10349_s1 + $0xd0] sm:$0xff]  ;;  %v4905_v17 = vld [vmem:[%s10348_s0 + $0x28] sm:$0xff] }
 0x1d9   :  { %6364 = vmatprep.subr.mxu0 %v7835_v11  ;;  %6426 = vmatprep.subr.mxu1 %v7835_v11  ;;  %v7356_v46 = vpack.c.bf16 %v4956_v5, %v4955_v1  ;;  %v5008_v1 = vld [vmem:[%s10350_s2 + $0x150] sm:$0xff] }
 0x1dc   :  { %6365 = vmatpush3.msk.msra.mxu0 %vm91_vm1, %v4920_v48  ;;  %6427 = vmatpush3.msk.msra.mxu1 %vm91_vm1, %v4939_v54  ;;  %v7371_v48 = vpack.c.bf16 %v4971_v45, %v4970_v31  ;;  %v4957_v54 = vld [vmem:[%s10349_s1 + $0xe0] sm:$0xff]  ;;  %v5018_v45 = vld [vmem:[%s10349_s1 + $0x168] sm:$0xff] }
 0x1dd   :  { %7304 = vmatprep.subr.bf16.mxu0 %v7833_v3  ;;  %7334 = vmatprep.subr.bf16.mxu1 %v7833_v3  ;;  %v5017_v31 = vld [vmem:[%s10349_s1 + $0x160] sm:$0xff] }
 0x1de   :  { %6367 = vmatmul.mubr.msk.f32.vlgmr.msra.gmra.mrb[8].mxu0 %vm81_vm2, %v4907_v56  ;;  %6429 = vmatmul.mubr.msk.f32.vlgmr.msra.gmra.mrb[8].mxu1 %vm81_vm2, %v4907_v56  ;;  %v4906_v56 = vld [vmem:[%s10348_s0 + $0x30] sm:$0xff] }
 0x1df   :  { %7306 = vmatpush3.bf16.msra.mxu0 %v7305_v58  ;;  %7336 = vmatpush3.bf16.msra.mxu1 %v7335_v59  ;;  %v4958_v58 = vld [vmem:[%s10349_s1 + $0xe8] sm:$0xff]  ;;  %v4972_v59 = vld [vmem:[%s10350_s2 + $0xe0] sm:$0xff] }
 0x1e0   :  { %7307 = vmatprep.subr.bf16.mxu0 %v7833_v3  ;;  %7337 = vmatprep.subr.bf16.mxu1 %v7833_v3  ;;  %v7359_v61 = vpack.c.bf16 %v4958_v58, %v4957_v54  ;;  %v7374_v62 = vpack.c.bf16 %v4973_v60, %v4972_v59  ;;  %v4994_v54 = vld [vmem:[%s10349_s1 + $0x158] sm:$0xf]  ;;  %v4981_v58 = vld [vmem:[%s10348_s0 + $0x23] sm:$0xff]  ;;  %v7410_v59 = vpack.c.bf16 %v5018_v45, %v5017_v31  ;;  %v4903_v31 = vld [vmem:[%s10354_s6] ss:$0 sm:$0xff]  ;;  %s7837_s6 = smov 64  }
 0x1e1   :  { %6369 = vmatprep.mubr.msk.f32.mxu0 %vm7834_vm0, %v7835_v11  ;;  %6431 = vmatprep.mubr.msk.f32.mxu1 %vm7834_vm0, %v7835_v11  ;;  %v5063_v45 = vld [vmem:[%s10352_s4 + $0x80] sm:$0xff] }
 0x1e2   :  { %6370 = vmatmul.mubr.msk.f32.gmra.mrb[10].mxu0 %vm81_vm2, %v4908_v10  ;;  %6432 = vmatmul.mubr.msk.f32.gmra.mrb[10].mxu1 %vm81_vm2, %v4908_v10 }
 0x1e3   :  { %7309 = vmatpush3.bf16.msra.mxu0 %v7308_v7  ;;  %7339 = vmatpush3.bf16.msra.mxu1 %v7338_v9  ;;  %v4960_v7 = vld [vmem:[%s10349_s1 + $0xf8] sm:$0xff]  ;;  %v4974_v9 = vld [vmem:[%s10350_s2 + $0xf0] sm:$0xff] }
 0x1e4   :  { %7310 = vmatprep.subr.bf16.mxu0 %v7833_v3  ;;  %7340 = vmatprep.subr.bf16.mxu1 %v7833_v3  ;;  %v7362_v10 = vpack.c.bf16 %v4960_v7, %v4959_v6  ;;  %v7377_v12 = vpack.c.bf16 %v4975_v32, %v4974_v9  ;;  %v5034_v6 = vld [vmem:[%s10350_s2 + $0x170] sm:$0xff]  ;;  %v5035_v7 = vld [vmem:[%s10350_s2 + $0x178] sm:$0xff] }
 0x1e5   :  { %6372 = vmatprep.mubr.msk.f32.mxu0 %vm7834_vm0, %v7835_v11  ;;  %6434 = vmatprep.mubr.msk.f32.mxu1 %vm7834_vm0, %v7835_v11  ;;  %v7428_v32 = vpack.c.bf16 %v5035_v7, %v5034_v6 }
 0x1e6   :  { %6373 = vmatmul.mubr.msk.f32.gmra.mrb[12].mxu0 %vm81_vm2, %v4909_v20  ;;  %6435 = vmatmul.mubr.msk.f32.gmra.mrb[12].mxu1 %vm81_vm2, %v4909_v20  ;;  %v4976_v20 = vld [vmem:[%s10350_s2 + $0x100] sm:$0xf] }
 0x1e7   :  { %7312 = vmatpush3.bf16.msra.mxu0 %v7311_v14  ;;  %7342 = vmatpush3.bf16.msra.mxu1 %v7341_v15  ;;  %v4999_v14 = vld [vmem:[%s10350_s2 + $0x108] sm:$0xff]  ;;  %v5000_v15 = vld [vmem:[%s10350_s2 + $0x110] sm:$0xff] }
 0x1e8   :  { %7313 = vmatprep.subr.bf16.mxu0 %v7833_v3  ;;  %7343 = vmatprep.subr.bf16.mxu1 %v7833_v3  ;;  %v7395_v23 = vpack.c.bf16 %v5000_v15, %v4999_v14  ;;  %v5037_v14 = vld [vmem:[%s10350_s2 + $0x188] sm:$0xff] }
 0x1e9   :  { %6397 = vmatprep.mubr.msk.f32.mxu0 %vm7834_vm0, %v7835_v11  ;;  %6459 = vmatprep.mubr.msk.f32.mxu1 %vm7834_vm0, %v7835_v11 }
 0x1eb   :  { %7315 = vmatpush3.bf16.msra.mxu0 %v7314_v27  ;;  %7345 = vmatpush3.bf16.msra.mxu1 %v7344_v28  ;;  %v4986_v27 = vld [vmem:[%s10349_s1 + $0x118] sm:$0xff]  ;;  %v4987_v28 = vld [vmem:[%s10349_s1 + $0x120] sm:$0xff] }
 0x1ec   :  { %7316 = vmatprep.subr.bf16.mxu0 %v7833_v3  ;;  %7346 = vmatprep.subr.bf16.mxu1 %v7833_v3  ;;  %v7383_v30 = vpack.c.bf16 %v4987_v28, %v4986_v27  ;;  %v5039_v27 = vld [vmem:[%s10350_s2 + $0x198] sm:$0xff] }
 0x1ef   :  { %7318 = vmatpush3.bf16.msra.mxu0 %v7317_v37  ;;  %7348 = vmatpush3.bf16.msra.mxu1 %v7347_v44  ;;  %v4988_v37 = vld [vmem:[%s10349_s1 + $0x128] sm:$0xff] }
 0x1f0   :  { %6395 = vmatprep.subr.mxu0 %v7835_v11  ;;  %6457 = vmatprep.subr.mxu1 %v7835_v11  ;;  %v4949_v44 = vld [vmem:[%s10348_s0 + $0x2a] sm:$0xff]  ;;  %v7386_v51 = vpack.c.bf16 %v4989_v49, %v4988_v37 }
 0x1f1   :  { %v5041_v37 = vld [vmem:[%s10350_s2 + $0x1a8] sm:$0xff] }
 0x1f3   :  { %6396 = vmatpush3.msk.msra.mxu0 %vm91_vm1, %v2285_v4  ;;  %6458 = vmatpush3.msk.msra.mxu1 %vm91_vm1, %v2296_v18  ;;  %v7401_v4 = vpack.c.bf16 %v5004_v50, %v5003_v16  ;;  %v4990_v18 = vld [vmem:[%s10349_s1 + $0x138] sm:$0xff]  ;;  %v5027_v16 = vld [vmem:[%s10349_s1 + $0x1b0] sm:$0xf] }
 0x1f4   :  { %7349 = vmatprep.subr.bf16.mxu0 %v7833_v3  ;;  %7364 = vmatprep.subr.bf16.mxu1 %v7833_v3  ;;  %v5042_v50 = vld [vmem:[%s10350_s2 + $0x1b0] sm:$0xf] }
 0x1f5   :  { %6398 = vmatmul.mubr.msk.f32.vlgmr.msra.gmra.mrb[8].mxu0 %vm81_vm2, %v4904_v24  ;;  %6460 = vmatmul.mubr.msk.f32.vlgmr.msra.gmra.mrb[8].mxu1 %vm81_vm2, %v4904_v24  ;;  %v4950_v24 = vld [vmem:[%s10348_s0 + $0x32] sm:$0xff] }
 0x1f6   :  { %7351 = vmatpush3.bf16.msra.mxu0 %v7350_v38  ;;  %7366 = vmatpush3.bf16.msra.mxu1 %v7365_v25  ;;  %v4991_v38 = vld [vmem:[%s10349_s1 + $0x140] sm:$0xff]  ;;  %v5005_v25 = vld [vmem:[%s10350_s2 + $0x138] sm:$0xff] }
 0x1f7   :  { %7352 = vmatprep.subr.bf16.mxu0 %v7833_v3  ;;  %7367 = vmatprep.subr.bf16.mxu1 %v7833_v3  ;;  %v7389_v41 = vpack.c.bf16 %v4991_v38, %v4990_v18  ;;  %v7404_v42 = vpack.c.bf16 %v5006_v40, %v5005_v25  ;;  %v5016_v18 = vld [vmem:[%s10348_s0 + $0x34] sm:$0xff]  ;;  %v5060_v38 = vld [vmem:[%s10352_s4 + $0x68] sm:$0xff]  ;;  %v5073_v25 = vld [vmem:[%s10353_s5 + $0x60] sm:$0xff] }
 0x1f8   :  { %6400 = vmatprep.mubr.msk.f32.mxu0 %vm7834_vm0, %v7835_v11  ;;  %6462 = vmatprep.mubr.msk.f32.mxu1 %vm7834_vm0, %v7835_v11 }
 0x1f9   :  { %6401 = vmatmul.mubr.msk.f32.gmra.mrb[10].mxu0 %vm81_vm2, %v4905_v17  ;;  %6463 = vmatmul.mubr.msk.f32.gmra.mrb[10].mxu1 %vm81_vm2, %v4905_v17 }
 0x1fa   :  { %7354 = vmatpush3.bf16.msra.mxu0 %v7353_v63  ;;  %7369 = vmatpush3.bf16.msra.mxu1 %v7368_v0  ;;  %v4993_v63 = vld [vmem:[%s10349_s1 + $0x150] sm:$0xff]  ;;  %v5007_v0 = vld [vmem:[%s10350_s2 + $0x148] sm:$0xff] }
 0x1fb   :  { %7355 = vmatprep.subr.bf16.mxu0 %v7833_v3  ;;  %7370 = vmatprep.subr.bf16.mxu1 %v7833_v3  ;;  %v7392_v17 = vpack.c.bf16 %v4993_v63, %v4992_v57  ;;  %v7407_v5 = vpack.c.bf16 %v5008_v1, %v5007_v0  ;;  %v5061_v57 = vld [vmem:[%s10352_s4 + $0x70] sm:$0xff]  ;;  %v5062_v63 = vld [vmem:[%s10352_s4 + $0x78] sm:$0xff] }
 0x1fc   :  { %6403 = vmatprep.mubr.msk.f32.mxu0 %vm7834_vm0, %v7835_v11  ;;  %6465 = vmatprep.mubr.msk.f32.mxu1 %vm7834_vm0, %v7835_v11  ;;  %v5075_v0 = vld [vmem:[%s10353_s5 + $0x70] sm:$0xff]  ;;  %v7443_v1 = vpack.c.bf16 %v5062_v63, %v5061_v57  ;;  %v5084_v63 = vld [vmem:[%s10353_s5 + $0xb8] sm:$0xff] }
 0x1fd   :  { %6404 = vmatmul.mubr.msk.f32.gmra.mrb[12].mxu0 %vm81_vm2, %v4906_v56  ;;  %6466 = vmatmul.mubr.msk.f32.gmra.mrb[12].mxu1 %vm81_vm2, %v4906_v56  ;;  %v5009_v56 = vld [vmem:[%s10350_s2 + $0x158] sm:$0xf] }
 0x1fe   :  { %7357 = vmatpush3.bf16.msra.mxu0 %v7356_v46  ;;  %7372 = vmatpush3.bf16.msra.mxu1 %v7371_v48  ;;  %v5032_v46 = vld [vmem:[%s10350_s2 + $0x160] sm:$0xff]  ;;  %v5033_v48 = vld [vmem:[%s10350_s2 + $0x168] sm:$0xff] }
 0x1ff   :  { %7358 = vmatprep.subr.bf16.mxu0 %v7833_v3  ;;  %7373 = vmatprep.subr.bf16.mxu1 %v7833_v3  ;;  %v7425_v60 = vpack.c.bf16 %v5033_v48, %v5032_v46  ;;  %v5064_v46 = vld [vmem:[%s10352_s4 + $0x88] sm:$0xff]  ;;  %v5077_v48 = vld [vmem:[%s10353_s5 + $0x80] sm:$0xff] }
 0x200   :  { %6490 = vmatprep.mubr.msk.f32.mxu0 %vm7834_vm0, %v7835_v11  ;;  %6521 = vmatprep.mubr.msk.f32.mxu1 %vm7834_vm0, %v7835_v11 }
 0x202   :  { %7360 = vmatpush3.bf16.msra.mxu0 %v7359_v61  ;;  %7375 = vmatpush3.bf16.msra.mxu1 %v7374_v62  ;;  %v5019_v61 = vld [vmem:[%s10349_s1 + $0x170] sm:$0xff]  ;;  %v5020_v62 = vld [vmem:[%s10349_s1 + $0x178] sm:$0xff] }
 0x203   :  { %7361 = vmatprep.subr.bf16.mxu0 %v7833_v3  ;;  %7376 = vmatprep.subr.bf16.mxu1 %v7833_v3  ;;  %v7413_v9 = vpack.c.bf16 %v5020_v62, %v5019_v61 }
 0x206   :  { %7363 = vmatpush3.bf16.msra.mxu0 %v7362_v10  ;;  %7378 = vmatpush3.bf16.msra.mxu1 %v7377_v12  ;;  %v5021_v10 = vld [vmem:[%s10349_s1 + $0x180] sm:$0xff]  ;;  %v4982_v12 = vld [vmem:[%s10348_s0 + $0x2b] sm:$0xff] }
 0x207   :  { %6488 = vmatprep.subr.mxu0 %v7835_v11  ;;  %6519 = vmatprep.subr.mxu1 %v7835_v11  ;;  %v7416_v15 = vpack.c.bf16 %v5022_v8, %v5021_v10  ;;  %v5079_v10 = vld [vmem:[%s10353_s5 + $0x90] sm:$0xff] }
 0x20a   :  { %6489 = vmatpush3.msk.msra.mxu0 %vm91_vm1, %v4961_v19  ;;  %6520 = vmatpush3.msk.msra.mxu1 %vm91_vm1, %v4976_v20  ;;  %v7431_v19 = vpack.c.bf16 %v5037_v14, %v5036_v13  ;;  %v5023_v20 = vld [vmem:[%s10349_s1 + $0x190] sm:$0xff]  ;;  %v5080_v14 = vld [vmem:[%s10353_s5 + $0x98] sm:$0xff] }
 0x20b   :  { %7379 = vmatprep.subr.bf16.mxu0 %v7833_v3  ;;  %7394 = vmatprep.subr.bf16.mxu1 %v7833_v3 }
 0x20c   :  { %6491 = vmatmul.mubr.msk.f32.vlgmr.msra.gmra.mrb[8].mxu0 %vm81_vm2, %v4948_v21  ;;  %6522 = vmatmul.mubr.msk.f32.vlgmr.msra.gmra.mrb[8].mxu1 %vm81_vm2, %v4948_v21  ;;  %v4983_v21 = vld [vmem:[%s10348_s0 + $0x33] sm:$0xff] }
 0x20d   :  { %7381 = vmatpush3.bf16.msra.mxu0 %v7380_v22  ;;  %7396 = vmatpush3.bf16.msra.mxu1 %v7395_v23  ;;  %v5024_v22 = vld [vmem:[%s10349_s1 + $0x198] sm:$0xff]  ;;  %v5038_v23 = vld [vmem:[%s10350_s2 + $0x190] sm:$0xff] }
 0x20e   :  { %7382 = vmatprep.subr.bf16.mxu0 %v7833_v3  ;;  %7397 = vmatprep.subr.bf16.mxu1 %v7833_v3  ;;  %v7419_v28 = vpack.c.bf16 %v5024_v22, %v5023_v20  ;;  %v7434_v26 = vpack.c.bf16 %v5039_v27, %v5038_v23  ;;  %v5067_v27 = vld [vmem:[%s10352_s4 + $0xa0] sm:$0xff] }
 0x20f   :  { %6493 = vmatprep.mubr.msk.f32.mxu0 %vm7834_vm0, %v7835_v11  ;;  %6524 = vmatprep.mubr.msk.f32.mxu1 %vm7834_vm0, %v7835_v11 }
 0x210   :  { %6494 = vmatmul.mubr.msk.f32.gmra.mrb[10].mxu0 %vm81_vm2, %v4949_v44  ;;  %6525 = vmatmul.mubr.msk.f32.gmra.mrb[10].mxu1 %vm81_vm2, %v4949_v44 }
 0x211   :  { %7384 = vmatpush3.bf16.msra.mxu0 %v7383_v30  ;;  %7399 = vmatpush3.bf16.msra.mxu1 %v7398_v34  ;;  %v5026_v30 = vld [vmem:[%s10349_s1 + $0x1a8] sm:$0xff]  ;;  %v5040_v34 = vld [vmem:[%s10350_s2 + $0x1a0] sm:$0xff] }
 0x212   :  { %7385 = vmatprep.subr.bf16.mxu0 %v7833_v3  ;;  %7400 = vmatprep.subr.bf16.mxu1 %v7833_v3  ;;  %v7422_v44 = vpack.c.bf16 %v5026_v30, %v5025_v29  ;;  %v7437_v49 = vpack.c.bf16 %v5041_v37, %v5040_v34 }
 0x213   :  { %6496 = vmatprep.mubr.msk.f32.mxu0 %vm7834_vm0, %v7835_v11  ;;  %6527 = vmatprep.mubr.msk.f32.mxu1 %vm7834_vm0, %v7835_v11 }
 0x214   :  { %6497 = vmatmul.mubr.msk.f32.gmra.mrb[12].mxu0 %vm81_vm2, %v4950_v24  ;;  %6528 = vmatmul.mubr.msk.f32.gmra.mrb[12].mxu1 %vm81_vm2, %v4950_v24  ;;  %v5059_v24 = vld [vmem:[%s10352_s4 + $0x60] sm:$0xff] }
 0x215   :  { %7387 = vmatpush3.bf16.msra.mxu0 %v7386_v51  ;;  %7402 = vmatpush3.bf16.msra.mxu1 %v7401_v4  ;;  %v5014_v51 = vld [vmem:[%s10348_s0 + $0x24] sm:$0xff]  ;;  %v5015_v4 = vld [vmem:[%s10348_s0 + $0x2c] sm:$0xff]  ;;  %v7440_v40 = vpack.c.bf16 %v5060_v38, %v5059_v24 }
 0x216   :  { %7388 = vmatprep.subr.bf16.mxu0 %v7833_v3  ;;  %7403 = vmatprep.subr.bf16.mxu1 %v7833_v3  ;;  %v5069_v38 = vld [vmem:[%s10352_s4 + $0xb0] sm:$0xff] }
 0x217   :  { %6552 = vmatprep.mubr.msk.f32.mxu0 %vm7834_vm0, %v7835_v11  ;;  %6583 = vmatprep.mubr.msk.f32.mxu1 %vm7834_vm0, %v7835_v11 }
 0x219   :  { %7390 = vmatpush3.bf16.msra.mxu0 %v7389_v41  ;;  %7405 = vmatpush3.bf16.msra.mxu1 %v7404_v42  ;;  %v5074_v41 = vld [vmem:[%s10353_s5 + $0x68] sm:$0xff] }
 0x21a   :  { %7391 = vmatprep.subr.bf16.mxu0 %v7833_v3  ;;  %7406 = vmatprep.subr.bf16.mxu1 %v7833_v3  ;;  %v7476_v42 = vpack.c.bf16 %v5074_v41, %v5073_v25  ;;  %v5070_v25 = vld [vmem:[%s10352_s4 + $0xb8] sm:$0xff] }
 0x21d   :  { %7393 = vmatpush3.bf16.msra.mxu0 %v7392_v17  ;;  %7408 = vmatpush3.bf16.msra.mxu1 %v7407_v5  ;;  %v5076_v17 = vld [vmem:[%s10353_s5 + $0x78] sm:$0xff] }
 0x21e   :  { %6550 = vmatprep.subr.mxu0 %v7835_v11  ;;  %6581 = vmatprep.subr.mxu1 %v7835_v11  ;;  %v7479_v5 = vpack.c.bf16 %v5076_v17, %v5075_v0  ;;  %v7455_v0 = vpack.c.bf16 %v5070_v25, %v5069_v38 }
 0x221   :  { %6551 = vmatpush3.msk.msra.mxu0 %vm91_vm1, %v4994_v54  ;;  %6582 = vmatpush3.msk.msra.mxu1 %vm91_vm1, %v5009_v56  ;;  %v7446_v54 = vpack.c.bf16 %v5064_v46, %v5063_v45  ;;  %v5078_v56 = vld [vmem:[%s10353_s5 + $0x88] sm:$0xff] }
 0x222   :  { %7409 = vmatprep.subr.bf16.mxu0 %v7833_v3  ;;  %7424 = vmatprep.subr.bf16.mxu1 %v7833_v3  ;;  %v7482_v61 = vpack.c.bf16 %v5078_v56, %v5077_v48 }
 0x223   :  { %6553 = vmatmul.mubr.msk.f32.vlgmr.msra.gmra.mrb[8].mxu0 %vm81_vm2, %v4981_v58  ;;  %6584 = vmatmul.mubr.msk.f32.vlgmr.msra.gmra.mrb[8].mxu1 %vm81_vm2, %v4981_v58 }
 0x224   :  { %7411 = vmatpush3.bf16.msra.mxu0 %v7410_v59  ;;  %7426 = vmatpush3.bf16.msra.mxu1 %v7425_v60  ;;  %v9617_v60 = vrot.slane %v4903_v31, %v8527_v33 }
 0x225   :  { %7412 = vmatprep.subr.bf16.mxu0 %v7833_v3  ;;  %7427 = vmatprep.subr.bf16.mxu1 %v7833_v3 }
 0x226   :  { %6555 = vmatprep.mubr.msk.f32.mxu0 %vm7834_vm0, %v7835_v11  ;;  %6586 = vmatprep.mubr.msk.f32.mxu1 %vm7834_vm0, %v7835_v11  ;;  %v2243_v23 = vrot.slane %v9617_v60, 1 }
 0x227   :  { %6556 = vmatmul.mubr.msk.f32.gmra.mrb[10].mxu0 %vm81_vm2, %v4982_v12  ;;  %6587 = vmatmul.mubr.msk.f32.gmra.mrb[10].mxu1 %vm81_vm2, %v4982_v12 }
 0x228   :  { %7414 = vmatpush3.bf16.msra.mxu0 %v7413_v9  ;;  %7429 = vmatpush3.bf16.msra.mxu1 %v7428_v32  ;;  %v5065_v9 = vld [vmem:[%s10352_s4 + $0x90] sm:$0xff]  ;;  %v5066_v32 = vld [vmem:[%s10352_s4 + $0x98] sm:$0xff] }
 0x229   :  { %7415 = vmatprep.subr.bf16.mxu0 %v7833_v3  ;;  %7430 = vmatprep.subr.bf16.mxu1 %v7833_v3  ;;  %v7449_v13 = vpack.c.bf16 %v5066_v32, %v5065_v9  ;;  %v9695_v9 = vld [vmem:[%s10353_s5] sm:$0xff]  ;;  %v9700_v32 = vld [vmem:[%s10353_s5 + $0x8] sm:$0xff] }
 0x22a   :  { %6558 = vmatprep.mubr.msk.f32.mxu0 %vm7834_vm0, %v7835_v11  ;;  %6589 = vmatprep.mubr.msk.f32.mxu1 %vm7834_vm0, %v7835_v11 }
 0x22b   :  { %6559 = vmatmul.mubr.msk.f32.gmra.mrb[12].mxu0 %vm81_vm2, %v4983_v21  ;;  %6590 = vmatmul.mubr.msk.f32.gmra.mrb[12].mxu1 %vm81_vm2, %v4983_v21 }
 0x22c   :  { %7417 = vmatpush3.bf16.msra.mxu0 %v7416_v15  ;;  %7432 = vmatpush3.bf16.msra.mxu1 %v7431_v19  ;;  %v9636_v15 = vcombine.high %v9617_v60, %v9617_v60  ;;  %v7485_v19 = vpack.c.bf16 %v5080_v14, %v5079_v10 }
 0x22d   :  { %7418 = vmatprep.subr.bf16.mxu0 %v7833_v3  ;;  %7433 = vmatprep.subr.bf16.mxu1 %v7833_v3 }
 0x22e   :  { %6614 = vmatprep.mubr.msk.f32.mxu0 %vm7834_vm0, %v7835_v11  ;;  %6645 = vmatprep.mubr.msk.f32.mxu1 %vm7834_vm0, %v7835_v11 }
 0x230   :  { %7420 = vmatpush3.bf16.msra.mxu0 %v7419_v28  ;;  %7435 = vmatpush3.bf16.msra.mxu1 %v7434_v26  ;;  %v5068_v28 = vld [vmem:[%s10352_s4 + $0xa8] sm:$0xff]  ;;  %v5081_v26 = vld [vmem:[%s10353_s5 + $0xa0] sm:$0xff] }
 0x231   :  { %7421 = vmatprep.subr.bf16.mxu0 %v7833_v3  ;;  %7436 = vmatprep.subr.bf16.mxu1 %v7833_v3 }
 0x234   :  { %7423 = vmatpush3.bf16.msra.mxu0 %v7422_v44  ;;  %7438 = vmatpush3.bf16.msra.mxu1 %v7437_v49  ;;  %v5082_v44 = vld [vmem:[%s10353_s5 + $0xa8] sm:$0xff]  ;;  %v2244_v49 = vrot.slane %v9636_v15, 1 }
 0x235   :  { %6612 = vmatprep.subr.mxu0 %v7835_v11  ;;  %6643 = vmatprep.subr.mxu1 %v7835_v11 }
 0x238   :  { %6613 = vmatpush3.msk.msra.mxu0 %vm91_vm1, %v5027_v16  ;;  %6644 = vmatpush3.msk.msra.mxu1 %vm91_vm1, %v5042_v50  ;;  %v7452_v16 = vpack.c.bf16 %v5068_v28, %v5067_v27  ;;  %v7488_v50 = vpack.c.bf16 %v5082_v44, %v5081_v26  ;;  %v9711_v27 = vld [vmem:[%s10352_s4 + $0x18] sm:$0xff]  ;;  %v9716_v28 = vld [vmem:[%s10353_s5 + $0x10] sm:$0xff] }
 0x239   :  { %6615 = vmatmul.mubr.msk.f32.vlgmr.msra.gmra.mrb[8].mxu0 %vm81_vm2, %v5014_v51  ;;  %6646 = vmatmul.mubr.msk.f32.vlgmr.msra.gmra.mrb[8].mxu1 %vm81_vm2, %v5014_v51  ;;  %v9721_v26 = vld [vmem:[%s10353_s5 + $0x18] sm:$0xff] }
 0x23a   :  { %6617 = vmatprep.mubr.msk.f32.mxu0 %vm7834_vm0, %v7835_v11  ;;  %6648 = vmatprep.mubr.msk.f32.mxu1 %vm7834_vm0, %v7835_v11  ;;  %v7497_v38 = vpack.c.bf16 %v9721_v26, %v9716_v28  ;;  %v3450_v28 = vld [vmem:[%s10353_s5 + $0x38] sm:$0xff] }
 0x23b   :  { %7439 = vmatprep.subr.bf16.mxu0 %v7833_v3  ;;  %7475 = vmatprep.subr.bf16.mxu1 %v7833_v3 }
 0x23c   :  { %7441 = vmatpush3.bf16.msra.mxu0 %v7440_v40  ;;  %7477 = vmatpush3.bf16.msra.mxu1 %v7476_v42  ;;  %v5083_v40 = vld [vmem:[%s10353_s5 + $0xb0] sm:$0xff] }
 0x23d   :  { %6618 = vmatmul.mubr.msk.f32.gmra.mrb[10].mxu0 %vm81_vm2, %v5015_v4  ;;  %6649 = vmatmul.mubr.msk.f32.gmra.mrb[10].mxu1 %vm81_vm2, %v5015_v4 }
 0x23e   :  { %6620 = vmatprep.mubr.msk.f32.mxu0 %vm7834_vm0, %v7835_v11  ;;  %6651 = vmatprep.mubr.msk.f32.mxu1 %vm7834_vm0, %v7835_v11 }
 0x23f   :  { %7442 = vmatprep.subr.bf16.mxu0 %v7833_v3  ;;  %7478 = vmatprep.subr.bf16.mxu1 %v7833_v3 }
 0x240   :  { %7444 = vmatpush3.bf16.msra.mxu0 %v7443_v1  ;;  %7480 = vmatpush3.bf16.msra.mxu1 %v7479_v5  ;;  %v7491_v1 = vpack.c.bf16 %v5084_v63, %v5083_v40 }
 0x241   :  { %6621 = vmatmul.mubr.msk.f32.gmra.mrb[12].mxu0 %vm81_vm2, %v5016_v18  ;;  %6652 = vmatmul.mubr.msk.f32.gmra.mrb[12].mxu1 %vm81_vm2, %v5016_v18 }
 0x242   :  { %6678 = vmatprep.mubr.msk.f32.mxu0 %vm7834_vm0, %v7835_v11  ;;  %6732 = vmatprep.mubr.msk.f32.mxu1 %vm7834_vm0, %v7835_v11 }
 0x243   :  { %7445 = vmatprep.subr.bf16.mxu0 %v7833_v3  ;;  %7481 = vmatprep.subr.bf16.mxu1 %v7833_v3 }
 0x244   :  { %7447 = vmatpush3.bf16.msra.mxu0 %v7446_v54  ;;  %7483 = vmatpush3.bf16.msra.mxu1 %v7482_v61  ;;  %v9684_v61 = vld [vmem:[%s10352_s4] sm:$0xff] }
 0x245   :  { %7448 = vmatprep.subr.bf16.mxu0 %v7833_v3  ;;  %7484 = vmatprep.subr.bf16.mxu1 %v7833_v3 }
 0x248   :  { %7450 = vmatpush3.bf16.msra.mxu0 %v7449_v13  ;;  %7486 = vmatpush3.bf16.msra.mxu1 %v7485_v19 }
 0x249   :  { %7451 = vmatprep.subr.bf16.mxu0 %v7833_v3  ;;  %7487 = vmatprep.subr.bf16.mxu1 %v7833_v3 }
 0x24c   :  { %7453 = vmatpush3.bf16.msra.mxu0 %v7452_v16  ;;  %7489 = vmatpush3.bf16.msra.mxu1 %v7488_v50 }
 0x24d   :  { %7454 = vmatprep.subr.bf16.mxu0 %v7833_v3  ;;  %7490 = vmatprep.subr.bf16.mxu1 %v7833_v3 }
 0x250   :  { %7456 = vmatpush3.bf16.msra.mxu0 %v7455_v0  ;;  %7492 = vmatpush3.bf16.msra.mxu1 %v7491_v1 }
 0x251   :  { %7457 = vmatprep.subr.bf16.mxu0 %v7833_v3  ;;  %7493 = vmatprep.subr.bf16.mxu1 %v7833_v3 }
 0x29a   :  { %v2102_v58 = vpop.f32.mrb[6].mxu0  ;;  %v2186_v59 = vpop.f32.mrb[6].mxu1 }
 0x29b   :  { %v2191_v62 = vmax.f32 %v2102_v58, %v2186_v59  ;;  %v6316_v6 = vpop.f32.mrb[7].mxu0  ;;  %v6343_v7 = vpop.f32.mrb[7].mxu1 }
 0x29c   :  { %v9690_v7 = vld [vmem:[%s10352_s4 + $0x8] sm:$0xff] }
 0x29d   :  { %v2193_v12 = vcombine.high %v2191_v62, %v2191_v62  ;;  %v2200_v8 = vrot.slane %v2191_v62, %v8527_v33 }
 0x29f   :  { %v2207_v20 = vrot.slane %v2193_v12, %v8527_v33  ;;  %v4899_v21 = vrot.slane %v2200_v8, 9  ;;  %v2208_v22 = vcombine.high %v2200_v8, %v2200_v8 }
 0x2a1   :  { %v4901_v29 = vrot.slane %v2207_v20, 9  ;;  %v2226_v30 = vmax.f32 %v2200_v8, %v4899_v21  ;;  %v4900_v34 = vrot.slane %v2208_v22, 9  ;;  %v2209_v37 = vcombine.high %v2207_v20, %v2207_v20  ;;  %v9705_v8 = vld [vmem:[%s10352_s4 + $0x10] sm:$0xff] }
 0x2a3   :  { %v2227_v51 = vmax.f32 %v2208_v22, %v4900_v34  ;;  %v4902_v4 = vrot.slane %v2209_v37, 9  ;;  %v2249_v18 = vadd.f32 %v9617_v60, %v2226_v30  ;;  %v2228_v24 = vmax.f32 %v2207_v20, %v4901_v29 }
 0x2a4   :  { %v7458_v29 = vpack.c.bf16 %v9690_v7, %v9684_v61  ;;  %v7494_v30 = vpack.c.bf16 %v9700_v32, %v9695_v9  ;;  %v3436_v61 = vld [vmem:[%s10352_s4 + $0x28] sm:$0xff]  ;;  %v3447_v7 = vld [vmem:[%s10353_s5 + $0x20] sm:$0xff] }
 0x2a5   :  { %v2250_v41 = vadd.f32 %v2243_v23, %v2227_v51  ;;  %v2229_v42 = vmax.f32 %v2209_v37, %v4902_v4  ;;  %v2253_v57 = vmax.f32 %v2249_v18, 0.0  ;;  %v2251_v17 = vadd.f32 %v9636_v15, %v2228_v24  ;;  %v3448_v9 = vld [vmem:[%s10353_s5 + $0x28] sm:$0xff] }
 0x2a6   :  { %v7461_v24 = vpack.c.bf16 %v9711_v27, %v9705_v8  ;;  %v3438_v8 = vld [vmem:[%s10352_s4 + $0x38] sm:$0xff]  ;;  %v3449_v27 = vld [vmem:[%s10353_s5 + $0x30] sm:$0xff] }
 0x2a7   :  { %v2254_v5 = vmax.f32 %v2250_v41, 0.0  ;;  %v2252_v31 = vadd.f32 %v2244_v49, %v2229_v42  ;;  %2258 = vst.msk [vmem:[#allocation2] sm:$0x1] %vm2257_vm11, %v2253_v57  ;;  %v2255_v45 = vmax.f32 %v2251_v17, 0.0 }
 0x2a9   :  { %2260 = vrot.lane.b32.xlu0 %v2254_v5, %s7837_s6  ;;  %2265 = vst.msk [vmem:[#allocation2 + $0x2] sm:$0x1] %vm2257_vm11, %v2255_v45  ;;  %v2256_v46 = vmax.f32 %v2252_v31, 0.0 }
 0x2ad   :  { %2267 = vrot.lane.b32.xlu0 %v2256_v46, %s7837_s6 }
 0x30c   :  { %v3176_v48 = vpop.f32.mrb[8].mxu0  ;;  %v3273_v54 = vpop.f32.mrb[8].mxu1 }
 0x30d   :  { %v3290_v56 = vmax.f32 %v3176_v48, %v3273_v54  ;;  %v6616_v58 = vpop.f32.mrb[9].mxu0  ;;  %v6647_v59 = vpop.f32.mrb[9].mxu1 }
 0x30f   :  { %v3296_v62 = vcombine.high %v3290_v56, %v3290_v56  ;;  %v3303_v6 = vrot.slane %v3290_v56, %v8527_v33 }
 0x310   :  { %v3181_v10 = vpop.f32.mrb[10].mxu0  ;;  %v3278_v12 = vpop.f32.mrb[10].mxu1 }
 0x311   :  { %v3310_v13 = vrot.slane %v3296_v62, %v8527_v33  ;;  %v3311_v14 = vcombine.high %v3303_v6, %v3303_v6  ;;  %v5047_v19 = vrot.slane %v3303_v6, 9  ;;  %v3291_v20 = vmax.f32 %v3181_v10, %v3278_v12  ;;  %v6619_v21 = vpop.f32.mrb[11].mxu0  ;;  %v6650_v22 = vpop.f32.mrb[11].mxu1 }
 0x313   :  { %v3312_v34 = vcombine.high %v3310_v13, %v3310_v13  ;;  %v5048_v37 = vrot.slane %v3311_v14, 9  ;;  %v5049_v44 = vrot.slane %v3310_v13, 9  ;;  %v3395_v16 = vmax.f32 %v3303_v6, %v5047_v19 }
 0x314   :  { %v3313_v50 = vcombine.high %v3291_v20, %v3291_v20  ;;  %v3320_v51 = vrot.slane %v3291_v20, %v8527_v33  ;;  %v3186_v4 = vpop.f32.mrb[12].mxu0  ;;  %v3283_v18 = vpop.f32.mrb[12].mxu1 }
 0x315   :  { %v5050_v25 = vrot.slane %v3312_v34, 9  ;;  %v3396_v40 = vmax.f32 %v3311_v14, %v5048_v37  ;;  %v3397_v41 = vmax.f32 %v3310_v13, %v5049_v44  ;;  %v3407_v42 = vadd.f32 %v3395_v16, %v8530_v35  ;;  %v6622_v57 = vpop.f32.mrb[13].mxu0  ;;  %v6653_v63 = vpop.f32.mrb[13].mxu1 }
 0x316   :  { %v3327_v0 = vrot.slane %v3313_v50, %v8527_v33  ;;  %v3328_v1 = vcombine.high %v3320_v51, %v3320_v51  ;;  %v5051_v17 = vrot.slane %v3320_v51, 9  ;;  %v3292_v5 = vmax.f32 %v3186_v4, %v3283_v18 }
 0x317   :  { %v3398_v31 = vmax.f32 %v3312_v34, %v5050_v25  ;;  %v3408_v45 = vadd.f32 %v3396_v40, %v8550_v47  ;;  %v3409_v46 = vadd.f32 %v3397_v41, %v8537_v39  ;;  %v3419_v48 = vmax.f32 %v3407_v42, 0.0 }
 0x318   :  { %v3329_v54 = vcombine.high %v3327_v0, %v3327_v0  ;;  %v5052_v56 = vrot.slane %v3328_v1, 9  ;;  %v5053_v58 = vrot.slane %v3327_v0, 9  ;;  %v3399_v59 = vmax.f32 %v3320_v51, %v5051_v17 }
 0x319   :  { %v3410_v62 = vadd.f32 %v3398_v31, %v8568_v52  ;;  %v3420_v6 = vmax.f32 %v3408_v45, 0.0  ;;  %v3421_v10 = vmax.f32 %v3409_v46, 0.0  ;;  %v3590_v12 = vrot.slane %v3419_v48, %v8570_v53 }
 0x31a   :  { %v5054_v13 = vrot.slane %v3329_v54, 9  ;;  %v3400_v14 = vmax.f32 %v3328_v1, %v5052_v56  ;;  %v3401_v19 = vmax.f32 %v3327_v0, %v5053_v58  ;;  %v3411_v20 = vadd.f32 %v3399_v59, %v8533_v36 }
 0x31b   :  { %v3422_v21 = vmax.f32 %v3410_v62, 0.0  ;;  %v3478_v22 = vrot.slane %v3420_v6, %v8570_v53  ;;  %v3482_v34 = vrot.slane %v3421_v10, %v8570_v53  ;;  %v3330_v37 = vcombine.high %v3292_v5, %v3292_v5  ;;  %v2261_v44 = vpop.permute.xlu0 %2260 }
 0x31c   :  { %v3402_v16 = vmax.f32 %v3329_v54, %v5054_v13  ;;  %v3412_v50 = vadd.f32 %v3400_v14, %v1210_v55  ;;  %v3413_v51 = vadd.f32 %v3401_v19, %v8541_v43  ;;  %v3423_v4 = vmax.f32 %v3411_v20, 0.0  ;;  %2264 = vst.msk [vmem:[#allocation2] sm:$0x1] %vm2263_vm12, %v2261_v44 }
 0x31d   :  { %v3486_v18 = vrot.slane %v3422_v21, %v8570_v53  ;;  %v3507_v25 = vsel %vm1321_vm3, %v3482_v34, %v3478_v22  ;;  %v3591_v40 = vsel %vm1321_vm3, %v3478_v22, %v3590_v12  ;;  %v3337_v41 = vrot.slane %v3292_v5, %v8527_v33 }
 0x31e   :  { %v3414_v42 = vadd.f32 %v3402_v16, %v1211_v2  ;;  %v3424_v57 = vmax.f32 %v3412_v50, 0.0  ;;  %v3425_v63 = vmax.f32 %v3413_v51, 0.0  ;;  %v3490_v36 = vrot.slane %v3423_v4, %v8570_v53 }
 0x31f   :  { %v3839_v55 = vsel %vm1321_vm3, %v3486_v18, %v3482_v34  ;;  %v3344_v0 = vrot.slane %v3330_v37, %v8527_v33  ;;  %v3345_v1 = vcombine.high %v3337_v41, %v3337_v41  ;;  %v5055_v17 = vrot.slane %v3337_v41, 9  ;;  %v2268_v31 = vpop.permute.xlu0 %2267 }
 0x320   :  { %v3426_v45 = vmax.f32 %v3414_v42, 0.0  ;;  %v3494_v46 = vrot.slane %v3424_v57, %v8570_v53  ;;  %v3498_v48 = vrot.slane %v3425_v63, %v8570_v53  ;;  %2270 = vst.msk [vmem:[#allocation2 + $0x2] sm:$0x1] %vm2263_vm12, %v2268_v31  ;;  %v3508_v43 = vsel %vm1323_vm4, %v3486_v18, %v3507_v25 }
 0x321   :  { %v3346_v2 = vcombine.high %v3344_v0, %v3344_v0  ;;  %v5056_v5 = vrot.slane %v3345_v1, 9  ;;  %v5057_v54 = vrot.slane %v3344_v0, 9  ;;  %v3403_v56 = vmax.f32 %v3337_v41, %v5055_v17 }
 0x322   :  { %v3502_v58 = vrot.slane %v3426_v45, %v8570_v53  ;;  %v3509_v59 = vsel %vm1325_vm5, %v3490_v36, %v3508_v43  ;;  %v3592_v62 = vsel %vm1323_vm4, %v3482_v34, %v3591_v40  ;;  %v3840_v6 = vsel %vm1323_vm4, %v3490_v36, %v3839_v55  ;;  %v3435_v43 = vld [vmem:[%s10352_s4 + $0x20] sm:$0xff] }
 0x323   :  { %v5058_v10 = vrot.slane %v3346_v2, 9  ;;  %v3404_v12 = vmax.f32 %v3345_v1, %v5056_v5  ;;  %v3405_v13 = vmax.f32 %v3344_v0, %v5057_v54  ;;  %v3415_v14 = vadd.f32 %v3403_v56, %v8530_v35 }
 0x324   :  { %v3510_v19 = vsel %vm1327_vm6, %v3494_v46, %v3509_v59  ;;  %v3593_v20 = vsel %vm1325_vm5, %v3486_v18, %v3592_v62  ;;  %v3841_v21 = vsel %vm1325_vm5, %v3494_v46, %v3840_v6  ;;  %v4019_v22 = vsel %vm1321_vm3, %v3490_v36, %v3486_v18  ;;  %v3437_v62 = vld [vmem:[%s10352_s4 + $0x30] sm:$0xff]  ;;  %v3439_v6 = vld [vmem:[%s10352_s4 + $0x40] sm:$0xff] }
 0x325   :  { %v3406_v37 = vmax.f32 %v3346_v2, %v5058_v10  ;;  %v3416_v44 = vadd.f32 %v3404_v12, %v8550_v47  ;;  %v3417_v34 = vadd.f32 %v3405_v13, %v8537_v39  ;;  %v3427_v16 = vmax.f32 %v3415_v14, 0.0  ;;  %v3440_v10 = vld [vmem:[%s10352_s4 + $0x48] sm:$0xff]  ;;  %v3451_v12 = vld [vmem:[%s10353_s5 + $0x40] sm:$0xff] }
 0x326   :  { %v3511_v50 = vsel %vm1329_vm7, %v3498_v48, %v3510_v19  ;;  %v3594_v51 = vsel %vm1327_vm6, %v3490_v36, %v3593_v20  ;;  %v3842_v35 = vsel %vm1327_vm6, %v3498_v48, %v3841_v21  ;;  %v4020_v4 = vsel %vm1323_vm4, %v3494_v46, %v4019_v22  ;;  %v3452_v13 = vld [vmem:[%s10353_s5 + $0x48] sm:$0xff]  ;;  %v3441_v20 = vld [vmem:[%s10352_s4 + $0x50] sm:$0xff]  ;;  %v3442_v21 = vld [vmem:[%s10352_s4 + $0x58] sm:$0xff] }
 0x327   :  { %v3428_v25 = vmax.f32 %v3416_v44, 0.0  ;;  %v3429_v40 = vmax.f32 %v3417_v34, 0.0  ;;  %v3506_v41 = vrot.slane %v3427_v16, %v8570_v53  ;;  %v3512_v18 = vsel %vm1331_vm8, %v3502_v58, %v3511_v50  ;;  %v3453_v22 = vld [vmem:[%s10353_s5 + $0x50] sm:$0xff]  ;;  %v5087_v16 = vld [vmem:[%s10352_s4 + $0xc0] sm:$0xff]  ;;  %v5088_v50 = vld [vmem:[%s10352_s4 + $0xc8] sm:$0xff] }
 0x328   :  { %v3595_v42 = vsel %vm1329_vm7, %v3494_v46, %v3594_v51  ;;  %v3843_v47 = vsel %vm1329_vm7, %v3502_v58, %v3842_v35  ;;  %v4021_v39 = vsel %vm1325_vm5, %v3498_v48, %v4020_v4  ;;  %v3418_v57 = vadd.f32 %v3406_v37, %v8568_v52  ;;  %v3454_v37 = vld [vmem:[%s10353_s5 + $0x58] sm:$0xff]  ;;  %v5100_v51 = vld [vmem:[%s10353_s5 + $0xc0] sm:$0xff]  ;;  %v5101_v35 = vld [vmem:[%s10353_s5 + $0xc8] sm:$0xff] }
 0x329   :  { %v3513_v63 = vsel %vm1333_vm9, %v3506_v41, %v3512_v18  ;;  %v3596_v55 = vsel %vm1331_vm8, %v3498_v48, %v3595_v42  ;;  %v3838_v0 = vrot.slane %v3428_v25, %v8570_v53  ;;  %v3844_v1 = vsel %vm1331_vm8, %v3506_v41, %v3843_v47  ;;  %v5102_v18 = vld [vmem:[%s10353_s5 + $0xd0] sm:$0xff]  ;;  %v5103_v42 = vld [vmem:[%s10353_s5 + $0xd8] sm:$0xff] }
 0x32a   :  { %6679 = vmatmul.mubr.msk.f32.vlgmr.msra.gmra.mrb[14].mxu0 %vm1335_vm10, %v3513_v63  ;;  %6733 = vmatmul.mubr.msk.f32.vlgmr.msra.gmra.mrb[14].mxu1 %vm1335_vm10, %v3513_v63  ;;  %v9786_v17 = vsel %vm1333_vm9, %v3502_v58, %v3596_v55  ;;  %v4018_v31 = vrot.slane %v3429_v40, %v8570_v53  ;;  %v4022_v45 = vsel %vm1327_vm6, %v3502_v58, %v4021_v39  ;;  %v3430_v52 = vmax.f32 %v3418_v57, 0.0  ;;  %v5089_v40 = vld [vmem:[%s10352_s4 + $0xd0] sm:$0xff]  ;;  %v5091_v57 = vld [vmem:[%s10352_s4 + $0xe0] sm:$0xff]  ;;  %v5092_v63 = vld [vmem:[%s10352_s4 + $0xe8] sm:$0xff] }
 0x32b   :  { %7459 = vmatpush3.bf16.msra.mxu0 %v7458_v29  ;;  %7495 = vmatpush3.bf16.msra.mxu1 %v7494_v30  ;;  %v9800_v2 = vsel %vm1333_vm9, %v3838_v0, %v3844_v1  ;;  %v4023_v5 = vsel %vm1329_vm7, %v3506_v41, %v4022_v45  ;;  %v4199_v54 = vsel %vm1321_vm3, %v3494_v46, %v3490_v36  ;;  %v5104_v55 = vld [vmem:[%s10353_s5 + $0xe0] sm:$0xff]  ;;  %v5094_v45 = vld [vmem:[%s10352_s4 + $0xf8] sm:$0xff] }
 0x32c   :  { %7460 = vmatprep.subr.bf16.mxu0 %v7833_v3  ;;  %7496 = vmatprep.subr.bf16.mxu1 %v7833_v3  ;;  %v4024_v32 = vsel %vm1331_vm8, %v3838_v0, %v4023_v5  ;;  %v4200_v29 = vsel %vm1323_vm4, %v3498_v48, %v4199_v54  ;;  %v4198_v36 = vrot.slane %v3430_v52, %v8570_v53  ;;  %v5106_v52 = vld [vmem:[%s10353_s5 + $0xf0] sm:$0xff] }
 0x32d   :  { %6705 = vmatprep.mubr.msk.f32.mxu0 %vm7834_vm0, %v7835_v11  ;;  %6759 = vmatprep.mubr.msk.f32.mxu1 %vm7834_vm0, %v7835_v11  ;;  %v9822_v30 = vsel %vm1333_vm9, %v4018_v31, %v4024_v32  ;;  %v4201_v46 = vsel %vm1325_vm5, %v3502_v58, %v4200_v29  ;;  %v7464_v48 = vpack.c.bf16 %v3436_v61, %v3435_v43  ;;  %v5107_v43 = vld [vmem:[%s10353_s5 + $0xf8] sm:$0xff]  ;;  %v5095_v61 = vld [vmem:[%s10352_s4 + $0x100] sm:$0xff]  ;;  %v5109_v32 = vld [vmem:[%s10353_s5 + $0x108] sm:$0xff] }
 0x32e   :  { %v4202_v56 = vsel %vm1327_vm6, %v3506_v41, %v4201_v46  ;;  %v7500_v59 = vpack.c.bf16 %v3448_v9, %v3447_v7  ;;  %v7503_v58 = vpack.c.bf16 %v3450_v28, %v3449_v27  ;;  %v7470_v14 = vpack.c.bf16 %v3440_v10, %v3439_v6  ;;  %v5090_v41 = vld [vmem:[%s10352_s4 + $0xd8] sm:$0xff]  ;;  %v5096_v7 = vld [vmem:[%s10352_s4 + $0x108] sm:$0xff]  ;;  %v5108_v9 = vld [vmem:[%s10353_s5 + $0x100] sm:$0xff] }
 0x32f   :  { %7462 = vmatpush3.bf16.msra.mxu0 %v7461_v24  ;;  %7498 = vmatpush3.bf16.msra.mxu1 %v7497_v38  ;;  %v4203_v53 = vsel %vm1329_vm7, %v3838_v0, %v4202_v56  ;;  %v7467_v38 = vpack.c.bf16 %v3438_v8, %v3437_v62  ;;  %v7506_v19 = vpack.c.bf16 %v3452_v13, %v3451_v12  ;;  %v5105_v0 = vld [vmem:[%s10353_s5 + $0xe8] sm:$0xff]  ;;  %v5097_v46 = vld [vmem:[%s10352_s4 + $0x110] sm:$0xff]  ;;  %v5098_v56 = vld [vmem:[%s10352_s4 + $0x118] sm:$0xff] }
 0x330   :  { %7463 = vmatprep.subr.bf16.mxu0 %v7833_v3  ;;  %7499 = vmatprep.subr.bf16.mxu1 %v7833_v3  ;;  %v4204_v26 = vsel %vm1331_vm8, %v4018_v31, %v4203_v53  ;;  %v7473_v44 = vpack.c.bf16 %v3442_v21, %v3441_v20  ;;  %v7509_v34 = vpack.c.bf16 %v3454_v37, %v3453_v22  ;;  %v5093_v31 = vld [vmem:[%s10352_s4 + $0xf0] sm:$0xff]  ;;  %v5113_v8 = vld [vmem:[%s10352_s4 + $0x120] sm:$0xff]  ;;  %v5114_v27 = vld [vmem:[%s10352_s4 + $0x128] sm:$0xff] }
 0x331   :  { %v9850_v24 = vsel %vm1333_vm9, %v4198_v36, %v4204_v26  ;;  %v7512_v4 = vpack.c.bf16 %v5088_v50, %v5087_v16  ;;  %v7530_v25 = vpack.c.bf16 %v5101_v35, %v5100_v51  ;;  %v7515_v47 = vpack.c.bf16 %v5090_v41, %v5089_v40  ;;  %v5126_v28 = vld [vmem:[%s10353_s5 + $0x120] sm:$0xff]  ;;  %v5127_v26 = vld [vmem:[%s10353_s5 + $0x128] sm:$0xff]  ;;  %v5115_v6 = vld [vmem:[%s10352_s4 + $0x130] sm:$0xff] }
 0x332   :  { %v7533_v39 = vpack.c.bf16 %v5103_v42, %v5102_v18  ;;  %v7518_v1 = vpack.c.bf16 %v5092_v63, %v5091_v57  ;;  %v7521_v5 = vpack.c.bf16 %v5094_v45, %v5093_v31  ;;  %v7539_v54 = vpack.c.bf16 %v5107_v43, %v5106_v52  ;;  %v5116_v10 = vld [vmem:[%s10352_s4 + $0x138] sm:$0xff]  ;;  %v5128_v12 = vld [vmem:[%s10353_s5 + $0x130] sm:$0xff]  ;;  %v5117_v20 = vld [vmem:[%s10352_s4 + $0x140] sm:$0xff] }
 0x333   :  { %7465 = vmatpush3.bf16.msra.mxu0 %v7464_v48  ;;  %7501 = vmatpush3.bf16.msra.mxu1 %v7500_v59  ;;  %v7524_v29 = vpack.c.bf16 %v5096_v7, %v5095_v61  ;;  %v7542_v36 = vpack.c.bf16 %v5109_v32, %v5108_v9  ;;  %v5110_v48 = vld [vmem:[%s10353_s5 + $0x110] sm:$0xff]  ;;  %v5111_v59 = vld [vmem:[%s10353_s5 + $0x118] sm:$0xff]  ;;  %v7527_v62 = vpack.c.bf16 %v5098_v56, %v5097_v46  ;;  %v5118_v21 = vld [vmem:[%s10352_s4 + $0x148] sm:$0xff] }
 0x334   :  { %7466 = vmatprep.subr.bf16.mxu0 %v7833_v3  ;;  %7502 = vmatprep.subr.bf16.mxu1 %v7833_v3  ;;  %v7545_v53 = vpack.c.bf16 %v5111_v59, %v5110_v48  ;;  %v5129_v13 = vld [vmem:[%s10353_s5 + $0x138] sm:$0xff]  ;;  %v5131_v22 = vld [vmem:[%s10353_s5 + $0x148] sm:$0xff]  ;;  %v7554_v37 = vpack.c.bf16 %v5118_v21, %v5117_v20  ;;  %v5132_v50 = vld [vmem:[%s10353_s5 + $0x150] sm:$0xff] }
 0x335   :  { %v5120_v16 = vld [vmem:[%s10352_s4 + $0x158] sm:$0xff]  ;;  %v5122_v40 = vld [vmem:[%s10352_s4 + $0x168] sm:$0xff]  ;;  %v5134_v41 = vld [vmem:[%s10353_s5 + $0x160] sm:$0xff] }
 0x336   :  { %v5133_v51 = vld [vmem:[%s10353_s5 + $0x158] sm:$0xff]  ;;  %v5135_v18 = vld [vmem:[%s10353_s5 + $0x168] sm:$0xff]  ;;  %v5136_v63 = vld [vmem:[%s10353_s5 + $0x170] sm:$0xff] }
 0x337   :  { %7468 = vmatpush3.bf16.msra.mxu0 %v7467_v38  ;;  %7504 = vmatpush3.bf16.msra.mxu1 %v7503_v58  ;;  %v7548_v38 = vpack.c.bf16 %v5114_v27, %v5113_v8  ;;  %v7566_v58 = vpack.c.bf16 %v5127_v26, %v5126_v28  ;;  %v5124_v57 = vld [vmem:[%s10352_s4 + $0x178] sm:$0xff]  ;;  %v5140_v31 = vld [vmem:[%s10352_s4 + $0x188] sm:$0xff]  ;;  %v5152_v45 = vld [vmem:[%s10353_s5 + $0x180] sm:$0xff] }
 0x338   :  { %7469 = vmatprep.subr.bf16.mxu0 %v7833_v3  ;;  %7505 = vmatprep.subr.bf16.mxu1 %v7833_v3  ;;  %v5153_v52 = vld [vmem:[%s10353_s5 + $0x188] sm:$0xff]  ;;  %v5142_v61 = vld [vmem:[%s10352_s4 + $0x198] sm:$0xff]  ;;  %v5154_v7 = vld [vmem:[%s10353_s5 + $0x190] sm:$0xff] }
 0x339   :  { %v5155_v9 = vld [vmem:[%s10353_s5 + $0x198] sm:$0xff]  ;;  %v5144_v46 = vld [vmem:[%s10352_s4 + $0x1a8] sm:$0xff]  ;;  %v5158_v8 = vld [vmem:[%s10353_s5 + $0x1b0] sm:$0xff] }
 0x33a   :  { %v5157_v56 = vld [vmem:[%s10353_s5 + $0x1a8] sm:$0xff]  ;;  %v5159_v27 = vld [vmem:[%s10353_s5 + $0x1b8] sm:$0xff]  ;;  %v5162_v20 = vld [vmem:[%s10353_s5 + $0x1d0] sm:$0xff] }
 0x33b   :  { %7471 = vmatpush3.bf16.msra.mxu0 %v7470_v14  ;;  %7507 = vmatpush3.bf16.msra.mxu1 %v7506_v19  ;;  %v7551_v14 = vpack.c.bf16 %v5116_v10, %v5115_v6  ;;  %v7569_v19 = vpack.c.bf16 %v5129_v13, %v5128_v12  ;;  %v7611_v26 = vpack.c.bf16 %v5159_v27, %v5158_v8  ;;  %v5160_v6 = vld [vmem:[%s10353_s5 + $0x1c0] sm:$0xff]  ;;  %v5161_v10 = vld [vmem:[%s10353_s5 + $0x1c8] sm:$0xff]  ;;  %v5163_v21 = vld [vmem:[%s10353_s5 + $0x1d8] sm:$0xff] }
 0x33c   :  { %7472 = vmatprep.subr.bf16.mxu0 %v7833_v3  ;;  %7508 = vmatprep.subr.bf16.mxu1 %v7833_v3  ;;  %v7614_v13 = vpack.c.bf16 %v5161_v10, %v5160_v6  ;;  %v4432_v27 = vld [vmem:[%s10355_s7 + $0x50] sm:$0xff]  ;;  %v4451_v10 = vld [vmem:[%s10355_s7 + $0xe8] sm:$0xff] }
 0x33f   :  { %7474 = vmatpush3.bf16.msra.mxu0 %v7473_v44  ;;  %7510 = vmatpush3.bf16.msra.mxu1 %v7509_v34  ;;  %v5119_v34 = vld [vmem:[%s10352_s4 + $0x150] sm:$0xff] }
 0x340   :  { %7511 = vmatprep.subr.bf16.mxu0 %v7833_v3  ;;  %7529 = vmatprep.subr.bf16.mxu1 %v7833_v3  ;;  %v7557_v35 = vpack.c.bf16 %v5120_v16, %v5119_v34  ;;  %v4422_v34 = vld [vmem:[%s10355_s7] sm:$0xff] }
 0x342   :  { %6706 = vmatmul.mubr.msk.f32.vlgmr.msra.gmra.mrb[14].mxu0 %vm1335_vm10, %v9786_v17  ;;  %6760 = vmatmul.mubr.msk.f32.vlgmr.msra.gmra.mrb[14].mxu1 %vm1335_vm10, %v9786_v17  ;;  %v7536_v17 = vpack.c.bf16 %v5105_v0, %v5104_v55  ;;  %v5137_v55 = vld [vmem:[%s10353_s5 + $0x178] sm:$0xff] }
 0x343   :  { %7513 = vmatpush3.bf16.msra.mxu0 %v7512_v4  ;;  %7531 = vmatpush3.bf16.msra.mxu1 %v7530_v25  ;;  %v7575_v4 = vpack.c.bf16 %v5133_v51, %v5132_v50  ;;  %v5121_v25 = vld [vmem:[%s10352_s4 + $0x160] sm:$0xff]  ;;  %v4441_v50 = vld [vmem:[%s10355_s7 + $0x98] sm:$0xff] }
 0x344   :  { %7514 = vmatprep.subr.bf16.mxu0 %v7833_v3  ;;  %7532 = vmatprep.subr.bf16.mxu1 %v7833_v3  ;;  %v7560_v42 = vpack.c.bf16 %v5122_v40, %v5121_v25  ;;  %v4425_v25 = vld [vmem:[%s10355_s7 + $0x18] sm:$0xff]  ;;  %v4442_v40 = vld [vmem:[%s10355_s7 + $0xa0] sm:$0xff] }
 0x345   :  { %6786 = vmatprep.mubr.msk.f32.mxu0 %vm7834_vm0, %v7835_v11  ;;  %6813 = vmatprep.mubr.msk.f32.mxu1 %vm7834_vm0, %v7835_v11 }
 0x347   :  { %7516 = vmatpush3.bf16.msra.mxu0 %v7515_v47  ;;  %7534 = vmatpush3.bf16.msra.mxu1 %v7533_v39  ;;  %v7578_v47 = vpack.c.bf16 %v5135_v18, %v5134_v41  ;;  %v5123_v39 = vld [vmem:[%s10352_s4 + $0x170] sm:$0xff]  ;;  %v4443_v41 = vld [vmem:[%s10355_s7 + $0xa8] sm:$0xff] }
 0x348   :  { %7517 = vmatprep.subr.bf16.mxu0 %v7833_v3  ;;  %7535 = vmatprep.subr.bf16.mxu1 %v7833_v3  ;;  %v7563_v0 = vpack.c.bf16 %v5124_v57, %v5123_v39  ;;  %v4427_v39 = vld [vmem:[%s10355_s7 + $0x28] sm:$0xff]  ;;  %v4444_v57 = vld [vmem:[%s10355_s7 + $0xb0] sm:$0xff] }
 0x34b   :  { %7519 = vmatpush3.bf16.msra.mxu0 %v7518_v1  ;;  %7537 = vmatpush3.bf16.msra.mxu1 %v7536_v17  ;;  %v7581_v1 = vpack.c.bf16 %v5137_v55, %v5136_v63  ;;  %v5139_v17 = vld [vmem:[%s10352_s4 + $0x180] sm:$0xff]  ;;  %v4445_v63 = vld [vmem:[%s10355_s7 + $0xb8] sm:$0xff] }
 0x34c   :  { %7520 = vmatprep.subr.bf16.mxu0 %v7833_v3  ;;  %7538 = vmatprep.subr.bf16.mxu1 %v7833_v3  ;;  %v7584_v43 = vpack.c.bf16 %v5140_v31, %v5139_v17  ;;  %v4429_v17 = vld [vmem:[%s10355_s7 + $0x38] sm:$0xff]  ;;  %v4446_v31 = vld [vmem:[%s10355_s7 + $0xc0] sm:$0xff] }
 0x34f   :  { %7522 = vmatpush3.bf16.msra.mxu0 %v7521_v5  ;;  %7540 = vmatpush3.bf16.msra.mxu1 %v7539_v54  ;;  %v7602_v5 = vpack.c.bf16 %v5153_v52, %v5152_v45  ;;  %v5141_v54 = vld [vmem:[%s10352_s4 + $0x190] sm:$0xff]  ;;  %v4447_v45 = vld [vmem:[%s10355_s7 + $0xc8] sm:$0xff] }
 0x350   :  { %7523 = vmatprep.subr.bf16.mxu0 %v7833_v3  ;;  %7541 = vmatprep.subr.bf16.mxu1 %v7833_v3  ;;  %v7587_v32 = vpack.c.bf16 %v5142_v61, %v5141_v54 }
 0x353   :  { %7525 = vmatpush3.bf16.msra.mxu0 %v7524_v29  ;;  %7543 = vmatpush3.bf16.msra.mxu1 %v7542_v36  ;;  %v7605_v29 = vpack.c.bf16 %v5155_v9, %v5154_v7  ;;  %v5143_v36 = vld [vmem:[%s10352_s4 + $0x1a0] sm:$0xff] }
 0x354   :  { %7526 = vmatprep.subr.bf16.mxu0 %v7833_v3  ;;  %7544 = vmatprep.subr.bf16.mxu1 %v7833_v3  ;;  %v7590_v48 = vpack.c.bf16 %v5144_v46, %v5143_v36  ;;  %v4448_v36 = vld [vmem:[%s10355_s7 + $0xd0] sm:$0xff] }
 0x357   :  { %7528 = vmatpush3.bf16.msra.mxu0 %v7527_v62  ;;  %7546 = vmatpush3.bf16.msra.mxu1 %v7545_v53  ;;  %v5145_v62 = vld [vmem:[%s10352_s4 + $0x1b0] sm:$0xff]  ;;  %v5146_v53 = vld [vmem:[%s10352_s4 + $0x1b8] sm:$0xff] }
 0x358   :  { %7547 = vmatprep.subr.bf16.mxu0 %v7833_v3  ;;  %7565 = vmatprep.subr.bf16.mxu1 %v7833_v3  ;;  %v7593_v28 = vpack.c.bf16 %v5146_v53, %v5145_v62 }
 0x35a   :  { %6787 = vmatmul.mubr.msk.f32.vlgmr.msra.gmra.mrb[14].mxu0 %vm1335_vm10, %v9800_v2  ;;  %6814 = vmatmul.mubr.msk.f32.vlgmr.msra.gmra.mrb[14].mxu1 %vm1335_vm10, %v9800_v2  ;;  %v5130_v2 = vld [vmem:[%s10353_s5 + $0x140] sm:$0xff] }
 0x35b   :  { %7549 = vmatpush3.bf16.msra.mxu0 %v7548_v38  ;;  %7567 = vmatpush3.bf16.msra.mxu1 %v7566_v58  ;;  %v7572_v44 = vpack.c.bf16 %v5131_v22, %v5130_v2  ;;  %v5147_v38 = vld [vmem:[%s10352_s4 + $0x1c0] sm:$0xff]  ;;  %v5148_v58 = vld [vmem:[%s10352_s4 + $0x1c8] sm:$0xff]  ;;  %v7617_v22 = vpack.c.bf16 %v5163_v21, %v5162_v20  ;;  %v4452_v20 = vld [vmem:[%s10355_s7 + $0xf0] sm:$0xff] }
 0x35c   :  { %7550 = vmatprep.subr.bf16.mxu0 %v7833_v3  ;;  %7568 = vmatprep.subr.bf16.mxu1 %v7833_v3  ;;  %v7596_v12 = vpack.c.bf16 %v5148_v58, %v5147_v38  ;;  %v4453_v21 = vld [vmem:[%s10355_s7 + $0xf8] sm:$0xff] }
 0x35d   :  { %6840 = vmatprep.mubr.msk.f32.mxu0 %vm7834_vm0, %v7835_v11  ;;  %6867 = vmatprep.mubr.msk.f32.mxu1 %vm7834_vm0, %v7835_v11 }
 0x35f   :  { %7552 = vmatpush3.bf16.msra.mxu0 %v7551_v14  ;;  %7570 = vmatpush3.bf16.msra.mxu1 %v7569_v19  ;;  %v5149_v14 = vld [vmem:[%s10352_s4 + $0x1d0] sm:$0xff]  ;;  %v5150_v19 = vld [vmem:[%s10352_s4 + $0x1d8] sm:$0xff] }
 0x360   :  { %7553 = vmatprep.subr.bf16.mxu0 %v7833_v3  ;;  %7571 = vmatprep.subr.bf16.mxu1 %v7833_v3  ;;  %v7599_v2 = vpack.c.bf16 %v5150_v19, %v5149_v14 }
 0x363   :  { %7555 = vmatpush3.bf16.msra.mxu0 %v7554_v37  ;;  %7573 = vmatpush3.bf16.msra.mxu1 %v7572_v44  ;;  %v4438_v37 = vld [vmem:[%s10355_s7 + $0x80] sm:$0xff]  ;;  %v4439_v44 = vld [vmem:[%s10355_s7 + $0x88] sm:$0xff] }
 0x364   :  { %7556 = vmatprep.subr.bf16.mxu0 %v7833_v3  ;;  %7574 = vmatprep.subr.bf16.mxu1 %v7833_v3  ;;  %v7619_v16 = vpack.c.bf16 %v4439_v44, %v4438_v37 }
 0x367   :  { %7558 = vmatpush3.bf16.msra.mxu0 %v7557_v35  ;;  %7576 = vmatpush3.bf16.msra.mxu1 %v7575_v4  ;;  %v4424_v4 = vld [vmem:[%s10355_s7 + $0x10] sm:$0xff] }
 0x368   :  { %7559 = vmatprep.subr.bf16.mxu0 %v7833_v3  ;;  %7577 = vmatprep.subr.bf16.mxu1 %v7833_v3  ;;  %v7625_v18 = vpack.c.bf16 %v4425_v25, %v4424_v4  ;;  %v4437_v4 = vld [vmem:[%s10355_s7 + $0x78] sm:$0xff] }
 0x36b   :  { %7561 = vmatpush3.bf16.msra.mxu0 %v7560_v42  ;;  %7579 = vmatpush3.bf16.msra.mxu1 %v7578_v47  ;;  %v7627_v42 = vpack.c.bf16 %v4443_v41, %v4442_v40  ;;  %v4426_v47 = vld [vmem:[%s10355_s7 + $0x20] sm:$0xff] }
 0x36c   :  { %7562 = vmatprep.subr.bf16.mxu0 %v7833_v3  ;;  %7580 = vmatprep.subr.bf16.mxu1 %v7833_v3  ;;  %v7629_v55 = vpack.c.bf16 %v4427_v39, %v4426_v47  ;;  %v4546_v47 = vld [vmem:[%s10357_s9 + $0x18] sm:$0xff] }
 0x36f   :  { %7564 = vmatpush3.bf16.msra.mxu0 %v7563_v0  ;;  %7582 = vmatpush3.bf16.msra.mxu1 %v7581_v1  ;;  %v7631_v0 = vpack.c.bf16 %v4445_v63, %v4444_v57  ;;  %v4428_v1 = vld [vmem:[%s10355_s7 + $0x30] sm:$0xff]  ;;  %v4547_v57 = vld [vmem:[%s10357_s9 + $0x20] sm:$0xff]  ;;  %v4548_v63 = vld [vmem:[%s10357_s9 + $0x28] sm:$0xff] }
 0x370   :  { %7583 = vmatprep.subr.bf16.mxu0 %v7833_v3  ;;  %7601 = vmatprep.subr.bf16.mxu1 %v7833_v3  ;;  %v7633_v52 = vpack.c.bf16 %v4429_v17, %v4428_v1  ;;  %v4550_v1 = vld [vmem:[%s10357_s9 + $0x38] sm:$0xff] }
 0x372   :  { %6841 = vmatmul.mubr.msk.f32.vlgmr.msra.gmra.mrb[14].mxu0 %vm1335_vm10, %v9822_v30  ;;  %6868 = vmatmul.mubr.msk.f32.vlgmr.msra.gmra.mrb[14].mxu1 %vm1335_vm10, %v9822_v30  ;;  %v5156_v30 = vld [vmem:[%s10353_s5 + $0x1a0] sm:$0xff] }
 0x373   :  { %7585 = vmatpush3.bf16.msra.mxu0 %v7584_v43  ;;  %7603 = vmatpush3.bf16.msra.mxu1 %v7602_v5  ;;  %v7608_v59 = vpack.c.bf16 %v5157_v56, %v5156_v30  ;;  %v7635_v43 = vpack.c.bf16 %v4447_v45, %v4446_v31  ;;  %v4551_v31 = vld [vmem:[%s10357_s9 + $0x40] sm:$0xff]  ;;  %v4552_v45 = vld [vmem:[%s10357_s9 + $0x48] sm:$0xff] }
 0x374   :  { %7586 = vmatprep.subr.bf16.mxu0 %v7833_v3  ;;  %7604 = vmatprep.subr.bf16.mxu1 %v7833_v3 }
 0x375   :  { %6894 = vmatprep.mubr.msk.f32.mxu0 %vm7834_vm0, %v7835_v11  ;;  %6921 = vmatprep.mubr.msk.f32.mxu1 %vm7834_vm0, %v7835_v11 }
 0x377   :  { %7588 = vmatpush3.bf16.msra.mxu0 %v7587_v32  ;;  %7606 = vmatpush3.bf16.msra.mxu1 %v7605_v29  ;;  %v4430_v32 = vld [vmem:[%s10355_s7 + $0x40] sm:$0xff]  ;;  %v4431_v29 = vld [vmem:[%s10355_s7 + $0x48] sm:$0xff] }
 0x378   :  { %7589 = vmatprep.subr.bf16.mxu0 %v7833_v3  ;;  %7607 = vmatprep.subr.bf16.mxu1 %v7833_v3  ;;  %v7637_v56 = vpack.c.bf16 %v4431_v29, %v4430_v32  ;;  %v4555_v29 = vld [vmem:[%s10357_s9 + $0x60] sm:$0xff] }
 0x37b   :  { %7591 = vmatpush3.bf16.msra.mxu0 %v7590_v48  ;;  %7609 = vmatpush3.bf16.msra.mxu1 %v7608_v59  ;;  %v4449_v48 = vld [vmem:[%s10355_s7 + $0xd8] sm:$0xff] }
 0x37c   :  { %7592 = vmatprep.subr.bf16.mxu0 %v7833_v3  ;;  %7610 = vmatprep.subr.bf16.mxu1 %v7833_v3  ;;  %v7639_v59 = vpack.c.bf16 %v4449_v48, %v4448_v36  ;;  %v4556_v36 = vld [vmem:[%s10357_s9 + $0x68] sm:$0xff] }
 0x37f   :  { %7594 = vmatpush3.bf16.msra.mxu0 %v7593_v28  ;;  %7612 = vmatpush3.bf16.msra.mxu1 %v7611_v26  ;;  %v4433_v28 = vld [vmem:[%s10355_s7 + $0x58] sm:$0xff]  ;;  %v4450_v26 = vld [vmem:[%s10355_s7 + $0xe0] sm:$0xff] }
 0x380   :  { %7595 = vmatprep.subr.bf16.mxu0 %v7833_v3  ;;  %7613 = vmatprep.subr.bf16.mxu1 %v7833_v3  ;;  %v7641_v14 = vpack.c.bf16 %v4433_v28, %v4432_v27  ;;  %v7643_v19 = vpack.c.bf16 %v4451_v10, %v4450_v26 }
 0x383   :  { %7597 = vmatpush3.bf16.msra.mxu0 %v7596_v12  ;;  %7615 = vmatpush3.bf16.msra.mxu1 %v7614_v13  ;;  %v4434_v12 = vld [vmem:[%s10355_s7 + $0x60] sm:$0xff]  ;;  %v4435_v13 = vld [vmem:[%s10355_s7 + $0x68] sm:$0xff] }
 0x384   :  { %7598 = vmatprep.subr.bf16.mxu0 %v7833_v3  ;;  %7616 = vmatprep.subr.bf16.mxu1 %v7833_v3 }
 0x387   :  { %7600 = vmatpush3.bf16.msra.mxu0 %v7599_v2  ;;  %7618 = vmatpush3.bf16.msra.mxu1 %v7617_v22 }
 0x388   :  { %7651 = vmatprep.subr.bf16.mxu1 %v7833_v3  ;;  %7620 = vmatprep.subr.bf16.mxu0 %v7619_v16  ;;  %v7647_v16 = vpack.c.bf16 %v4453_v21, %v4452_v20 }
 0x38a   :  { %6895 = vmatmul.mubr.msk.f32.vlgmr.msra.gmra.mrb[14].mxu0 %vm1335_vm10, %v9850_v24  ;;  %6922 = vmatmul.mubr.msk.f32.vlgmr.msra.gmra.mrb[14].mxu1 %vm1335_vm10, %v9850_v24  ;;  %v4423_v24 = vld [vmem:[%s10355_s7 + $0x8] sm:$0xff] }
 0x38b   :  { %6956 = vmatprep.mubr.msk.f32.mxu1 %vm7834_vm0, %v7835_v11  ;;  %v4440_v11 = vld [vmem:[%s10355_s7 + $0x90] sm:$0xff]  ;;  %v7621_v51 = vpack.c.bf16 %v4423_v24, %v4422_v34  ;;  %v7645_v34 = vpack.c.bf16 %v4435_v13, %v4434_v12 }
 0x38c   :  { %v7623_v35 = vpack.c.bf16 %v4441_v50, %v4440_v11 }
 0x38d   :  { %7622 = vmatpush3.bf16.msra.mxu0 %v7621_v51 }
 0x38e   :  { %7624 = vmatprep.subr.bf16.mxu0 %v7623_v35  ;;  %v4436_v35 = vld [vmem:[%s10355_s7 + $0x70] sm:$0xff] }
 0x391   :  { %7626 = vmatpush3.bf16.msra.mxu0 %v7625_v18  ;;  %v4543_v18 = vld [vmem:[%s10357_s9] sm:$0xff] }
 0x392   :  { %7628 = vmatprep.subr.bf16.mxu0 %v7627_v42 }
 0x395   :  { %7630 = vmatpush3.bf16.msra.mxu0 %v7629_v55  ;;  %v7658_v55 = vpack.c.bf16 %v4548_v63, %v4547_v57 }
 0x396   :  { %7632 = vmatprep.subr.bf16.mxu0 %v7631_v0  ;;  %v4549_v0 = vld [vmem:[%s10357_s9 + $0x30] sm:$0xff] }
 0x397   :  { %v7661_v17 = vpack.c.bf16 %v4550_v1, %v4549_v0 }
 0x399   :  { %7634 = vmatpush3.bf16.msra.mxu0 %v7633_v52  ;;  %v7664_v52 = vpack.c.bf16 %v4552_v45, %v4551_v31 }
 0x39a   :  { %7636 = vmatprep.subr.bf16.mxu0 %v7635_v43  ;;  %v4553_v43 = vld [vmem:[%s10357_s9 + $0x50] sm:$0xff] }
 0x39d   :  { %7638 = vmatpush3.bf16.msra.mxu0 %v7637_v56  ;;  %v4558_v56 = vld [vmem:[%s10357_s9 + $0x78] sm:$0xff] }
 0x39e   :  { %7640 = vmatprep.subr.bf16.mxu0 %v7639_v59 }
 0x3a1   :  { %7642 = vmatpush3.bf16.msra.mxu0 %v7641_v14 }
 0x3a2   :  { %7644 = vmatprep.subr.bf16.mxu0 %v7643_v19 }
 0x3a5   :  { %7646 = vmatpush3.bf16.msra.mxu0 %v7645_v34 }
 0x3a6   :  { %7648 = vmatprep.subr.bf16.mxu0 %v7647_v16 }
 0x45d   :  { %v4274_v5 = vpop.f32.mrb[14].mxu0  ;;  %v4357_v54 = vpop.f32.mrb[14].mxu1 }
 0x45e   :  { %v4362_v61 = vmax.f32 %v4274_v5, %v4357_v54  ;;  %v6896_v7 = vpop.f32.mrb[15].mxu0  ;;  %v6923_v9 = vpop.f32.mrb[15].mxu1  ;;  %v4554_v5 = vld [vmem:[%s10357_s9 + $0x58] sm:$0xff] }
 0x45f   :  { %v7667_v54 = vpack.c.bf16 %v4554_v5, %v4553_v43 }
 0x460   :  { %v4364_v46 = vcombine.high %v4362_v61, %v4362_v61  ;;  %v4371_v30 = vrot.slane %v4362_v61, %v8527_v33 }
 0x462   :  { %v4378_v62 = vrot.slane %v4364_v46, %v8527_v33  ;;  %v5165_v53 = vrot.slane %v4371_v30, 9  ;;  %v4379_v8 = vcombine.high %v4371_v30, %v4371_v30  ;;  %v7670_v46 = vpack.c.bf16 %v4556_v36, %v4555_v29 }
 0x464   :  { %v5167_v38 = vrot.slane %v4378_v62, 9  ;;  %v4397_v58 = vmax.f32 %v4371_v30, %v5165_v53  ;;  %v5166_v6 = vrot.slane %v4379_v8, 9  ;;  %v4380_v33 = vcombine.high %v4378_v62, %v4378_v62  ;;  %v4557_v30 = vld [vmem:[%s10357_s9 + $0x70] sm:$0xff] }
 0x465   :  { %v7673_v48 = vpack.c.bf16 %v4558_v56, %v4557_v30 }
 0x466   :  { %v4398_v2 = vmax.f32 %v4379_v8, %v5166_v6  ;;  %v5168_v22 = vrot.slane %v4380_v33, 9  ;;  %v4401_v37 = vadd.f32 %v4397_v58, %v9617_v60  ;;  %v4399_v44 = vmax.f32 %v4378_v62, %v5167_v38  ;;  %v5169_v62 = vld [vmem:[%s10356_s8] ss:$0 sm:$0xff] }
 0x468   :  { %v4402_v24 = vadd.f32 %v4398_v2, %v2243_v23  ;;  %v4400_v11 = vmax.f32 %v4380_v33, %v5168_v22  ;;  %v4405_v50 = vmax.f32 %v4401_v37, 0.0  ;;  %v4403_v51 = vadd.f32 %v4399_v44, %v9636_v15  ;;  %v4544_v15 = vld [vmem:[%s10357_s9 + $0x8] sm:$0xff] }
 0x469   :  { %v7649_v23 = vpack.c.bf16 %v4437_v4, %v4436_v35  ;;  %v7652_v42 = vpack.c.bf16 %v4544_v15, %v4543_v18 }
 0x46a   :  { %v4406_v25 = vmax.f32 %v4402_v24, 0.0  ;;  %v4404_v40 = vadd.f32 %v4400_v11, %v2244_v49  ;;  %4409 = vst.msk [vmem:[#allocation2 + $0x1] sm:$0x1] %vm2257_vm11, %v4405_v50  ;;  %v4407_v60 = vmax.f32 %v4403_v51, 0.0  ;;  %v4545_v49 = vld [vmem:[%s10357_s9 + $0x10] sm:$0xff]  ;;  %s7809_s9 = scalar_lea.vmem %s4645_s20, 32 }
 0x46b   :  { %7650 = vmatpush3.bf16.msra.mxu0 %v7649_v23  ;;  %7653 = vmatpush3.bf16.msra.mxu1 %v7652_v42  ;;  %v7655_v39 = vpack.c.bf16 %v4546_v47, %v4545_v49  ;;  %p7810_p0 = scmp.ne.s32.totalorder %s4645_s20, %s7809_s9  ;;  %p7815_p2 = scmp.lt.s32.totalorder %s7809_s9, %s7809_s9 }
 0x46c   :  { %4411 = vrot.lane.b32.xlu1 %v4406_v25, %s7837_s6  ;;  %4415 = vst.msk [vmem:[#allocation2 + $0x3] sm:$0x1] %vm2257_vm11, %v4407_v60  ;;  %v4408_v41 = vmax.f32 %v4404_v40, 0.0  ;;  %7654 = vmatprep.subr.bf16.mxu1 %v7833_v3 }
 0x46d   :  { %p7816_p3 = por %p7815_p2, %p7814_p1 }
 0x46f   :  { %7656 = vmatpush3.bf16.msra.mxu1 %v7655_v39  ;;  %p7817_p4 = pnand %p7816_p3, %p7810_p0 }
 0x470   :  { %4417 = vrot.lane.b32.xlu1 %v4408_v41, %s7837_s6  ;;  %7657 = vmatprep.subr.bf16.mxu1 %v7833_v3 }
 0x473   :  { %7659 = vmatpush3.bf16.msra.mxu1 %v7658_v55 }
 0x474   :  { %7660 = vmatprep.subr.bf16.mxu1 %v7833_v3 }
 0x477   :  { %7662 = vmatpush3.bf16.msra.mxu1 %v7661_v17 }
 0x478   :  { %7663 = vmatprep.subr.bf16.mxu1 %v7833_v3 }
 0x47b   :  { %7665 = vmatpush3.bf16.msra.mxu1 %v7664_v52 }
 0x47c   :  { %7666 = vmatprep.subr.bf16.mxu1 %v7833_v3 }
 0x47f   :  { %7668 = vmatpush3.bf16.msra.mxu1 %v7667_v54 }
 0x480   :  { %7669 = vmatprep.subr.bf16.mxu1 %v7833_v3 }
 0x483   :  { %7671 = vmatpush3.bf16.msra.mxu1 %v7670_v46 }
 0x484   :  { %7672 = vmatprep.subr.bf16.mxu1 %v7833_v3  ;;  %v5171_v3 = vld [vmem:[%s10358_s10] ss:$0 sm:$0xff] }
 0x487   :  { %7674 = vmatpush3.bf16.msra.mxu1 %v7673_v48 }
 0x4de   :  { %v4412_v61 = vpop.permute.xlu1 %4411 }
 0x4df   :  { %4414 = vst.msk [vmem:[#allocation2 + $0x1] sm:$0x1] %vm2263_vm12, %v4412_v61 }
 0x4e2   :  { %v4418_v7 = vpop.permute.xlu1 %4417 }
 0x4e3   :  { %4420 = vst.msk [vmem:[#allocation2 + $0x3] sm:$0x1] %vm2263_vm12, %v4418_v7 }
 0x4ea   :  { %v5170_v9 = vld.sshfl [vmem:[#allocation2] sm:$0x33 pattern:$0x76325410] }
 0x4eb   :  { %v4469_v32 = vcombine.high %v5170_v9, %v5170_v9 }
 0x4ed   :  { %4536 = vmatprep.mubr.f32.mxu0 %v4469_v32 }
 0x4ee   :  { %4537 = vmatmul.mubr.f32.vlgmr.msra.gmra.mrb[16].mxu0 %v5170_v9 }
 0x5c1   :  { %v5744_v59 = vpop.f32.mrb[16].mxu0 }
 0x5c2   :  { %v5745_v53 = vpop.f32.mrb[17].mxu0 }
 0x5c3   :  { %v5746_v8 = vadd.f32 %v5745_v53, %v5744_v59 }
 0x5c5   :  { %v4539_v27 = vadd.f32 %v5746_v8, %v5169_v62 }
 0x5c7   :  { %v4542_v28 = vmax.f32 %v4539_v27, 0.0 }
 0x5c9   :  { %6957 = vmatmul.mubr.f32.vlgmr.msra.gmra.mrb[16].mxu1 %v4542_v28 }
 0x69c   :  { %v4632_v26 = vpop.f32.mrb[16].mxu1 }
 0x69d   :  { %v4633_v38 = vadd.f32 %v5171_v3, %v4632_v26  ;;  %v6958_v58 = vpop.f32.mrb[17].mxu1 }
 0x69f   :  { %v4636_v6 = vmax.f32 %v4633_v38, 0.0 }
 0x6a1   :  { %4637 = vst [vmem:[#allocation3] sm:$0x3] %v4636_v6 }
 0x6a2   :  { %7820 = shalt.err (!%p7817_p4)
}
 0x6a3   :  { %s7821_s4 = scalar_lea.hbm %s10359_s11, 32 }
 0x6a4   :  { %p7822_p5 = scmp.ne.s32.totalorder %s10359_s11, %s7821_s4  ;;  %p7825_p6 = scmp.lt.u32.totalorder %s7821_s4, %s10359_s11 }
 0x6a6   :  { %p7827_p7 = pnand %p7825_p6, %p7822_p5 }
 0x6a8   :  { %7830 = shalt.err (!%p7827_p7)
}
 0x6a9   :  { %4647 = dma.vmem_to_hbm [thread:$0]  %s4645_s20, 32, %s10359_s11, [#allocation4]  }
 0x6aa   :  { %7831 = dma.done.wait [#allocation4], 32  }
 0x6ab   :  { %7832 = vsyncadd [#allocation4], 4294967264 }
 0x6ac   :  { %4651 = vsyncpa [#allocation4], 1 }

</bundles_post_ra>
